<compile_context>
chip_gen: v5e
topology: v5e:2x2
jax: 0.10.0
libtpu: 0.0.40
codegen_flags: <defaults>
</compile_context>

<pallas_src>
import functools

import jax
import jax.numpy as jnp
from jax import lax
from jax.experimental import pallas as pl
from jax.experimental.pallas import tpu as pltpu

# Keep f32 matmuls exact-ish on TPU (both in-kernel and in the pure-JAX reference)
# so the fused kernel matches the reference tightly.
jax.config.update("jax_default_matmul_precision", "highest")

_HI = lax.Precision.HIGHEST


# ----------------------------------------------------------------------------
# Pallas kernel: fused embedding gather + GMF branch + MLP branch + NeuMF head
# for one batch tile.  All activations are (features, tb): batch on lanes.
# ----------------------------------------------------------------------------
def neumf_kernel(n_mlp_layers, d_gmf, *refs):
    # refs layout (inputs then output):
    #   [0] ids (1, 2, tb) i32             row 0 = user ids, row 1 = item ids
    #   [1] user_tab (Dg+Dm, Nu_p) f32     stacked [gmf_user_emb.T ; mlp_user_emb.T]
    #   [2] item_tab (Dg+Dm, Ni_p) f32     stacked [gmf_item_emb.T ; mlp_item_emb.T]
    #   [3] gmf_h_w (1, Dg)
    #   [4] w0_user (U0, Dm)  [5] w0_item (U0, Dm)  [6] b0 (U0, 1)
    #   then for k = 1 .. n_mlp_layers-1:  w_k (U_k, U_{k-1}), b_k (U_k, 1)
    #   then w_m (1, U_last)               NeuMF-head weights for the MLP columns
    #   then scalars (3,) f32 in SMEM: [gmf_h_b, neumf_w_gmf, neumf_b]
    #   [-1] out (1, 1, tb)
    ids_ref = refs[0]
    user_tab, item_tab = refs[1], refs[2]
    gmf_h_w = refs[3]
    w0u, w0i, b0 = refs[4], refs[5], refs[6]
    r = 7
    hidden = []
    for _ in range(n_mlp_layers - 1):
        hidden.append((refs[r], refs[r + 1]))
        r += 2
    w_m, scal, out_ref = refs[r], refs[r + 1], refs[r + 2]

    ids = ids_ref[0]                       # (2, tb) int32, batch on lanes
    uid = ids[0:1, :]                      # (1, tb)
    iid = ids[1:2, :]                      # (1, tb)

    def onehot(idx_row, vocab):
        # (vocab, tb) one-hot selector built on the VPU, consumed by the MXU.
        row_ids = lax.broadcasted_iota(jnp.int32, (vocab, idx_row.shape[-1]), 0)
        return (row_ids == idx_row).astype(jnp.float32)

    # Fused gathers: stacked tables -> one matmul per side: (Dg+Dm, vocab)@(vocab, tb).
    eu = jnp.dot(user_tab[...], onehot(uid, user_tab.shape[1]),
                 preferred_element_type=jnp.float32, precision=_HI)   # (Dg+Dm, tb)
    ei = jnp.dot(item_tab[...], onehot(iid, item_tab.shape[1]),
                 preferred_element_type=jnp.float32, precision=_HI)   # (Dg+Dm, tb)

    gu, mu = eu[:d_gmf], eu[d_gmf:]        # sublane split (d_gmf multiple of 8)
    gi, mi = ei[:d_gmf], ei[d_gmf:]

    # --- GMF branch: elementwise product -> linear -> sigmoid ---
    mf = gu * gi                                                     # (Dg, tb)
    gmf_logit = (jnp.dot(gmf_h_w[...], mf,
                         preferred_element_type=jnp.float32, precision=_HI)
                 + scal[0])                                          # (1, tb)
    gmf_out = jax.nn.sigmoid(gmf_logit)

    # --- MLP branch: layer 0 consumes concat([mu, mi]) via split weights ---
    h = (jnp.dot(w0u[...], mu, preferred_element_type=jnp.float32, precision=_HI)
         + jnp.dot(w0i[...], mi, preferred_element_type=jnp.float32, precision=_HI)
         + b0[...])                                                  # (U0, tb)
    h = jnp.maximum(h, 0.0)
    for w_ref, b_ref in hidden:
        h = jnp.maximum(
            jnp.dot(w_ref[...], h, preferred_element_type=jnp.float32,
                    precision=_HI) + b_ref[...],
            0.0)

    # --- NeuMF head: concat([gmf_out, mlp_out]) @ W + b via scalar + split weights ---
    logit = (scal[1] * gmf_out
             + jnp.dot(w_m[...], h, preferred_element_type=jnp.float32,
                       precision=_HI)
             + scal[2])                                              # (1, tb)
    out_ref[0] = jax.nn.sigmoid(logit)                               # lane-dense store


# ----------------------------------------------------------------------------
# Wrapper: weight re-layout + pallas_call over lane-major batch tiles.
# ----------------------------------------------------------------------------
def neumf_forward(params, user_vector, item_vector, *, tb=256):
    Dg = params["gmf_user_emb"].shape[1]
    Dm = params["mlp_user_emb"].shape[1]
    n_mlp_layers = len(params["mlp_weights"])

    B = user_vector.shape[0]
    num_tiles = pl.cdiv(B, tb)
    padded = num_tiles * tb
    pad = padded - B

    # Pack user/item ids into one (num_tiles, 2, tb) i32 array -> one input DMA/tile.
    ids = jnp.stack([jnp.pad(user_vector.astype(jnp.int32), (0, pad)),
                     jnp.pad(item_vector.astype(jnp.int32), (0, pad))], axis=0)
    ids = ids.reshape(2, num_tiles, tb).transpose(1, 0, 2)

    # Stacked, transposed tables: (Dg+Dm, vocab) so gathered activations come out
    # feature-major.  Pad vocab to a multiple of 8 for clean sublane layout of the
    # one-hot (padded rows are zero and never selected).
    def stack_tabs(gmf_tab, mlp_tab):
        tab = jnp.concatenate([gmf_tab.T, mlp_tab.T], axis=0)       # (Dg+Dm, V)
        v = tab.shape[1]
        vp = ((v + 7) // 8) * 8
        return jnp.pad(tab, ((0, 0), (0, vp - v)))

    user_tab = stack_tabs(params["gmf_user_emb"], params["mlp_user_emb"])
    item_tab = stack_tabs(params["gmf_item_emb"], params["mlp_item_emb"])

    # PyTorch linear weights are (out, in) which is exactly the W @ x orientation.
    gmf_h_w = params["gmf_h_w"]                        # (1, Dg)
    w0 = params["mlp_weights"][0]                      # (U0, 2*Dm)
    w0u, w0i = w0[:, :Dm], w0[:, Dm:]
    b0 = params["mlp_biases"][0].reshape(-1, 1)

    weight_inputs = [user_tab, item_tab, gmf_h_w, w0u, w0i, b0]
    for k in range(1, n_mlp_layers):
        weight_inputs.append(params["mlp_weights"][k])
        weight_inputs.append(params["mlp_biases"][k].reshape(-1, 1))
    weight_inputs.append(params["neumf_w"][:, 1:])     # (1, mlp_out) head MLP columns

    # True scalars go to SMEM: [gmf head bias, neumf weight on gmf column, neumf bias].
    scalars = jnp.stack([params["gmf_h_b"][0],
                         params["neumf_w"][0, 0],
                         params["neumf_b"][0]]).astype(jnp.float32)

    grid = (num_tiles,)
    in_specs = [pl.BlockSpec((1, 2, tb), lambda i: (i, 0, 0))]
    # Resident weights/tables: constant index_map -> fetched once, not per step.
    in_specs += [pl.BlockSpec(w.shape, lambda i: (0, 0)) for w in weight_inputs]
    in_specs += [pl.BlockSpec(memory_space=pltpu.MemorySpace.SMEM)]
    out_spec = pl.BlockSpec((1, 1, tb), lambda i: (i, 0, 0))

    kernel = functools.partial(neumf_kernel, n_mlp_layers, Dg)
    out = pl.pallas_call(
        kernel,
        grid=grid,
        in_specs=in_specs,
        out_specs=out_spec,
        out_shape=jax.ShapeDtypeStruct((num_tiles, 1, tb), jnp.float32),
        compiler_params=pltpu.CompilerParams(dimension_semantics=("parallel",)),
    )(ids, *weight_inputs, scalars)

    return out.reshape(padded)[:B].reshape(B, 1)


# ----------------------------------------------------------------------------
# Deterministic parameter init (synthetic weights, PyTorch-like shapes).
# ----------------------------------------------------------------------------
def init_params(key, n_users, n_items, gmf_dim, mlp_dim, n_mlp_layers):
    keys = iter(jax.random.split(key, 8 + 2 * n_mlp_layers + 2))
    p = {
        "gmf_user_emb": jax.random.normal(next(keys), (n_users, gmf_dim), jnp.float32),
        "gmf_item_emb": jax.random.normal(next(keys), (n_items, gmf_dim), jnp.float32),
        "mlp_user_emb": jax.random.normal(next(keys), (n_users, mlp_dim), jnp.float32),
        "mlp_item_emb": jax.random.normal(next(keys), (n_items, mlp_dim), jnp.float32),
        "gmf_h_w": 0.1 * jax.random.normal(next(keys), (1, gmf_dim), jnp.float32),
        "gmf_h_b": 0.1 * jax.random.normal(next(keys), (1,), jnp.float32),
    }
    mlp_ws, mlp_bs = [], []
    units = mlp_dim * 2
    for _ in range(n_mlp_layers):
        mlp_ws.append(0.1 * jax.random.normal(next(keys), (units // 2, units), jnp.float32))
        mlp_bs.append(0.1 * jax.random.normal(next(keys), (units // 2,), jnp.float32))
        units //= 2
    p["mlp_weights"] = mlp_ws
    p["mlp_biases"] = mlp_bs
    mlp_out_dim = mlp_dim // (2 ** (n_mlp_layers - 1))
    p["neumf_w"] = 0.1 * jax.random.normal(next(keys), (1, mlp_out_dim + 1), jnp.float32)
    p["neumf_b"] = 0.1 * jax.random.normal(next(keys), (1,), jnp.float32)
    return p


# ----------------------------------------------------------------------------
# Pure-JAX reference (mirrors the PyTorch forward) for a correctness check.
# ----------------------------------------------------------------------------
def neumf_reference(params, user_vector, item_vector):
    gu = params["gmf_user_emb"][user_vector]
    gi = params["gmf_item_emb"][item_vector]
    mf = gu * gi
    gmf_out = jax.nn.sigmoid(mf @ params["gmf_h_w"].T + params["gmf_h_b"])

    mu = params["mlp_user_emb"][user_vector]
    mi = params["mlp_item_emb"][item_vector]
    h = jnp.concatenate([mu, mi], axis=1)
    for w, b in zip(params["mlp_weights"], params["mlp_biases"]):
        h = jax.nn.relu(h @ w.T + b)

    cat = jnp.concatenate([gmf_out, h], axis=1)
    return jax.nn.sigmoid(cat @ params["neumf_w"].T + params["neumf_b"])


if __name__ == "__main__":
    n_users, n_items = 64, 80
    gmf_latent_dim = 16
    mlp_latent_dim = 32
    n_mlp_layers = 3
    batch = 512          # two 256-wide lane tiles -> even grid (both v7x cores busy)

    key = jax.random.PRNGKey(0)
    k_par, k_u, k_i = jax.random.split(key, 3)
    params = init_params(k_par, n_users, n_items, gmf_latent_dim,
                         mlp_latent_dim, n_mlp_layers)
    user_vector = jax.random.randint(k_u, (batch,), 0, n_users, dtype=jnp.int32)
    item_vector = jax.random.randint(k_i, (batch,), 0, n_items, dtype=jnp.int32)

    out = neumf_forward(params, user_vector, item_vector, tb=256)
    out = jax.block_until_ready(out)

    ref = neumf_reference(params, user_vector, item_vector)
    assert out.shape == (batch, 1)
    assert jnp.allclose(out, ref, atol=2e-5, rtol=2e-5), "mismatch vs reference"

    print("KERNEL_OK")
</pallas_src>

<mosaic_0001>
module attributes {stable_mosaic.version = 11 : i64} {
  func.func @neumf_kernel(%arg0: i32, %arg1: memref<1x2x256xi32, #tpu.memory_space<vmem>>, %arg2: memref<48x64xf32, #tpu.memory_space<vmem>>, %arg3: memref<48x80xf32, #tpu.memory_space<vmem>>, %arg4: memref<1x16xf32, #tpu.memory_space<vmem>>, %arg5: memref<32x32xf32, #tpu.memory_space<vmem>>, %arg6: memref<32x32xf32, #tpu.memory_space<vmem>>, %arg7: memref<32x1xf32, #tpu.memory_space<vmem>>, %arg8: memref<16x32xf32, #tpu.memory_space<vmem>>, %arg9: memref<16x1xf32, #tpu.memory_space<vmem>>, %arg10: memref<8x16xf32, #tpu.memory_space<vmem>>, %arg11: memref<8x1xf32, #tpu.memory_space<vmem>>, %arg12: memref<1x8xf32, #tpu.memory_space<vmem>>, %arg13: memref<3xf32, #tpu.memory_space<smem>>, %arg14: memref<1x1x256xf32, #tpu.memory_space<vmem>>) attributes {dimension_semantics = [#tpu.dimension_semantics<parallel>], iteration_bounds = array<i64: 2>, scalar_prefetch = 0 : i64, scratch_operands = 0 : i64, tpu.core_type = #tpu.core_type<tc>, window_params = [{transform_indices = @transform_0, window_bounds = array<i64: 1, 2, 256>}, {pipeline_mode = #tpu.pipeline_mode<synchronous>, transform_indices = @transform_1, window_bounds = array<i64: 48, 64>}, {pipeline_mode = #tpu.pipeline_mode<synchronous>, transform_indices = @transform_2, window_bounds = array<i64: 48, 80>}, {pipeline_mode = #tpu.pipeline_mode<synchronous>, transform_indices = @transform_3, window_bounds = array<i64: 1, 16>}, {pipeline_mode = #tpu.pipeline_mode<synchronous>, transform_indices = @transform_4, window_bounds = array<i64: 32, 32>}, {pipeline_mode = #tpu.pipeline_mode<synchronous>, transform_indices = @transform_5, window_bounds = array<i64: 32, 32>}, {pipeline_mode = #tpu.pipeline_mode<synchronous>, transform_indices = @transform_6, window_bounds = array<i64: 32, 1>}, {pipeline_mode = #tpu.pipeline_mode<synchronous>, transform_indices = @transform_7, window_bounds = array<i64: 16, 32>}, {pipeline_mode = #tpu.pipeline_mode<synchronous>, transform_indices = @transform_8, window_bounds = array<i64: 16, 1>}, {pipeline_mode = #tpu.pipeline_mode<synchronous>, transform_indices = @transform_9, window_bounds = array<i64: 8, 16>}, {pipeline_mode = #tpu.pipeline_mode<synchronous>, transform_indices = @transform_10, window_bounds = array<i64: 8, 1>}, {pipeline_mode = #tpu.pipeline_mode<synchronous>, transform_indices = @transform_11, window_bounds = array<i64: 1, 8>}, {transform_indices = @transform_12, window_bounds = array<i64: 3>}, {transform_indices = @transform_13, window_bounds = array<i64: 1, 1, 256>}]} {
    %c0 = arith.constant 0 : index
    %c0_0 = arith.constant 0 : index
    %c0_1 = arith.constant 0 : index
    %0 = vector.load %arg1[%c0, %c0_0, %c0_1] : memref<1x2x256xi32, #tpu.memory_space<vmem>>, vector<1x2x256xi32>
    %1 = vector.shape_cast %0 : vector<1x2x256xi32> to vector<2x256xi32>
    %2 = vector.extract_strided_slice %1 {offsets = [0, 0], sizes = [1, 256], strides = [1, 1]} : vector<2x256xi32> to vector<1x256xi32>
    %3 = vector.extract_strided_slice %1 {offsets = [1, 0], sizes = [1, 256], strides = [1, 1]} : vector<2x256xi32> to vector<1x256xi32>
    %c0_2 = arith.constant 0 : index
    %c0_3 = arith.constant 0 : index
    %4 = vector.load %arg2[%c0_2, %c0_3] : memref<48x64xf32, #tpu.memory_space<vmem>>, vector<48x64xf32>
    %5 = tpu.iota {dimensions = array<i32: 0>} : vector<64x256xi32>
    %6 = vector.broadcast %2 : vector<1x256xi32> to vector<64x256xi32>
    %7 = arith.cmpi eq, %5, %6 : vector<64x256xi32>
    %8 = arith.extui %7 : vector<64x256xi1> to vector<64x256xi32>
    %9 = arith.sitofp %8 : vector<64x256xi32> to vector<64x256xf32>
    %cst = arith.constant dense<0.000000e+00> : vector<48x256xf32>
    %10 = tpu.matmul %4, %9, %cst {dimension_numbers = #tpu.dot_dimension_numbers<[1], [0], [0], [1], [0, 0, 1, 1], [], []>, precision = #tpu.contract_precision<fp32>} : vector<48x64xf32>, vector<64x256xf32>, vector<48x256xf32> -> vector<48x256xf32>
    %c0_4 = arith.constant 0 : index
    %c0_5 = arith.constant 0 : index
    %11 = vector.load %arg3[%c0_4, %c0_5] : memref<48x80xf32, #tpu.memory_space<vmem>>, vector<48x80xf32>
    %12 = tpu.iota {dimensions = array<i32: 0>} : vector<80x256xi32>
    %13 = vector.broadcast %3 : vector<1x256xi32> to vector<80x256xi32>
    %14 = arith.cmpi eq, %12, %13 : vector<80x256xi32>
    %15 = arith.extui %14 : vector<80x256xi1> to vector<80x256xi32>
    %16 = arith.sitofp %15 : vector<80x256xi32> to vector<80x256xf32>
    %cst_6 = arith.constant dense<0.000000e+00> : vector<48x256xf32>
    %17 = tpu.matmul %11, %16, %cst_6 {dimension_numbers = #tpu.dot_dimension_numbers<[1], [0], [0], [1], [0, 0, 1, 1], [], []>, precision = #tpu.contract_precision<fp32>} : vector<48x80xf32>, vector<80x256xf32>, vector<48x256xf32> -> vector<48x256xf32>
    %18 = vector.extract_strided_slice %10 {offsets = [0, 0], sizes = [16, 256], strides = [1, 1]} : vector<48x256xf32> to vector<16x256xf32>
    %19 = vector.extract_strided_slice %10 {offsets = [16, 0], sizes = [32, 256], strides = [1, 1]} : vector<48x256xf32> to vector<32x256xf32>
    %20 = vector.extract_strided_slice %17 {offsets = [0, 0], sizes = [16, 256], strides = [1, 1]} : vector<48x256xf32> to vector<16x256xf32>
    %21 = vector.extract_strided_slice %17 {offsets = [16, 0], sizes = [32, 256], strides = [1, 1]} : vector<48x256xf32> to vector<32x256xf32>
    %22 = arith.mulf %18, %20 : vector<16x256xf32>
    %c0_7 = arith.constant 0 : index
    %c0_8 = arith.constant 0 : index
    %23 = vector.load %arg4[%c0_7, %c0_8] : memref<1x16xf32, #tpu.memory_space<vmem>>, vector<1x16xf32>
    %cst_9 = arith.constant dense<0.000000e+00> : vector<1x256xf32>
    %24 = tpu.matmul %23, %22, %cst_9 {dimension_numbers = #tpu.dot_dimension_numbers<[1], [0], [0], [1], [0, 0, 1, 1], [], []>, precision = #tpu.contract_precision<fp32>} : vector<1x16xf32>, vector<16x256xf32>, vector<1x256xf32> -> vector<1x256xf32>
    %c0_10 = arith.constant 0 : index
    %25 = memref.load %arg13[%c0_10] : memref<3xf32, #tpu.memory_space<smem>>
    %26 = vector.broadcast %25 : f32 to vector<1x256xf32>
    %27 = arith.addf %24, %26 : vector<1x256xf32>
    %28 = arith.negf %27 : vector<1x256xf32>
    %29 = math.exp %28 : vector<1x256xf32>
    %cst_11 = arith.constant 1.000000e+00 : f32
    %30 = vector.broadcast %cst_11 : f32 to vector<1x256xf32>
    %31 = arith.addf %30, %29 : vector<1x256xf32>
    %32 = arith.divf %30, %31 : vector<1x256xf32>
    %c0_12 = arith.constant 0 : index
    %c0_13 = arith.constant 0 : index
    %33 = vector.load %arg5[%c0_12, %c0_13] : memref<32x32xf32, #tpu.memory_space<vmem>>, vector<32x32xf32>
    %cst_14 = arith.constant dense<0.000000e+00> : vector<32x256xf32>
    %34 = tpu.matmul %33, %19, %cst_14 {dimension_numbers = #tpu.dot_dimension_numbers<[1], [0], [0], [1], [0, 0, 1, 1], [], []>, precision = #tpu.contract_precision<fp32>} : vector<32x32xf32>, vector<32x256xf32>, vector<32x256xf32> -> vector<32x256xf32>
    %c0_15 = arith.constant 0 : index
    %c0_16 = arith.constant 0 : index
    %35 = vector.load %arg6[%c0_15, %c0_16] : memref<32x32xf32, #tpu.memory_space<vmem>>, vector<32x32xf32>
    %cst_17 = arith.constant dense<0.000000e+00> : vector<32x256xf32>
    %36 = tpu.matmul %35, %21, %cst_17 {dimension_numbers = #tpu.dot_dimension_numbers<[1], [0], [0], [1], [0, 0, 1, 1], [], []>, precision = #tpu.contract_precision<fp32>} : vector<32x32xf32>, vector<32x256xf32>, vector<32x256xf32> -> vector<32x256xf32>
    %37 = arith.addf %34, %36 : vector<32x256xf32>
    %c0_18 = arith.constant 0 : index
    %c0_19 = arith.constant 0 : index
    %38 = vector.load %arg7[%c0_18, %c0_19] : memref<32x1xf32, #tpu.memory_space<vmem>>, vector<32x1xf32>
    %39 = vector.broadcast %38 : vector<32x1xf32> to vector<32x256xf32>
    %40 = arith.addf %37, %39 : vector<32x256xf32>
    %cst_20 = arith.constant 0.000000e+00 : f32
    %41 = vector.broadcast %cst_20 : f32 to vector<32x256xf32>
    %42 = arith.maximumf %40, %41 : vector<32x256xf32>
    %c0_21 = arith.constant 0 : index
    %c0_22 = arith.constant 0 : index
    %43 = vector.load %arg8[%c0_21, %c0_22] : memref<16x32xf32, #tpu.memory_space<vmem>>, vector<16x32xf32>
    %cst_23 = arith.constant dense<0.000000e+00> : vector<16x256xf32>
    %44 = tpu.matmul %43, %42, %cst_23 {dimension_numbers = #tpu.dot_dimension_numbers<[1], [0], [0], [1], [0, 0, 1, 1], [], []>, precision = #tpu.contract_precision<fp32>} : vector<16x32xf32>, vector<32x256xf32>, vector<16x256xf32> -> vector<16x256xf32>
    %c0_24 = arith.constant 0 : index
    %c0_25 = arith.constant 0 : index
    %45 = vector.load %arg9[%c0_24, %c0_25] : memref<16x1xf32, #tpu.memory_space<vmem>>, vector<16x1xf32>
    %46 = vector.broadcast %45 : vector<16x1xf32> to vector<16x256xf32>
    %47 = arith.addf %44, %46 : vector<16x256xf32>
    %cst_26 = arith.constant 0.000000e+00 : f32
    %48 = vector.broadcast %cst_26 : f32 to vector<16x256xf32>
    %49 = arith.maximumf %47, %48 : vector<16x256xf32>
    %c0_27 = arith.constant 0 : index
    %c0_28 = arith.constant 0 : index
    %50 = vector.load %arg10[%c0_27, %c0_28] : memref<8x16xf32, #tpu.memory_space<vmem>>, vector<8x16xf32>
    %cst_29 = arith.constant dense<0.000000e+00> : vector<8x256xf32>
    %51 = tpu.matmul %50, %49, %cst_29 {dimension_numbers = #tpu.dot_dimension_numbers<[1], [0], [0], [1], [0, 0, 1, 1], [], []>, precision = #tpu.contract_precision<fp32>} : vector<8x16xf32>, vector<16x256xf32>, vector<8x256xf32> -> vector<8x256xf32>
    %c0_30 = arith.constant 0 : index
    %c0_31 = arith.constant 0 : index
    %52 = vector.load %arg11[%c0_30, %c0_31] : memref<8x1xf32, #tpu.memory_space<vmem>>, vector<8x1xf32>
    %53 = vector.broadcast %52 : vector<8x1xf32> to vector<8x256xf32>
    %54 = arith.addf %51, %53 : vector<8x256xf32>
    %cst_32 = arith.constant 0.000000e+00 : f32
    %55 = vector.broadcast %cst_32 : f32 to vector<8x256xf32>
    %56 = arith.maximumf %54, %55 : vector<8x256xf32>
    %c1 = arith.constant 1 : index
    %57 = memref.load %arg13[%c1] : memref<3xf32, #tpu.memory_space<smem>>
    %58 = vector.broadcast %57 : f32 to vector<1x256xf32>
    %59 = arith.mulf %58, %32 : vector<1x256xf32>
    %c0_33 = arith.constant 0 : index
    %c0_34 = arith.constant 0 : index
    %60 = vector.load %arg12[%c0_33, %c0_34] : memref<1x8xf32, #tpu.memory_space<vmem>>, vector<1x8xf32>
    %cst_35 = arith.constant dense<0.000000e+00> : vector<1x256xf32>
    %61 = tpu.matmul %60, %56, %cst_35 {dimension_numbers = #tpu.dot_dimension_numbers<[1], [0], [0], [1], [0, 0, 1, 1], [], []>, precision = #tpu.contract_precision<fp32>} : vector<1x8xf32>, vector<8x256xf32>, vector<1x256xf32> -> vector<1x256xf32>
    %62 = arith.addf %59, %61 : vector<1x256xf32>
    %c2 = arith.constant 2 : index
    %63 = memref.load %arg13[%c2] : memref<3xf32, #tpu.memory_space<smem>>
    %64 = vector.broadcast %63 : f32 to vector<1x256xf32>
    %65 = arith.addf %62, %64 : vector<1x256xf32>
    %66 = arith.negf %65 : vector<1x256xf32>
    %67 = math.exp %66 : vector<1x256xf32>
    %cst_36 = arith.constant 1.000000e+00 : f32
    %68 = vector.broadcast %cst_36 : f32 to vector<1x256xf32>
    %69 = arith.addf %68, %67 : vector<1x256xf32>
    %70 = arith.divf %68, %69 : vector<1x256xf32>
    %c0_37 = arith.constant 0 : index
    %c0_38 = arith.constant 0 : index
    %c0_39 = arith.constant 0 : index
    %71 = vector.load %arg14[%c0_37, %c0_38, %c0_39] : memref<1x1x256xf32, #tpu.memory_space<vmem>>, vector<1x1x256xf32>
    %72 = vector.shape_cast %71 : vector<1x1x256xf32> to vector<1x256xf32>
    %73 = vector.shape_cast %70 : vector<1x256xf32> to vector<1x1x256xf32>
    tpu.vector_store %arg14[%c0_37, %c0_38, %c0_39], %73 {strides = array<i32>} : memref<1x1x256xf32, #tpu.memory_space<vmem>>, vector<1x1x256xf32>,
    return
  }
  func.func @transform_0(%arg0: i32) -> (i32, i32, i32) {
    %c0_i32 = arith.constant 0 : i32
    %c0_i32_0 = arith.constant 0 : i32
    %c0_i32_1 = arith.constant 0 : i32
    return %arg0, %c0_i32, %c0_i32_0 : i32, i32, i32
  }
  func.func @transform_1(%arg0: i32) -> (i32, i32) {
    %c0_i32 = arith.constant 0 : i32
    %c0_i32_0 = arith.constant 0 : i32
    %c0_i32_1 = arith.constant 0 : i32
    return %c0_i32, %c0_i32_0 : i32, i32
  }
  func.func @transform_2(%arg0: i32) -> (i32, i32) {
    %c0_i32 = arith.constant 0 : i32
    %c0_i32_0 = arith.constant 0 : i32
    %c0_i32_1 = arith.constant 0 : i32
    return %c0_i32, %c0_i32_0 : i32, i32
  }
  func.func @transform_3(%arg0: i32) -> (i32, i32) {
    %c0_i32 = arith.constant 0 : i32
    %c0_i32_0 = arith.constant 0 : i32
    %c0_i32_1 = arith.constant 0 : i32
    return %c0_i32, %c0_i32_0 : i32, i32
  }
  func.func @transform_4(%arg0: i32) -> (i32, i32) {
    %c0_i32 = arith.constant 0 : i32
    %c0_i32_0 = arith.constant 0 : i32
    %c0_i32_1 = arith.constant 0 : i32
    return %c0_i32, %c0_i32_0 : i32, i32
  }
  func.func @transform_5(%arg0: i32) -> (i32, i32) {
    %c0_i32 = arith.constant 0 : i32
    %c0_i32_0 = arith.constant 0 : i32
    %c0_i32_1 = arith.constant 0 : i32
    return %c0_i32, %c0_i32_0 : i32, i32
  }
  func.func @transform_6(%arg0: i32) -> (i32, i32) {
    %c0_i32 = arith.constant 0 : i32
    %c0_i32_0 = arith.constant 0 : i32
    %c0_i32_1 = arith.constant 0 : i32
    return %c0_i32, %c0_i32_0 : i32, i32
  }
  func.func @transform_7(%arg0: i32) -> (i32, i32) {
    %c0_i32 = arith.constant 0 : i32
    %c0_i32_0 = arith.constant 0 : i32
    %c0_i32_1 = arith.constant 0 : i32
    return %c0_i32, %c0_i32_0 : i32, i32
  }
  func.func @transform_8(%arg0: i32) -> (i32, i32) {
    %c0_i32 = arith.constant 0 : i32
    %c0_i32_0 = arith.constant 0 : i32
    %c0_i32_1 = arith.constant 0 : i32
    return %c0_i32, %c0_i32_0 : i32, i32
  }
  func.func @transform_9(%arg0: i32) -> (i32, i32) {
    %c0_i32 = arith.constant 0 : i32
    %c0_i32_0 = arith.constant 0 : i32
    %c0_i32_1 = arith.constant 0 : i32
    return %c0_i32, %c0_i32_0 : i32, i32
  }
  func.func @transform_10(%arg0: i32) -> (i32, i32) {
    %c0_i32 = arith.constant 0 : i32
    %c0_i32_0 = arith.constant 0 : i32
    %c0_i32_1 = arith.constant 0 : i32
    return %c0_i32, %c0_i32_0 : i32, i32
  }
  func.func @transform_11(%arg0: i32) -> (i32, i32) {
    %c0_i32 = arith.constant 0 : i32
    %c0_i32_0 = arith.constant 0 : i32
    %c0_i32_1 = arith.constant 0 : i32
    return %c0_i32, %c0_i32_0 : i32, i32
  }
  func.func @transform_12(%arg0: i32) -> i32 {
    %c0_i32 = arith.constant 0 : i32
    %c0_i32_0 = arith.constant 0 : i32
    return %c0_i32 : i32
  }
  func.func @transform_13(%arg0: i32) -> (i32, i32, i32) {
    %c0_i32 = arith.constant 0 : i32
    %c0_i32_0 = arith.constant 0 : i32
    %c0_i32_1 = arith.constant 0 : i32
    return %arg0, %c0_i32, %c0_i32_0 : i32, i32, i32
  }
}

</mosaic_0001>

<bundles_post_ra>
// kernel: tpu_custom_call.1
= control target key start
LH: loop header
LB: loop body
LE: loop exit
PB: predicated region body
PF: predicated region fallthrough
CT: control target
= control target key end

     0   :  { %s8336_s0 = inlined_call_operand.vmem [shape: s32[2,2,256], index: 0, kind: input, shape index: {}]   ;;  %s8337_s1 = inlined_call_operand.vmem [shape: f32[48,64], index: 1, kind: input, shape index: {}]   ;;  %s8338_s2 = inlined_call_operand.hbm [shape: f32[48,80], index: 2, kind: input, shape index: {}]   ;;  %s8339_s3 = inlined_call_operand.vmem [shape: f32[1,16], index: 3, kind: input, shape index: {}]   ;;  %s8340_s4 = inlined_call_operand.hbm [shape: f32[32,32], index: 4, kind: input, shape index: {}]   ;;  %s8341_s5 = inlined_call_operand.hbm [shape: f32[32,32], index: 5, kind: input, shape index: {}]   ;;  %s8342_s6 = inlined_call_operand.vmem [shape: f32[32,1], index: 6, kind: input, shape index: {}]   ;;  %s8343_s7 = inlined_call_operand.hbm [shape: f32[16,32], index: 7, kind: input, shape index: {}]   ;;  %s8344_s8 = inlined_call_operand.vmem [shape: f32[16,1], index: 8, kind: input, shape index: {}]   ;;  %s8345_s9 = inlined_call_operand.hbm [shape: f32[8,16], index: 9, kind: input, shape index: {}]   ;;  %s8346_s10 = inlined_call_operand.vmem [shape: f32[8,1], index: 10, kind: input, shape index: {}]   ;;  %s8347_s11 = inlined_call_operand.vmem [shape: f32[1,8], index: 11, kind: input, shape index: {}]   ;;  %s8348_s12 = inlined_call_operand.vmem [shape: f32[3], index: 12, kind: input, shape index: {}]   ;;  %s8349_s13 = inlined_call_operand.hbm [shape: f32[2,1,256], index: 13, kind: output, shape index: {}]  }
   0x1   :  { %8364 = sst [smem:[#allocation52_spill]] %s8340_s4 }
   0x2   :  { %8365 = sst [smem:[#allocation53_spill]] %s8343_s7 }
   0x3   :  { %18 = vsyncpa [#allocation3], 0 }
   0x4   :  { %19 = vsyncpa [#allocation7], 0 }
   0x5   :  { %20 = vsyncpa [#allocation10], 0 }
   0x6   :  { %21 = vsyncpa [#allocation5], 0 }
   0x7   :  { %22 = vsyncpa [#allocation4], 0 }
   0x8   :  { %24 = vsyncpa [#allocation4 + $0x1], 0  ;;  %s5787_s25 = smov 0   ;;  %s5789_s26 = smov 0  }
   0x9   :  { %s5791_s27 = smov 0   ;;  %s5793_s28 = smov 0  }
   0xa LB: > { %8366 = sst [smem:[#allocation19_spill]] %s5692_s25  ;;  %s5808_s29 = sadd.s32 4294967295, %s5704_s28   ;;  %s5704_s28 = sphi %s5793_s28, %s8468_s28   ;;  %s5700_s27 = sphi %s5791_s27, %s8470_s27   ;;  %s5696_s26 = sphi %s5789_s26, %s8472_s26   ;;  %s5692_s25 = sphi %s5787_s25, %s8471_s25  }
   0xb   : > { %8367 = sst [smem:[#allocation20_spill]] %s5700_s27  ;;  %s5163_s30 = sadd.s32 4294967294, %s5704_s28  }
   0xc   : > { %8368 = sst [smem:[#allocation21_spill]] %s5704_s28  ;;  %s5812_s14 = sadd.s32 1, %s5704_s28  }
   0xd   : > { %8369 = sst [smem:[#allocation22_spill]] %s5812_s14  ;;  %s315_s15 = sadd.s32 1, %s5700_s27 }
   0xe   : > { %s312_s16 = ssub.s32 %s5704_s28, %s5812_s14  ;;  %p325_p0 = scmp.ne.s32.totalorder %s5700_s27, %s5696_s26 }
   0xf   : > { %p313_p1 = scmp.eq.s32.totalorder %s312_s16, 0  ;;  %p326_p2 = scmp.eq.s32.totalorder %s5808_s29, 1 }
  0x10   : > { %p331_p3 = scmp.ne.s32.totalorder %s5696_s26, %s5692_s25  ;;  %p332_p4 = scmp.eq.s32.totalorder %s5163_s30, 1 }
  0x11   : > { %s5823_s17 = scalar_select %p313_p1, %s5700_s27, %s315_s15  }
  0x12   : > { %p5825_p5 = por %p326_p2, %p325_p0  ;;  %p5829_p6 = por %p332_p4, %p331_p3 }
  0x13   : > { %8370 = sst [smem:[#allocation23_spill]] %s5823_s17  ;;  %p5164_p7 = scmp.ge.s32.totalorder %s5704_s28, 1 }
  0x14   : > { %s8371_s18 = scalar_select %p5825_p5, 1, 0 }
  0x15   : > { %s8373_s19 = scalar_select %p5829_p6, 1, 0 }
  0x16   : > { %8372 = sst [smem:[#allocation24_spill]] %s8371_s18  ;;  %p339_p8 = scmp.lt.s32.totalorder %s5704_s28, 3 }
  0x17   : > { %8374 = sst [smem:[#allocation25_spill]] %s8373_s19  ;;  %p5386_p9 = scmp.eq.s32.totalorder %s5808_s29, 0 }
  0x18   : > { %p5836_p10 = pnand %p5164_p7, %p339_p8  ;;  %s8376_s4 = sld [smem:[#allocation52_spill]] }
  0x19   : > { %s8377_s7 = sld [smem:[#allocation53_spill]]  ;;  %s5706_s17 = smov [#allocation6]  }
  0x1a   : > { %p5363_p11 = pneg %p5836_p10  ;;  %s372_s27 = sshll.u32 %s5706_s17, 4  ;;  %s373_s27 = int_to_ptr.vmem [resolvable:$true] %s372_s27 }
  0x1b   : > { %s5707_s21 = smov 128   ;;  %s5708_s22 = smov 8  }
  0x1c   : > { %p5850_p12 = pnand %p5386_p9, %p5363_p11  ;;  %s384_s25 = sshll.u32 %s8341_s5, 4  ;;  %s385_s25 = int_to_ptr.hbm [resolvable:$true] %s384_s25 }
  0x1d   : > { %s5710_s28 = smov [#allocation2]   ;;  %s419_s30 = sshll.u32 %s8345_s9, 4  ;;  %s420_s30 = int_to_ptr.hbm [resolvable:$true] %s419_s30 }
  0x1e   : > { %s370_s23 = sshll.u32 %s8376_s4, 4  ;;  %s5709_s4 = smov [#allocation9]   ;;  %s371_s23 = int_to_ptr.hbm [resolvable:$true] %s370_s23 }
  0x1f   : > { %s401_s15 = sshll.u32 %s8377_s7, 4  ;;  %s403_s14 = sshll.u32 %s5709_s4, 4  ;;  %s402_s15 = int_to_ptr.hbm [resolvable:$true] %s401_s15  ;;  %s404_s14 = int_to_ptr.vmem [resolvable:$true] %s403_s14 }
  0x20   : > { %5369 = dma.hbm_to_vmem [thread:$0]  (!%p5850_p12), %s371_s23, 512, %s373_s27, [#allocation7], %s5707_s21, %s5707_s21, %s5708_s22  }
  0x21   : > { %s353_s7 = sshll.u32 %s8338_s2, 4  ;;  %s355_s18 = sshll.u32 %s5710_s28, 4  ;;  %s354_s7 = int_to_ptr.hbm [resolvable:$true] %s353_s7  ;;  %s356_s18 = int_to_ptr.vmem [resolvable:$true] %s355_s18 }
  0x22   : > { %5375 = dma.hbm_to_vmem [thread:$0]  (!%p5850_p12), %s402_s15, 256, %s404_s14, [#allocation10], %s5707_s21, %s5707_s21, %s5708_s22  }
  0x23   : > { %5366 = dma.hbm_to_vmem [thread:$0]  (!%p5850_p12), %s354_s7, 768, %s356_s18, [#allocation3], %s5707_s21, %s5707_s21, %s5708_s22  }
  0x24   : > { %s5711_s4 = smov [#allocation8]   ;;  %s437_s15 = sshll.u32 %s8348_s12, 4  ;;  %s438_s15 = int_to_ptr.vmem [resolvable:$true] %s437_s15 }
  0x25   : > { %s386_s27 = sshll.u32 %s5711_s4, 4  ;;  %s5712_s28 = smov [#allocation11]   ;;  %s387_s27 = int_to_ptr.vmem [resolvable:$true] %s386_s27 }
  0x26   : > { %5372 = dma.hbm_to_vmem [thread:$0]  (!%p5850_p12), %s385_s25, 512, %s387_s27, [#allocation7], %s5707_s21, %s5707_s21, %s5708_s22  }
  0x27   : > { %s421_s17 = sshll.u32 %s5712_s28, 4  ;;  %s5713_s7 = smov [#allocation12]   ;;  %s422_s17 = int_to_ptr.vmem [resolvable:$true] %s421_s17 }
  0x28   : > { %5378 = dma.hbm_to_vmem [thread:$0]  (!%p5850_p12), %s420_s30, 128, %s422_s17, [#allocation10]  }
  0x29   : > { %5381 = dma.vmem_to_smem (!%p5850_p12), %s438_s15, 16, %s5713_s7, [#allocation5]  }
  0x2a   : > { %458 = sbr.rel (%p5836_p10) target bundleno = 1352 (0x548), region = 72 }
  0x2f   : > { %5671 = dma.done.wait (%p5386_p9), [#allocation3], 768  }
  0x30   : > { %5673 = vsyncadd (%p5386_p9), [#allocation3], 4294966528 }
  0x31   : > { %5675 = dma.done.wait (%p5386_p9), [#allocation7], 1024  }
  0x32   : > { %5677 = vsyncadd (%p5386_p9), [#allocation7], 4294966272 }
  0x33   : > { %5679 = dma.done.wait (%p5386_p9), [#allocation10], 384  }
  0x34   : > { %5681 = vsyncadd (%p5386_p9), [#allocation10], 4294966912 }
  0x35   : > { %5683 = dma.done.wait (%p5386_p9), [#allocation5], 16  }
  0x36   : > { %5685 = vsyncadd (%p5386_p9), [#allocation5], 4294967280 }
  0x37   : > { %490 = sfence }
  0x38   : > { %p529_p13 = scmp.lt.s32.totalorder %s5808_s29, 1  ;;  %v8359_v0 = vlaneseq  ;;  %v535_v1 = vld [vmem:[%s8337_s1] sm:$0xff]  ;;  %vm602_vm0 = vcmask 523264   ;;  %v536_v2 = vld [vmem:[%s8337_s1 + $0x8] sm:$0xff]  ;;  %v537_v15 = vld [vmem:[%s8337_s1 + $0x10] sm:$0xff]  ;;  %v5714_v23 = vmov 1.0  }
  0x39   : > { %v604_v3 = vsel %vm602_vm0, %v535_v1, 0  ;;  %v607_v6 = vsel %vm602_vm0, %v536_v2, 0  ;;  %v5955_v22 = vsel %vm602_vm0, %v537_v15, 0  ;;  %v5715_v24 = vmov 0.0   ;;  %v538_v59 = vld [vmem:[%s8337_s1 + $0x18] sm:$0xff]  ;;  %s7905_s4 = sld [smem:[#allocation12]] }
  0x3a   : > { %s530_s21 = scalar_select %p529_p13, %s5808_s29, 1  ;;  %v5906_v4 = vshrl.u32 %v8359_v0, 7  ;;  %v5908_v5 = vand.u32 4294901760, %v604_v3  ;;  %v5922_v10 = vand.u32 4294901760, %v607_v6  ;;  %v6086_v55 = vand.u32 4294901760, %v5955_v22 }
  0x3b   : > { %s8284_s20 = sld [smem:[#allocation12 + $0x1]]  ;;  %s5646_s18 = scalar_lea.hbm %s8349_s13, 4 }
  0x3c   : > { %s5336_s22 = sshll.u32 %s530_s21, 2  ;;  %v5917_v8 = vadd.s32 56, %v5906_v4  ;;  %v5920_v9 = vsub.f32 %v604_v3, %v5908_v5  ;;  %v5926_v12 = vadd.s32 48, %v5906_v4  ;;  %v5929_v13 = vadd.s32 40, %v5906_v4  ;;  %s8286_s16 = sld [smem:[#allocation12 + $0x2]] }
  0x3d   : > { %s533_s23 = scalar_lea.vmem %s8336_s0, %s5336_s22  ;;  %v5932_v14 = vadd.s32 32, %v5906_v4  ;;  %v5938_v16 = vadd.s32 24, %v5906_v4  ;;  %v5943_v18 = vadd.s32 16, %v5906_v4  ;;  %v5946_v19 = vadd.s32 8, %v5906_v4  ;;  %s526_s21 = sand.u32 1, %s5696_s26  }
  0x3e   : > { %v5914_v7 = vld [vmem:[%s533_s23] sm:$0xf]  ;;  %v5949_v20 = vand.u32 4294901760, %v5920_v9  ;;  %v5952_v21 = vsub.f32 %v607_v6, %v5922_v10  ;;  %v6129_v6 = vsub.f32 %v5955_v22, %v6086_v55  ;;  %s8293_s22 = sshll.u32 %s526_s21, 1  ;;  %s5027_s15 = scalar_lea.sflag [#allocation4], %s526_s21 }
  0x3f   : > { %v550_v11 = vperm.slane %v5914_v7, 0  ;;  %v551_v58 = vperm.slane %v5914_v7, 2 }
  0x40   : > { %v648_v38 = vsub.f32 %v5920_v9, %v5949_v20  ;;  %v6107_v61 = vand.u32 4294901760, %v5952_v21 }
  0x41   : > { %v5940_v17 = vperm.slane %v550_v11, 0  ;;  %v6114_v2 = vperm.slane %v551_v58, 0  ;;  %v613_v11 = vsel %vm602_vm0, %v538_v59, 0  ;;  %v539_v59 = vld [vmem:[%s8337_s1 + $0x20] sm:$0xff] }
  0x42   : > { %v6100_v60 = vand.u32 4294901760, %v648_v38  ;;  %v656_v22 = vsub.f32 %v5952_v21, %v6107_v61 }
  0x43   : > { %vm568_vm1 = vcmp.eq.s32.totalorder %v5917_v8, %v5940_v17  ;;  %vm566_vm2 = vcmp.eq.s32.totalorder %v5926_v12, %v5940_v17  ;;  %vm564_vm3 = vcmp.eq.s32.totalorder %v5929_v13, %v5940_v17  ;;  %vm562_vm4 = vcmp.eq.s32.totalorder %v5932_v14, %v5940_v17 }
  0x44   : > { %5198 = vmatpush.msk.msra.mxu0 %vm568_vm1, %v5714_v23  ;;  %v5196_v25 = vsel %vm568_vm1, 1.0, %v5715_v24  ;;  %5206 = vmatpush.msk.msra.mxu3 %vm568_vm1, %v5714_v23  ;;  %v5194_v26 = vsel %vm566_vm2, 1.0, %v5715_v24  ;;  %vm560_vm5 = vcmp.eq.s32.totalorder %v5938_v16, %v5940_v17  ;;  %v5192_v27 = vsel %vm564_vm3, 1.0, %v5715_v24 }
  0x45   : > { %v5987_v28 = vsub.f32 %v5196_v25, %v5196_v25  ;;  %v5989_v29 = vsub.f32 %v5194_v26, %v5194_v26  ;;  %v5991_v30 = vsub.f32 %v5192_v27, %v5192_v27  ;;  %vm558_vm6 = vcmp.eq.s32.totalorder %v5943_v18, %v5940_v17 }
  0x46   : > { %5199 = vmatpush.msk.msra.mxu0 %vm566_vm2, %v5714_v23  ;;  %5207 = vmatpush.msk.msra.mxu3 %vm566_vm2, %v5714_v23  ;;  %v5190_v31 = vsel %vm562_vm4, 1.0, %v5715_v24  ;;  %vm556_vm7 = vcmp.eq.s32.totalorder %v5946_v19, %v5940_v17  ;;  %v5188_v32 = vsel %vm560_vm5, 1.0, %v5715_v24  ;;  %vm554_vm8 = vcmp.eq.s32.totalorder %v5906_v4, %v5940_v17 }
  0x47   : > { %785 = vmatpush.msra.mxu2 %v5987_v28  ;;  %v704_v33 = vand.u32 4294901760, %v5987_v28  ;;  %v710_v34 = vand.u32 4294901760, %v5989_v29  ;;  %v6018_v35 = vsub.f32 %v5190_v31, %v5190_v31  ;;  %v716_v36 = vand.u32 4294901760, %v5991_v30 }
  0x48   : > { %5200 = vmatpush.msk.msra.mxu0 %vm564_vm3, %v5714_v23  ;;  %5208 = vmatpush.msk.msra.mxu3 %vm564_vm3, %v5714_v23  ;;  %v6029_v37 = vsub.f32 %v5188_v32, %v5188_v32  ;;  %v5186_v39 = vsel %vm558_vm6, 1.0, %v5715_v24  ;;  %v5184_v40 = vsel %vm556_vm7, 1.0, %v5715_v24  ;;  %v5182_v48 = vsel %vm554_vm8, 1.0, %v5715_v24 }
  0x49   : > { %788 = vmatpush.msra.mxu2 %v5989_v29  ;;  %v705_v41 = vsub.f32 %v5987_v28, %v704_v33  ;;  %v711_v42 = vsub.f32 %v5989_v29, %v710_v34  ;;  %v717_v43 = vsub.f32 %v5991_v30, %v716_v36  ;;  %v722_v44 = vand.u32 4294901760, %v6018_v35 }
  0x4a   : > { %5201 = vmatpush.msk.msra.mxu0 %vm562_vm4, %v5714_v23  ;;  %5209 = vmatpush.msk.msra.mxu3 %vm562_vm4, %v5714_v23  ;;  %v6060_v45 = vsub.f32 %v5186_v39, %v5186_v39  ;;  %v728_v46 = vand.u32 4294901760, %v6029_v37  ;;  %v6063_v47 = vsub.f32 %v5184_v40, %v5184_v40  ;;  %v6082_v53 = vsub.f32 %v5182_v48, %v5182_v48 }
  0x4b   : > { %v706_v49 = vand.u32 4294901760, %v705_v41  ;;  %791 = vmatpush.msra.mxu2 %v5991_v30  ;;  %v712_v50 = vand.u32 4294901760, %v711_v42  ;;  %v723_v51 = vsub.f32 %v6018_v35, %v722_v44  ;;  %v718_v56 = vand.u32 4294901760, %v717_v43 }
  0x4c   : > { %5202 = vmatpush.msk.msra.mxu0 %vm560_vm5, %v5714_v23  ;;  %5210 = vmatpush.msk.msra.mxu3 %vm560_vm5, %v5714_v23  ;;  %v734_v52 = vand.u32 4294901760, %v6060_v45  ;;  %v740_v54 = vand.u32 4294901760, %v6063_v47  ;;  %v729_v57 = vsub.f32 %v6029_v37, %v728_v46  ;;  %v746_v1 = vand.u32 4294901760, %v6082_v53 }
  0x4d   : > { %707 = vmatpush.msra.mxu1 %v706_v49  ;;  %794 = vmatpush.msra.mxu2 %v6018_v35  ;;  %v724_v62 = vand.u32 4294901760, %v723_v51  ;;  %vm569_vm9 = vcmp.eq.s32.totalorder %v5917_v8, %v6114_v2  ;;  %vm8358_vm10 = vcmp.eq.s32.totalorder %v5926_v12, %v6114_v2  ;;  %vm565_vm11 = vcmp.eq.s32.totalorder %v5929_v13, %v6114_v2 }
  0x4e   : > { %5203 = vmatpush.msk.msra.mxu0 %vm558_vm6, %v5714_v23  ;;  %5211 = vmatpush.msk.msra.mxu3 %vm558_vm6, %v5714_v23  ;;  %v735_v63 = vsub.f32 %v6060_v45, %v734_v52  ;;  %v741_v3 = vsub.f32 %v6063_v47, %v740_v54  ;;  %v730_v15 = vand.u32 4294901760, %v729_v57  ;;  %v5197_v25 = vsel %vm569_vm9, 1.0, %v5715_v24 }
  0x4f   : > { %713 = vmatpush.msra.mxu1 %v712_v50  ;;  %797 = vmatpush.msra.mxu2 %v6029_v37  ;;  %v5195_v26 = vsel %vm8358_vm10, 1.0, %v5715_v24  ;;  %v5193_v27 = vsel %vm565_vm11, 1.0, %v5715_v24  ;;  %v747_v32 = vsub.f32 %v6082_v53, %v746_v1  ;;  %v6165_v38 = vsub.f32 %v5197_v25, %v5197_v25 }
  0x50   : > { %5204 = vmatpush.msk.msra.mxu0 %vm556_vm7, %v5714_v23  ;;  %5212 = vmatpush.msk.msra.mxu3 %vm556_vm7, %v5714_v23  ;;  %v736_v31 = vand.u32 4294901760, %v735_v63  ;;  %v6167_v39 = vsub.f32 %v5195_v26, %v5195_v26  ;;  %v6172_v40 = vand.u32 4294901760, %v6129_v6  ;;  %v6174_v41 = vsub.f32 %v5193_v27, %v5193_v27 }
  0x51   : > { %719 = vmatpush.msra.mxu1 %v718_v56  ;;  %800 = vmatpush.msra.mxu2 %v6060_v45  ;;  %vm563_vm12 = vcmp.eq.s32.totalorder %v5932_v14, %v6114_v2  ;;  %v742_v42 = vand.u32 4294901760, %v741_v3  ;;  %v1096_v43 = vand.u32 4294901760, %v6165_v38  ;;  %v6187_v50 = vand.u32 4294901760, %v656_v22 }
  0x52   : > { %5205 = vmatpush.msk.msra.mxu0 %vm554_vm8, %v5714_v23  ;;  %5213 = vmatpush.msk.msra.mxu3 %vm554_vm8, %v5714_v23  ;;  %v1102_v48 = vand.u32 4294901760, %v6167_v39  ;;  %v5191_v49 = vsel %vm563_vm12, 1.0, %v5715_v24  ;;  %v6189_v51 = vand.u32 4294901760, %v613_v11  ;;  %v1108_v56 = vand.u32 4294901760, %v6174_v41 }
  0x53   : > { %650 = vmatmul.f32.vlgmr.msra.gmra.mxu0 %v6100_v60  ;;  %725 = vmatpush.msra.mxu1 %v724_v62  ;;  %v6192_v57 = vsub.f32 %v5191_v49, %v5191_v49  ;;  %v748_v28 = vand.u32 4294901760, %v747_v32  ;;  %vm561_vm13 = vcmp.eq.s32.totalorder %v5938_v16, %v6114_v2  ;;  %v664_v62 = vsub.f32 %v6129_v6, %v6172_v40 }
  0x54   : > { %803 = vmatpush.msra.mxu2 %v6063_v47  ;;  %865 = vmatmul.f32.vlgmr.msra.gmra.mxu3 %v5949_v20  ;;  %v1103_v58 = vsub.f32 %v6167_v39, %v1102_v48  ;;  %v5189_v22 = vsel %vm561_vm13, 1.0, %v5715_v24  ;;  %vm559_vm14 = vcmp.eq.s32.totalorder %v5943_v18, %v6114_v2  ;;  %v6229_v29 = vsub.f32 %v613_v11, %v6189_v51 }
  0x55   : > { %731 = vmatpush.msra.mxu1 %v730_v15  ;;  %910 = vmatpush.msrb.mxu0 %v704_v33  ;;  %v1097_v33 = vsub.f32 %v6165_v38, %v1096_v43  ;;  %v1114_v63 = vand.u32 4294901760, %v6192_v57  ;;  %v1109_v15 = vsub.f32 %v6174_v41, %v1108_v56  ;;  %v616_v25 = vsel %vm602_vm0, %v539_v59, 0 }
  0x56   : > { %806 = vmatpush.msra.mxu2 %v6082_v53  ;;  %v6238_v27 = vsub.f32 %v5189_v22, %v5189_v22  ;;  %v5187_v11 = vsel %vm559_vm14, 1.0, %v5715_v24  ;;  %vm557_vm15 = vcmp.eq.s32.totalorder %v5946_v19, %v6114_v2  ;;  %v6248_v30 = vand.u32 4294901760, %v664_v62 }
  0x57   : > { %737 = vmatpush.msra.mxu1 %v736_v31  ;;  %809 = vmatmul.f32.vlgmr.msra.gmra.mxu2 %v5920_v9  ;;  %v1098_v3 = vand.u32 4294901760, %v1097_v33  ;;  %v1115_v26 = vsub.f32 %v6192_v57, %v1114_v63  ;;  %v5185_v31 = vsel %vm557_vm15, 1.0, %v5715_v24  ;;  %v1110_v32 = vand.u32 4294901760, %v1109_v15 }
  0x58   : > { %5222 = vmatpush.msk.msrb.mxu2 %vm569_vm9, %v5714_v23  ;;  %914 = vmatpush.msrb.mxu0 %v710_v34  ;;  %v1104_v34 = vand.u32 4294901760, %v1103_v58  ;;  %v6261_v49 = vsub.f32 %v5185_v31, %v5185_v31  ;;  %v6272_v33 = vand.u32 4294901760, %v616_v25 }
  0x59   : > { %743 = vmatpush.msra.mxu1 %v742_v42  ;;  %1099 = vmatpush.msrb.mxu3 %v1098_v3  ;;  %v1120_v42 = vand.u32 4294901760, %v6238_v27  ;;  %v1116_v62 = vand.u32 4294901760, %v1115_v26 }
  0x5a   : > { %5223 = vmatpush.msk.msrb.mxu2 %vm8358_vm10, %v5714_v23  ;;  %918 = vmatpush.msrb.mxu0 %v716_v36  ;;  %v6250_v36 = vsub.f32 %v5187_v11, %v5187_v11  ;;  %vm555_vm10 = vcmp.eq.s32.totalorder %v5906_v4, %v6114_v2  ;;  %v1132_v15 = vand.u32 4294901760, %v6261_v49 }
  0x5b   : > { %658 = vmatmul.f32.gmra.mxu0 %v6187_v50  ;;  %749 = vmatpush.msra.mxu1 %v748_v28  ;;  %v6266_v28 = vand.u32 4294901760, %v6229_v29  ;;  %v5183_v59 = vsel %vm555_vm10, 1.0, %v5715_v24  ;;  %v1121_v3 = vsub.f32 %v6238_v27, %v1120_v42 }
  0x5c   : > { %751 = vmatmul.f32.vlgmr.msra.gmra.mxu1 %v5908_v5  ;;  %871 = vmatmul.f32.gmra.mxu3 %v6107_v61  ;;  %v1126_v58 = vand.u32 4294901760, %v6250_v36  ;;  %v6286_v22 = vsub.f32 %v5183_v59, %v5183_v59  ;;  %v1133_v11 = vsub.f32 %v6261_v49, %v1132_v15 }
  0x5d   : > { %5214 = vmatpush.msk.msrb.mxu1 %vm568_vm1, %v5714_v23  ;;  %5224 = vmatpush.msk.msrb.mxu2 %vm565_vm11, %v5714_v23  ;;  %v672_v37 = vsub.f32 %v6229_v29, %v6266_v28 }
  0x5e   : > { %922 = vmatpush.msrb.mxu0 %v722_v44  ;;  %1105 = vmatpush.msrb.mxu3 %v1104_v34  ;;  %v1127_v35 = vsub.f32 %v6250_v36, %v1126_v58  ;;  %v540_v44 = vld [vmem:[%s8337_s1 + $0x28] sm:$0xff]  ;;  %v1122_v34 = vand.u32 4294901760, %v1121_v3  ;;  %v1138_v26 = vand.u32 4294901760, %v6286_v22 }
  0x5f   : > { %814 = vmatmul.f32.gmra.mxu2 %v5952_v21  ;;  %5215 = vmatpush.msk.msrb.mxu1 %vm566_vm2, %v5714_v23  ;;  %v619_v31 = vsel %vm602_vm0, %v540_v44, 0  ;;  %vm8379_vm0 = vcmp.eq.s32.totalorder %v5926_v12, %v6114_v2 }
  0x60   : > { %5225 = vmatpush.msk.msrb.mxu2 %vm563_vm12, %v5714_v23  ;;  %1111 = vmatpush.msrb.mxu3 %v1110_v32  ;;  %v1128_v32 = vand.u32 4294901760, %v1127_v35  ;;  %v1139_v59 = vsub.f32 %v6286_v22, %v1138_v26  ;;  %v6344_v35 = vand.u32 4294901760, %v619_v31  ;;  %vm8380_vm1 = vmmov %vm8379_vm0 }
  0x61   : > { %926 = vmatpush.msrb.mxu0 %v728_v46  ;;  %5216 = vmatpush.msk.msrb.mxu1 %vm564_vm3, %v5714_v23  ;;  %v6320_v46 = vsub.f32 %v616_v25, %v6272_v33  ;;  %v1134_v25 = vand.u32 4294901760, %v1133_v11 }
  0x62   : > { %5226 = vmatpush.msk.msrb.mxu2 %vm561_vm13, %v5714_v23  ;;  %1117 = vmatpush.msrb.mxu3 %v1116_v62  ;;  %v6339_v62 = vand.u32 4294901760, %v672_v37  ;;  %v1140_v45 = vand.u32 4294901760, %v1139_v59 }
  0x63   : > { %666 = vmatmul.f32.gmra.mxu0 %v6248_v30  ;;  %5217 = vmatpush.msk.msrb.mxu1 %vm562_vm4, %v5714_v23  ;;  %v6342_v3 = vand.u32 4294901760, %v6320_v46 }
  0x64   : > { %755 = vmatmul.f32.gmra.mxu1 %v5922_v10  ;;  %877 = vmatmul.f32.gmra.mxu3 %v6172_v40 }
  0x65   : > { %1123 = vmatpush.msrb.mxu3 %v1122_v34  ;;  %930 = vmatpush.msrb.mxu0 %v734_v52  ;;  %v680_v47 = vsub.f32 %v6320_v46, %v6342_v3  ;;  %v6366_v52 = vsub.f32 %v619_v31, %v6344_v35 }
  0x66   : > { %5227 = vmatpush.msk.msrb.mxu2 %vm559_vm14, %v5714_v23  ;;  %5218 = vmatpush.msk.msrb.mxu1 %vm560_vm5, %v5714_v23 }
  0x67   : > { %819 = vmatmul.f32.gmra.mxu2 %v6129_v6  ;;  %934 = vmatpush.msrb.mxu0 %v740_v54  ;;  %v6382_v53 = vand.u32 4294901760, %v680_v47  ;;  %v6385_v54 = vand.u32 4294901760, %v6366_v52 }
  0x68   : > { %1129 = vmatpush.msrb.mxu3 %v1128_v32  ;;  %5219 = vmatpush.msk.msrb.mxu1 %vm558_vm6, %v5714_v23 }
  0x69   : > { %5228 = vmatpush.msk.msrb.mxu2 %vm557_vm15, %v5714_v23  ;;  %938 = vmatpush.msrb.mxu0 %v746_v1  ;;  %v688_v17 = vsub.f32 %v6366_v52, %v6385_v54 }
  0x6a   : > { %1135 = vmatpush.msrb.mxu3 %v1134_v25  ;;  %5220 = vmatpush.msk.msrb.mxu1 %vm556_vm7, %v5714_v23 }
  0x6b   : > { %674 = vmatmul.f32.gmra.mxu0 %v6339_v62  ;;  %5229 = vmatpush.msk.msrb.mxu2 %vm555_vm10, %v5714_v23  ;;  %v6429_v1 = vand.u32 4294901760, %v688_v17 }
  0x6c   : > { %759 = vmatmul.f32.gmra.mxu1 %v6086_v55  ;;  %883 = vmatmul.f32.gmra.mxu3 %v6266_v28 }
  0x6d   : > { %1141 = vmatpush.msrb.mxu3 %v1140_v45  ;;  %1302 = vmatpush.msra.mxu2 %v1096_v43  ;;  %v6531_v43 = vadd.s32 64, %v5906_v4 }
  0x6e   : > { %1177 = vmatpush.msra.mxu0 %v6165_v38  ;;  %5221 = vmatpush.msk.msrb.mxu1 %vm554_vm8, %v5714_v23  ;;  %v6509_v38 = vadd.s32 72, %v5906_v4 }
  0x6f   : > { %824 = vmatmul.f32.gmra.mxu2 %v6229_v29  ;;  %5238 = vmatpush.msk.msra.mxu3 %vm569_vm9, %v5714_v23 }
  0x70   : > { %5230 = vmatpush.msk.msra.mxu1 %vm569_vm9, %v5714_v23  ;;  %1306 = vmatpush.msra.mxu2 %v1102_v48 }
  0x71   : > { %1180 = vmatpush.msra.mxu0 %v6167_v39  ;;  %5239 = vmatpush.msk.msra.mxu3 %vm8379_vm0, %v5714_v23 }
  0x72   : > { %5231 = vmatpush.msk.msra.mxu1 %vm8380_vm1, %v5714_v23  ;;  %1310 = vmatpush.msra.mxu2 %v1108_v56 }
  0x73   : > { %682 = vmatmul.f32.gmra.mxu0 %v6382_v53  ;;  %5240 = vmatpush.msk.msra.mxu3 %vm565_vm11, %v5714_v23 }
  0x74   : > { %763 = vmatmul.f32.gmra.mxu1 %v6189_v51  ;;  %889 = vmatmul.f32.gmra.mxu3 %v6342_v3 }
  0x75   : > { %1183 = vmatpush.msra.mxu0 %v6174_v41  ;;  %5232 = vmatpush.msk.msra.mxu1 %vm565_vm11, %v5714_v23 }
  0x76   : > { %1314 = vmatpush.msra.mxu2 %v1114_v63  ;;  %5241 = vmatpush.msk.msra.mxu3 %vm563_vm12, %v5714_v23 }
  0x77   : > { %829 = vmatmul.f32.gmra.mxu2 %v6320_v46  ;;  %1186 = vmatpush.msra.mxu0 %v6192_v57 }
  0x78   : > { %5233 = vmatpush.msk.msra.mxu1 %vm563_vm12, %v5714_v23  ;;  %1318 = vmatpush.msra.mxu2 %v1120_v42  ;;  %vm1477_vm12 = vcmask 654336  }
  0x79   : > { %1189 = vmatpush.msra.mxu0 %v6238_v27  ;;  %5242 = vmatpush.msk.msra.mxu3 %vm561_vm13, %v5714_v23 }
  0x7a   : > { %5234 = vmatpush.msk.msra.mxu1 %vm561_vm13, %v5714_v23  ;;  %1322 = vmatpush.msra.mxu2 %v1126_v58 }
  0x7b   : > { %690 = vmatmul.f32.gmra.mxu0 %v6429_v1  ;;  %5243 = vmatpush.msk.msra.mxu3 %vm559_vm14, %v5714_v23 }
  0x7c   : > { %767 = vmatmul.f32.gmra.mxu1 %v6272_v33  ;;  %895 = vmatmul.f32.gmra.mxu3 %v6385_v54 }
  0x7d   : > { %1192 = vmatpush.msra.mxu0 %v6250_v36  ;;  %5235 = vmatpush.msk.msra.mxu1 %vm559_vm14, %v5714_v23 }
  0x7e   : > { %1326 = vmatpush.msra.mxu2 %v1132_v15  ;;  %5244 = vmatpush.msk.msra.mxu3 %vm557_vm15, %v5714_v23 }
  0x7f   : > { %834 = vmatmul.f32.gmra.mxu2 %v6366_v52  ;;  %1195 = vmatpush.msra.mxu0 %v6261_v49 }
  0x80   : > { %1330 = vmatpush.msra.mxu2 %v1138_v26  ;;  %5236 = vmatpush.msk.msra.mxu1 %vm557_vm15, %v5714_v23 }
  0x81   : > { %1198 = vmatpush.msra.mxu0 %v6286_v22  ;;  %5245 = vmatpush.msk.msra.mxu3 %vm555_vm10, %v5714_v23 }
  0x82   : > { %5237 = vmatpush.msk.msra.mxu1 %vm555_vm10, %v5714_v23 }
  0x83   : > { %940 = vmatmul.f32.vlgmr.msrb.gmra.mxu0 %v5908_v5 }
  0x84   : > { %771 = vmatmul.f32.gmra.mxu1 %v6344_v35  ;;  %1143 = vmatmul.f32.vlgmr.msrb.gmra.mxu3 %v5908_v5 }
  0x87   : > { %1042 = vmatmul.f32.vlgmr.msrb.gmra.mxu2 %v6100_v60  ;;  %v1413_v60 = vperm.slane %v5914_v7, 1 }
  0x89   : > { %v6505_v2 = vperm.slane %v1413_v60, 1 }
  0x8b   : > { %944 = vmatmul.f32.gmra.mxu0 %v5922_v10  ;;  %vm1435_vm2 = vcmp.eq.s32.totalorder %v6509_v38, %v6505_v2  ;;  %vm1433_vm3 = vcmp.eq.s32.totalorder %v6531_v43, %v6505_v2  ;;  %vm1431_vm4 = vcmp.eq.s32.totalorder %v5917_v8, %v6505_v2  ;;  %vm1429_vm5 = vcmp.eq.s32.totalorder %v5926_v12, %v6505_v2 }
  0x8c   : > { %989 = vmatmul.f32.vlgmr.msrb.gmra.mxu1 %v5908_v5  ;;  %1147 = vmatmul.f32.gmra.mxu3 %v5922_v10  ;;  %v5264_v39 = vsel %vm1435_vm2, 1.0, %v5715_v24  ;;  %v5258_v15 = vsel %vm1429_vm5, 1.0, %v5715_v24  ;;  %vm1427_vm6 = vcmp.eq.s32.totalorder %v5929_v13, %v6505_v2  ;;  %vm1425_vm7 = vcmp.eq.s32.totalorder %v5932_v14, %v6505_v2 }
  0x8d   : > { %5266 = vmatpush.msk.msrb.mxu0 %vm1435_vm2, %v5714_v23  ;;  %5276 = vmatpush.msk.msrb.mxu3 %vm1435_vm2, %v5714_v23  ;;  %v6528_v41 = vsub.f32 %v5264_v39, %v5264_v39  ;;  %v6598_v44 = vsub.f32 %v5258_v15, %v5258_v15  ;;  %v5256_v11 = vsel %vm1427_vm6, 1.0, %v5715_v24  ;;  %v5254_v32 = vsel %vm1425_vm7, 1.0, %v5715_v24 }
  0x8e   : > { %v6618_v37 = vsub.f32 %v5256_v11, %v5256_v11  ;;  %v6638_v59 = vsub.f32 %v5254_v32, %v5254_v32  ;;  %vm1423_vm8 = vcmp.eq.s32.totalorder %v5938_v16, %v6505_v2  ;;  %vm1421_vm9 = vcmp.eq.s32.totalorder %v5943_v18, %v6505_v2 }
  0x8f   : > { %1050 = vmatmul.f32.gmra.mxu2 %v6187_v50  ;;  %v1579_v48 = vand.u32 4294901760, %v6528_v41  ;;  %v5262_v50 = vsel %vm1433_vm3, 1.0, %v5715_v24  ;;  %5267 = vmatpush.msk.msrb.mxu0 %vm1433_vm3, %v5714_v23  ;;  %v1597_v26 = vand.u32 4294901760, %v6598_v44  ;;  %v5250_v45 = vsel %vm1421_vm9, 1.0, %v5715_v24 }
  0x90   : > { %1670 = vmatpush.msrb.mxu2 %v6528_v41  ;;  %5277 = vmatpush.msk.msrb.mxu3 %vm1433_vm3, %v5714_v23  ;;  %v6553_v57 = vsub.f32 %v5262_v50, %v5262_v50  ;;  %vm1419_vm10 = vcmp.eq.s32.totalorder %v5946_v19, %v6505_v2  ;;  %v6683_v17 = vsub.f32 %v5250_v45, %v5250_v45 }
  0x91   : > { %v1580_v56 = vsub.f32 %v6528_v41, %v1579_v48  ;;  %5268 = vmatpush.msk.msrb.mxu0 %vm1431_vm4, %v5714_v23  ;;  %vm1417_vm11 = vcmp.eq.s32.totalorder %v5906_v4, %v6505_v2  ;;  %v1414_v41 = vperm.slane %v5914_v7, 3 }
  0x92   : > { %1673 = vmatpush.msrb.mxu2 %v6553_v57  ;;  %v1585_v27 = vand.u32 4294901760, %v6553_v57  ;;  %5278 = vmatpush.msk.msrb.mxu3 %vm1431_vm4, %v5714_v23  ;;  %v1621_v50 = vand.u32 4294901760, %v6683_v17 }
  0x93   : > { %948 = vmatmul.f32.gmra.mxu0 %v6086_v55  ;;  %v1581_v63 = vand.u32 4294901760, %v1580_v56  ;;  %v6769_v7 = vperm.slane %v1414_v41, 1 }
  0x94   : > { %993 = vmatmul.f32.gmra.mxu1 %v5922_v10  ;;  %1151 = vmatmul.f32.gmra.mxu3 %v6086_v55  ;;  %v1586_v42 = vsub.f32 %v6553_v57, %v1585_v27  ;;  %v1407_v57 = vld [vmem:[#allocation2 + $0x10] sm:$0xff] }
  0x95   : > { %1582 = vmatpush.msrb.mxu1 %v1581_v63  ;;  %5269 = vmatpush.msk.msrb.mxu0 %vm1429_vm5, %v5714_v23  ;;  %v5246_v63 = vsel %vm1417_vm11, 1.0, %v5715_v24  ;;  %vm1436_vm13 = vcmp.eq.s32.totalorder %v6509_v38, %v6769_v7  ;;  %vm1434_vm14 = vcmp.eq.s32.totalorder %v6531_v43, %v6769_v7  ;;  %vm1432_vm15 = vcmp.eq.s32.totalorder %v5917_v8, %v6769_v7 }
  0x96   : > { %v1587_v58 = vand.u32 4294901760, %v1586_v42  ;;  %5279 = vmatpush.msk.msrb.mxu3 %vm1429_vm5, %v5714_v23  ;;  %v6720_v42 = vsub.f32 %v5246_v63, %v5246_v63  ;;  %vm1430_vm0 = vcmp.eq.s32.totalorder %v5926_v12, %v6769_v7  ;;  %vm1428_vm1 = vcmp.eq.s32.totalorder %v5929_v13, %v6769_v7 }
  0x97   : > { %1058 = vmatmul.f32.gmra.mxu2 %v6248_v30  ;;  %v5260_v30 = vsel %vm1431_vm4, 1.0, %v5715_v24  ;;  %5270 = vmatpush.msk.msrb.mxu0 %vm1427_vm6, %v5714_v23 }
  0x98   : > { %v6569_v36 = vsub.f32 %v5260_v30, %v5260_v30  ;;  %1588 = vmatpush.msrb.mxu1 %v1587_v58  ;;  %5280 = vmatpush.msk.msrb.mxu3 %vm1427_vm6, %v5714_v23  ;;  %v1622_v30 = vsub.f32 %v6683_v17, %v1621_v50 }
  0x99   : > { %5271 = vmatpush.msk.msrb.mxu0 %vm1425_vm7, %v5714_v23 }
  0x9a   : > { %1676 = vmatpush.msrb.mxu2 %v6569_v36  ;;  %v1591_v49 = vand.u32 4294901760, %v6569_v36  ;;  %5281 = vmatpush.msk.msrb.mxu3 %vm1425_vm7, %v5714_v23 }
  0x9b   : > { %952 = vmatmul.f32.gmra.mxu0 %v6189_v51 }
  0x9c   : > { %997 = vmatmul.f32.gmra.mxu1 %v6086_v55  ;;  %1155 = vmatmul.f32.gmra.mxu3 %v6189_v51  ;;  %v1592_v22 = vsub.f32 %v6569_v36, %v1591_v49 }
  0x9d   : > { %1679 = vmatpush.msrb.mxu2 %v6598_v44  ;;  %5272 = vmatpush.msk.msrb.mxu0 %vm1423_vm8, %v5714_v23 }
  0x9e   : > { %v1593_v34 = vand.u32 4294901760, %v1592_v22  ;;  %5282 = vmatpush.msk.msrb.mxu3 %vm1423_vm8, %v5714_v23 }
  0x9f   : > { %1066 = vmatmul.f32.gmra.mxu2 %v6339_v62  ;;  %5273 = vmatpush.msk.msrb.mxu0 %vm1421_vm9, %v5714_v23 }
  0xa0   : > { %1594 = vmatpush.msrb.mxu1 %v1593_v34  ;;  %1682 = vmatpush.msrb.mxu2 %v6618_v37  ;;  %v1633_v34 = vand.u32 4294901760, %v6720_v42 }
  0xa1   : > { %5283 = vmatpush.msk.msrb.mxu3 %vm1421_vm9, %v5714_v23  ;;  %5274 = vmatpush.msk.msrb.mxu0 %vm1419_vm10, %v5714_v23 }
  0xa2   : > { %1685 = vmatpush.msrb.mxu2 %v6638_v59  ;;  %v1634_v11 = vsub.f32 %v6720_v42, %v1633_v34 }
  0xa3   : > { %956 = vmatmul.f32.gmra.mxu0 %v6272_v33  ;;  %5284 = vmatpush.msk.msrb.mxu3 %vm1419_vm10, %v5714_v23 }
  0xa4   : > { %1001 = vmatmul.f32.gmra.mxu1 %v6189_v51  ;;  %1159 = vmatmul.f32.gmra.mxu3 %v6272_v33 }
  0xa5   : > { %5275 = vmatpush.msk.msrb.mxu0 %vm1417_vm11, %v5714_v23  ;;  %5285 = vmatpush.msk.msrb.mxu3 %vm1417_vm11, %v5714_v23 }
  0xa7   : > { %1074 = vmatmul.f32.gmra.mxu2 %v6382_v53 }
  0xab   : > { %960 = vmatmul.f32.gmra.mxu0 %v6344_v35 }
  0xac   : > { %1005 = vmatmul.f32.gmra.mxu1 %v6272_v33  ;;  %1163 = vmatmul.f32.gmra.mxu3 %v6344_v35 }
  0xaf   : > { %1082 = vmatmul.f32.gmra.mxu2 %v6429_v1  ;;  %v5248_v1 = vsel %vm1419_vm10, 1.0, %v5715_v24 }
  0xb0   : > { %v6701_v39 = vsub.f32 %v5248_v1, %v5248_v1 }
  0xb2   : > { %v1627_v58 = vand.u32 4294901760, %v6701_v39 }
  0xb3   : > { %1201 = vmatmul.f32.vlgmr.msra.gmra.mxu0 %v5920_v9  ;;  %v1598_v9 = vsub.f32 %v6598_v44, %v1597_v26  ;;  %v5265_v44 = vsel %vm1436_vm13, 1.0, %v5715_v24 }
  0xb4   : > { %1009 = vmatmul.f32.gmra.mxu1 %v6344_v35  ;;  %1381 = vmatmul.f32.vlgmr.msra.gmra.mxu3 %v5908_v5  ;;  %v1628_v22 = vsub.f32 %v6701_v39, %v1627_v58 }
  0xb5   : > { %v1599_v31 = vand.u32 4294901760, %v1598_v9  ;;  %1801 = vmatpush.msra.mxu0 %v1579_v48  ;;  %v1405_v9 = vld [vmem:[#allocation2] sm:$0xff]  ;;  %v1406_v48 = vld [vmem:[#allocation2 + $0x8] sm:$0xff] }
  0xb7   : > { %1332 = vmatmul.f32.vlgmr.msra.gmra.mxu2 %v5908_v5  ;;  %1600 = vmatpush.msrb.mxu1 %v1599_v31  ;;  %v1603_v5 = vand.u32 4294901760, %v6618_v37  ;;  %v1635_v31 = vand.u32 4294901760, %v1634_v11 }
  0xb8   : > { %1805 = vmatpush.msra.mxu0 %v1585_v27  ;;  %v1482_v27 = vsel %vm1477_vm12, %v1406_v48, 0 }
  0xb9   : > { %v1604_v25 = vsub.f32 %v6618_v37, %v1603_v5 }
  0xba   : > { %1809 = vmatpush.msra.mxu0 %v1591_v49  ;;  %v6795_v49 = vand.u32 4294901760, %v1482_v27 }
  0xbb   : > { %1206 = vmatmul.f32.gmra.mxu0 %v5952_v21  ;;  %v5252_v21 = vsel %vm1423_vm8, 1.0, %v5715_v24  ;;  %v1605_v47 = vand.u32 4294901760, %v1604_v25 }
  0xbc   : > { %1257 = vmatmul.f32.vlgmr.msra.gmra.mxu1 %v5949_v20  ;;  %1385 = vmatmul.f32.gmra.mxu3 %v5922_v10  ;;  %v1609_v20 = vand.u32 4294901760, %v6638_v59  ;;  %v6663_v62 = vsub.f32 %v5252_v21, %v5252_v21  ;;  %v6838_v45 = vsub.f32 %v1482_v27, %v6795_v49 }
  0xbd   : > { %1606 = vmatpush.msrb.mxu1 %v1605_v47  ;;  %1813 = vmatpush.msra.mxu0 %v1597_v26 }
  0xbe   : > { %v1610_v53 = vsub.f32 %v6638_v59, %v1609_v20  ;;  %1688 = vmatpush.msrb.mxu2 %v6663_v62 }
  0xbf   : > { %1336 = vmatmul.f32.gmra.mxu2 %v5922_v10  ;;  %v1615_v10 = vand.u32 4294901760, %v6663_v62  ;;  %1817 = vmatpush.msra.mxu0 %v1603_v5  ;;  %v5263_v5 = vsel %vm1434_vm14, 1.0, %v5715_v24 }
  0xc0   : > { %v1611_v60 = vand.u32 4294901760, %v1610_v53  ;;  %1691 = vmatpush.msrb.mxu2 %v6683_v17 }
  0xc1   : > { %v1616_v56 = vsub.f32 %v6663_v62, %v1615_v10  ;;  %1821 = vmatpush.msra.mxu0 %v1609_v20  ;;  %v6830_v20 = vsub.f32 %v5263_v5, %v5263_v5 }
  0xc2   : > { %1612 = vmatpush.msrb.mxu1 %v1611_v60  ;;  %1694 = vmatpush.msrb.mxu2 %v6701_v39 }
  0xc3   : > { %1211 = vmatmul.f32.gmra.mxu0 %v6129_v6  ;;  %v1617_v15 = vand.u32 4294901760, %v1616_v56  ;;  %v1623_v6 = vand.u32 4294901760, %v1622_v30  ;;  %v2003_v53 = vand.u32 4294901760, %v6830_v20  ;;  %v5261_v56 = vsel %vm1432_vm15, 1.0, %v5715_v24 }
  0xc4   : > { %1263 = vmatmul.f32.gmra.mxu1 %v6107_v61  ;;  %1389 = vmatmul.f32.gmra.mxu3 %v6086_v55  ;;  %v1629_v61 = vand.u32 4294901760, %v1628_v22 }
  0xc5   : > { %1618 = vmatpush.msrb.mxu1 %v1617_v15  ;;  %1697 = vmatpush.msrb.mxu2 %v6720_v42  ;;  %v2004_v1 = vsub.f32 %v6830_v20, %v2003_v53 }
  0xc6   : > { %1825 = vmatpush.msra.mxu0 %v1615_v10 }
  0xc7   : > { %1340 = vmatmul.f32.gmra.mxu2 %v6086_v55  ;;  %1624 = vmatpush.msrb.mxu1 %v1623_v6  ;;  %v1479_v55 = vsel %vm1477_vm12, %v1405_v9, 0  ;;  %v2005_v30 = vand.u32 4294901760, %v2004_v1 }
  0xc8   : > { %5296 = vmatpush.msk.msra.mxu2 %vm1436_vm13, %v5714_v23  ;;  %1829 = vmatpush.msra.mxu0 %v1621_v50  ;;  %v6870_v50 = vand.u32 4294901760, %v6838_v45 }
  0xc9   : > { %1630 = vmatpush.msrb.mxu1 %v1629_v61  ;;  %v5259_v61 = vsel %vm1430_vm0, 1.0, %v5715_v24 }
  0xca   : > { %5297 = vmatpush.msk.msra.mxu2 %vm1434_vm14, %v5714_v23  ;;  %1833 = vmatpush.msra.mxu0 %v1627_v58  ;;  %v1408_v58 = vld [vmem:[#allocation2 + $0x18] sm:$0xff]  ;;  %v1533_v11 = vsub.f32 %v6838_v45, %v6870_v50 }
  0xcb   : > { %1216 = vmatmul.f32.gmra.mxu0 %v6229_v29  ;;  %1636 = vmatpush.msrb.mxu1 %v1635_v31  ;;  %v6759_v29 = vand.u32 4294901760, %v1479_v55  ;;  %v1488_v9 = vsel %vm1477_vm12, %v1408_v58, 0  ;;  %v6906_v31 = vsub.f32 %v5259_v61, %v5259_v61 }
  0xcc   : > { %1269 = vmatmul.f32.gmra.mxu1 %v6172_v40  ;;  %1393 = vmatmul.f32.gmra.mxu3 %v6189_v51  ;;  %v6937_v27 = vand.u32 4294901760, %v1488_v9 }
  0xcd   : > { %5286 = vmatpush.msk.msra.mxu1 %vm1435_vm2, %v5714_v23  ;;  %1837 = vmatpush.msra.mxu0 %v1633_v34  ;;  %v2015_v2 = vand.u32 4294901760, %v6906_v31  ;;  %vm1426_vm2 = vcmp.eq.s32.totalorder %v5932_v14, %v6769_v7 }
  0xce   : > { %5298 = vmatpush.msk.msra.mxu2 %vm1432_vm15, %v5714_v23  ;;  %v6967_v58 = vsub.f32 %v1488_v9, %v6937_v27 }
  0xcf   : > { %1344 = vmatmul.f32.gmra.mxu2 %v6189_v51  ;;  %5287 = vmatpush.msk.msra.mxu1 %vm1433_vm3, %v5714_v23  ;;  %v6777_v51 = vsub.f32 %v1479_v55, %v6759_v29  ;;  %vm1424_vm3 = vcmp.eq.s32.totalorder %v5938_v16, %v6769_v7 }
  0xd0   : > { %v651_v40 = vpop.f32.mrf.mxu0  ;;  %5299 = vmatpush.msk.msra.mxu2 %vm1430_vm0, %v5714_v23 }
  0xd1   : > { %5288 = vmatpush.msk.msra.mxu1 %vm1431_vm4, %v5714_v23  ;;  %v6793_v36 = vand.u32 4294901760, %v6777_v51  ;;  %vm1422_vm4 = vcmp.eq.s32.totalorder %v5943_v18, %v6769_v7 }
  0xd2   : > { %5300 = vmatpush.msk.msra.mxu2 %vm1428_vm1, %v5714_v23  ;;  %v5251_v61 = vsel %vm1422_vm4, 1.0, %v5715_v24 }
  0xd3   : > { %1221 = vmatmul.f32.gmra.mxu0 %v6320_v46  ;;  %5289 = vmatpush.msk.msra.mxu1 %vm1429_vm5, %v5714_v23  ;;  %v1485_v46 = vsel %vm1477_vm12, %v1407_v57, 0  ;;  %v1525_v62 = vsub.f32 %v6777_v51, %v6793_v36  ;;  %vm1420_vm5 = vcmp.eq.s32.totalorder %v5946_v19, %v6769_v7 }
  0xd4   : > { %1275 = vmatmul.f32.gmra.mxu1 %v6266_v28  ;;  %1397 = vmatmul.f32.gmra.mxu3 %v6272_v33  ;;  %v6815_v32 = vand.u32 4294901760, %v1485_v46 }
  0xd5   : > { %5290 = vmatpush.msk.msra.mxu1 %vm1427_vm6, %v5714_v23  ;;  %v6867_v39 = vand.u32 4294901760, %v1525_v62  ;;  %5301 = vmatpush.msk.msra.mxu2 %vm1426_vm2, %v5714_v23  ;;  %vm1418_vm6 = vcmp.eq.s32.totalorder %v5906_v4, %v6769_v7 }
  0xd6   : > { %v6851_v17 = vsub.f32 %v1485_v46, %v6815_v32 }
  0xd7   : > { %1348 = vmatmul.f32.gmra.mxu2 %v6272_v33  ;;  %v866_v28 = vpop.f32.mrf.mxu3  ;;  %v6809_v33 = vsub.f32 %v5265_v44, %v5265_v44  ;;  %5291 = vmatpush.msk.msra.mxu1 %vm1425_vm7, %v5714_v23  ;;  %vm2339_vm7 = vcmask 130048  }
  0xd8   : > { %v659_v26 = vpop.f32.mrf.mxu0  ;;  %v6885_v6 = vand.u32 4294901760, %v6851_v17  ;;  %5302 = vmatpush.msk.msra.mxu2 %vm1424_vm3, %v5714_v23 }
  0xd9   : > { %v752_v37 = vpop.f32.mrf.mxu1  ;;  %v1997_v25 = vand.u32 4294901760, %v6809_v33  ;;  %5292 = vmatpush.msk.msra.mxu1 %vm1423_vm8, %v5714_v23  ;;  %vm2707_vm8 = vcmask 261120  }
  0xda   : > { %v753_v59 = vadd.f32 %v752_v37, %v651_v40  ;;  %v810_v21 = vpop.f32.mrf.mxu2  ;;  %v5257_v40 = vsel %vm1428_vm1, 1.0, %v5715_v24  ;;  %v1541_v48 = vsub.f32 %v6851_v17, %v6885_v6  ;;  %v2016_v37 = vsub.f32 %v6906_v31, %v2015_v2  ;;  %5303 = vmatpush.msk.msra.mxu2 %vm1422_vm4, %v5714_v23 }
  0xdb   : > { %1226 = vmatmul.f32.gmra.mxu0 %v6366_v52  ;;  %v1998_v52 = vsub.f32 %v6809_v33, %v1997_v25  ;;  %5293 = vmatpush.msk.msra.mxu1 %vm1421_vm9, %v5714_v23  ;;  %vm4675_vm9 = vcmask 64512  }
  0xdc   : > { %v811_v47 = vadd.f32 %v810_v21, %v753_v59  ;;  %1281 = vmatmul.f32.gmra.mxu1 %v6342_v3  ;;  %1401 = vmatmul.f32.gmra.mxu3 %v6344_v35 }
  0xdd   : > { %v1999_v10 = vand.u32 4294901760, %v1998_v52  ;;  %5294 = vmatpush.msk.msra.mxu1 %vm1419_vm10, %v5714_v23  ;;  %v1409_v52 = vld [vmem:[#allocation2 + $0x20] sm:$0xff]  ;;  %5304 = vmatpush.msk.msra.mxu2 %vm1420_vm5, %v5714_v23 }
  0xde   : > { %v6859_v3 = vadd.f32 %v866_v28, %v811_v47  ;;  %v5255_v28 = vsel %vm1426_vm2, 1.0, %v5715_v24  ;;  %v6959_v47 = vand.u32 4294901760, %v1541_v48  ;;  %v1491_v9 = vsel %vm1477_vm12, %v1409_v52, 0 }
  0xdf   : > { %1352 = vmatmul.f32.gmra.mxu2 %v6344_v35  ;;  %v872_v60 = vpop.f32.mrf.mxu3  ;;  %2000 = vmatpush.msra.mxu3 %v1999_v10  ;;  %v6882_v35 = vsub.f32 %v5261_v56, %v5261_v56  ;;  %v6950_v59 = vsub.f32 %v5255_v28, %v5255_v28  ;;  %v2017_v10 = vand.u32 4294901760, %v2016_v37  ;;  %v5249_v48 = vsel %vm1420_vm5, 1.0, %v5715_v24 }
  0xe0   : > { %v667_v63 = vpop.f32.mrf.mxu0  ;;  %5295 = vmatpush.msk.msra.mxu1 %vm1417_vm11, %v5714_v23  ;;  %v7010_v37 = vsub.f32 %v5249_v48, %v5249_v48  ;;  %v7023_v52 = vand.u32 4294901760, %v6967_v58  ;;  %5305 = vmatpush.msk.msra.mxu2 %vm1418_vm6, %v5714_v23 }
  0xe1   : > { %v756_v15 = vpop.f32.mrf.mxu1  ;;  %2006 = vmatpush.msra.mxu3 %v2005_v30  ;;  %v2009_v34 = vand.u32 4294901760, %v6882_v35 }
  0xe2   : > { %v757_v42 = vadd.f32 %v756_v15, %v659_v26  ;;  %v815_v22 = vpop.f32.mrf.mxu2  ;;  %v6944_v26 = vand.u32 4294901760, %v1533_v11  ;;  %v5253_v15 = vsel %vm1424_vm3, 1.0, %v5715_v24  ;;  %v8384_v16 = vand.u32 4294901760, %v7010_v37 }
  0xe3   : > { %1527 = vmatmul.f32.vlgmr.msrb.gmra.mxu0 %v6867_v39  ;;  %v2010_v41 = vsub.f32 %v6882_v35, %v2009_v34 }
  0xe4   : > { %v816_v55 = vadd.f32 %v815_v22, %v757_v42  ;;  %1287 = vmatmul.f32.gmra.mxu1 %v6385_v54  ;;  %1758 = vmatmul.f32.vlgmr.msrb.gmra.mxu3 %v6793_v36  ;;  %v6930_v54 = vsub.f32 %v5257_v40, %v5257_v40  ;;  %v6983_v22 = vsub.f32 %v5253_v15, %v5253_v15  ;;  %v8360_v15 = vand.u32 4294901760, %v7010_v37 }
  0xe5   : > { %2088 = vmatpush.msrb.mxu0 %v6809_v33  ;;  %v2011_v46 = vand.u32 4294901760, %v2010_v41 }
  0xe6   : > { %v6935_v57 = vadd.f32 %v872_v60, %v816_v55  ;;  %v2021_v5 = vand.u32 4294901760, %v6930_v54  ;;  %v2027_v60 = vand.u32 4294901760, %v6950_v59  ;;  %v6992_v55 = vsub.f32 %v5251_v61, %v5251_v61 }
  0xe7   : > { %1700 = vmatmul.f32.vlgmr.msrb.gmra.mxu2 %v6777_v51  ;;  %v878_v44 = vpop.f32.mrf.mxu3  ;;  %2091 = vmatpush.msrb.mxu0 %v6830_v20  ;;  %v8362_v40 = vand.u32 4294901760, %v6983_v22  ;;  %v2046_v0 = vsub.f32 %v7010_v37, %v8360_v15 }
  0xe8   : > { %v675_v21 = vpop.f32.mrf.mxu0  ;;  %2012 = vmatpush.msra.mxu3 %v2011_v46  ;;  %v2022_v1 = vsub.f32 %v6930_v54, %v2021_v5  ;;  %v2028_v42 = vsub.f32 %v6950_v59, %v2027_v60  ;;  %v8361_v28 = vand.u32 4294901760, %v6992_v55  ;;  %2219 = vmatpush.msrb.mxu2 %v1997_v25 }
  0xe9   : > { %v760_v62 = vpop.f32.mrf.mxu1  ;;  %2094 = vmatpush.msrb.mxu0 %v6882_v35 }
  0xea   : > { %v761_v56 = vadd.f32 %v760_v62, %v667_v63  ;;  %v820_v30 = vpop.f32.mrf.mxu2  ;;  %2018 = vmatpush.msra.mxu3 %v2017_v10  ;;  %v2023_v63 = vand.u32 4294901760, %v2022_v1  ;;  %v2029_v41 = vand.u32 4294901760, %v2028_v42  ;;  %v5247_v62 = vsel %vm1418_vm6, 1.0, %v5715_v24  ;;  %v1410_v42 = vld [vmem:[#allocation2 + $0x28] sm:$0xff]  ;;  %2223 = vmatpush.msrb.mxu2 %v2003_v53 }
  0xeb   : > { %1535 = vmatmul.f32.gmra.mxu0 %v6944_v26  ;;  %v7025_v10 = vand.u32 4294901760, %v1491_v9  ;;  %v2034_v24 = vsub.f32 %v6983_v22, %v8362_v40  ;;  %v7030_v1 = vsub.f32 %v5247_v62, %v5247_v62  ;;  %v1494_v15 = vsel %vm1477_vm12, %v1410_v42, 0 }
  0xec   : > { %v821_v11 = vadd.f32 %v820_v30, %v761_v56  ;;  %1638 = vmatmul.f32.vlgmr.msrb.gmra.mxu1 %v6759_v29  ;;  %1764 = vmatmul.f32.gmra.mxu3 %v6870_v50  ;;  %v2040_v30 = vsub.f32 %v6992_v55, %v8361_v28  ;;  %v2047_v28 = vand.u32 4294901760, %v2046_v0  ;;  %v7084_v42 = vand.u32 4294901760, %v1494_v15 }
  0xed   : > { %2024 = vmatpush.msra.mxu3 %v2023_v63  ;;  %5306 = vmatpush.msk.msrb.mxu1 %vm1436_vm13, %v5714_v23  ;;  %v2035_v61 = vand.u32 4294901760, %v2034_v24  ;;  %v7061_v24 = vsub.f32 %v1491_v9, %v7025_v10 }
  0xee   : > { %v7007_v46 = vadd.f32 %v878_v44, %v821_v11  ;;  %2097 = vmatpush.msrb.mxu0 %v6906_v31  ;;  %v2051_v11 = vand.u32 4294901760, %v7030_v1  ;;  %v2041_v62 = vand.u32 4294901760, %v2040_v30  ;;  %2227 = vmatpush.msrb.mxu2 %v2009_v34  ;;  %v7103_v53 = vsub.f32 %v1494_v15, %v7084_v42 }
  0xef   : > { %1705 = vmatmul.f32.gmra.mxu2 %v6838_v45  ;;  %v884_v44 = vpop.f32.mrf.mxu3  ;;  %2030 = vmatpush.msra.mxu3 %v2029_v41  ;;  %v7082_v0 = vand.u32 4294901760, %v7061_v24 }
  0xf0   : > { %8381 = vst [vmem:[#allocation26_spill] sm:$0xff] %v7007_v46  ;;  %v683_v56 = vpop.f32.mrf.mxu0  ;;  %5307 = vmatpush.msk.msrb.mxu1 %vm1434_vm14, %v5714_v23  ;;  %2100 = vmatpush.msrb.mxu0 %v6930_v54  ;;  %v2052_v30 = vsub.f32 %v7030_v1, %v2051_v11  ;;  %v7128_v43 = vand.u32 4294901760, %v7103_v53 }
  0xf1   : > { %v764_v63 = vpop.f32.mrf.mxu1  ;;  %2036 = vmatpush.msra.mxu3 %v2035_v61  ;;  %v1557_v20 = vsub.f32 %v7061_v24, %v7082_v0  ;;  %2231 = vmatpush.msrb.mxu2 %v2015_v2 }
  0xf2   : > { %v765_v41 = vadd.f32 %v764_v63, %v675_v21  ;;  %v825_v48 = vpop.f32.mrf.mxu2  ;;  %5308 = vmatpush.msk.msrb.mxu1 %vm1432_vm15, %v5714_v23  ;;  %v1549_v21 = vsub.f32 %v6967_v58, %v7023_v52  ;;  %v2053_v40 = vand.u32 4294901760, %v2052_v30  ;;  %2103 = vmatpush.msrb.mxu0 %v6950_v59  ;;  %v1565_v54 = vsub.f32 %v7103_v53, %v7128_v43 }
  0xf3   : > { %1543 = vmatmul.f32.gmra.mxu0 %v6959_v47  ;;  %2042 = vmatpush.msra.mxu3 %v2041_v62  ;;  %v7125_v34 = vand.u32 4294901760, %v1557_v20 }
  0xf4   : > { %v826_v63 = vadd.f32 %v825_v48, %v765_v41  ;;  %1642 = vmatmul.f32.gmra.mxu1 %v6795_v49  ;;  %1770 = vmatmul.f32.gmra.mxu3 %v6885_v6  ;;  %v7079_v41 = vand.u32 4294901760, %v1549_v21 }
  0xf5   : > { %5309 = vmatpush.msk.msrb.mxu1 %vm1430_vm0, %v5714_v23  ;;  %2048 = vmatpush.msra.mxu3 %v2047_v28 }
  0xf6   : > { %v7071_v9 = vadd.f32 %v884_v44, %v826_v63  ;;  %2106 = vmatpush.msrb.mxu0 %v6983_v22  ;;  %2235 = vmatpush.msrb.mxu2 %v2021_v5  ;;  %v8382_v5 = vand.u32 4294901760, %v6983_v22  ;;  %v8383_v22 = vand.u32 4294901760, %v6992_v55 }
  0xf7   : > { %1710 = vmatmul.f32.gmra.mxu2 %v6851_v17  ;;  %v890_v61 = vpop.f32.mrf.mxu3  ;;  %5310 = vmatpush.msk.msrb.mxu1 %vm1428_vm1, %v5714_v23 }
  0xf8   : > { %v691_v33 = vpop.f32.mrf.mxu0  ;;  %2054 = vmatpush.msra.mxu3 %v2053_v40  ;;  %2109 = vmatpush.msrb.mxu0 %v6992_v55 }
  0xf9   : > { %v768_v25 = vpop.f32.mrf.mxu1  ;;  %5311 = vmatpush.msk.msrb.mxu1 %vm1426_vm2, %v5714_v23  ;;  %2239 = vmatpush.msrb.mxu2 %v2027_v60  ;;  %v7172_v60 = vand.u32 4294901760, %v1565_v54 }
  0xfa   : > { %v769_v44 = vadd.f32 %v768_v25, %v683_v56  ;;  %v830_v48 = vpop.f32.mrf.mxu2  ;;  %5316 = vmatpush.msk.msrb.mxu3 %vm1436_vm13, %v5714_v23  ;;  %2112 = vmatpush.msrb.mxu0 %v7010_v37 }
  0xfb   : > { %1551 = vmatmul.f32.gmra.mxu0 %v7079_v41  ;;  %5312 = vmatpush.msk.msrb.mxu1 %vm1424_vm3, %v5714_v23 }
  0xfc   : > { %v831_v40 = vadd.f32 %v830_v48, %v769_v44  ;;  %1646 = vmatmul.f32.gmra.mxu1 %v6815_v32  ;;  %1776 = vmatmul.f32.gmra.mxu3 %v7023_v52 }
  0xfd   : > { %5317 = vmatpush.msk.msrb.mxu3 %vm1434_vm14, %v5714_v23  ;;  %5313 = vmatpush.msk.msrb.mxu1 %vm1422_vm4, %v5714_v23 }
  0xfe   : > { %v7117_v38 = vadd.f32 %v890_v61, %v831_v40  ;;  %2115 = vmatpush.msrb.mxu0 %v7030_v1  ;;  %2243 = vmatpush.msrb.mxu2 %v8382_v5 }
  0xff   : > { %1715 = vmatmul.f32.gmra.mxu2 %v6967_v58  ;;  %v896_v35 = vpop.f32.mrf.mxu3  ;;  %5318 = vmatpush.msk.msrb.mxu3 %vm1432_vm15, %v5714_v23 }
 0x100   : > { %v7134_v31 = vpop.f32.mrf.mxu0  ;;  %5314 = vmatpush.msk.msrb.mxu1 %vm1420_vm5, %v5714_v23  ;;  %2247 = vmatpush.msrb.mxu2 %v8383_v22 }
 0x101   : > { %v772_v2 = vpop.f32.mrf.mxu1  ;;  %5319 = vmatpush.msk.msrb.mxu3 %vm1430_vm0, %v5714_v23 }
 0x102   : > { %v773_v8 = vadd.f32 %v772_v2, %v691_v33  ;;  %v835_v28 = vpop.f32.mrf.mxu2  ;;  %5315 = vmatpush.msk.msrb.mxu1 %vm1418_vm6, %v5714_v23  ;;  %2251 = vmatpush.msrb.mxu2 %v8384_v16 }
 0x103   : > { %1559 = vmatmul.f32.gmra.mxu0 %v7125_v34  ;;  %5320 = vmatpush.msk.msrb.mxu3 %vm1428_vm1, %v5714_v23 }
 0x104   : > { %v836_v12 = vadd.f32 %v835_v28, %v773_v8  ;;  %1650 = vmatmul.f32.gmra.mxu1 %v6937_v27  ;;  %1782 = vmatmul.f32.gmra.mxu3 %v7082_v0 }
 0x105   : > { %5321 = vmatpush.msk.msrb.mxu3 %vm1426_vm2, %v5714_v23  ;;  %2255 = vmatpush.msrb.mxu2 %v2051_v11 }
 0x106   : > { %v7165_v59 = vadd.f32 %v896_v35, %v836_v12 }
 0x107   : > { %1720 = vmatmul.f32.gmra.mxu2 %v7061_v24  ;;  %v1144_v13 = vpop.f32.mrf.mxu3  ;;  %5322 = vmatpush.msk.msrb.mxu3 %vm1424_vm3, %v5714_v23 }
 0x108   : > { %v7178_v14 = vpop.f32.mrf.mxu0 }
 0x109   : > { %v7186_v56 = vpop.f32.mrf.mxu1  ;;  %5323 = vmatpush.msk.msrb.mxu3 %vm1422_vm4, %v5714_v23 }
 0x10a   : > { %v1043_v15 = vpop.f32.mrf.mxu2 }
 0x10b   : > { %v7194_v62 = vadd.f32 %v1144_v13, %v1043_v15  ;;  %1567 = vmatmul.f32.gmra.mxu0 %v7172_v60  ;;  %5324 = vmatpush.msk.msrb.mxu3 %vm1420_vm5, %v5714_v23 }
 0x10c   : > { %1654 = vmatmul.f32.gmra.mxu1 %v7025_v10  ;;  %1788 = vmatmul.f32.gmra.mxu3 %v7128_v43 }
 0x10d   : > { %5325 = vmatpush.msk.msrb.mxu3 %vm1418_vm6, %v5714_v23 }
 0x10f   : > { %1725 = vmatmul.f32.gmra.mxu2 %v7103_v53  ;;  %v1148_v18 = vpop.f32.mrf.mxu3 }
 0x110   : > { %v7210_v55 = vpop.f32.mrf.mxu0 }
 0x111   : > { %8385 = vst [vmem:[#allocation27_spill] sm:$0xff] %v7210_v55  ;;  %v7212_v37 = vpop.f32.mrf.mxu1 }
 0x112   : > { %v1051_v19 = vpop.f32.mrf.mxu2 }
 0x113   : > { %v7214_v21 = vadd.f32 %v1148_v18, %v1051_v19  ;;  %1839 = vmatmul.f32.vlgmr.msra.gmra.mxu0 %v6759_v29 }
 0x114   : > { %1658 = vmatmul.f32.gmra.mxu1 %v7084_v42  ;;  %2056 = vmatmul.f32.vlgmr.msra.gmra.mxu3 %v6759_v29 }
 0x117   : > { %1945 = vmatmul.f32.vlgmr.msra.gmra.mxu2 %v6867_v39  ;;  %v1152_v4 = vpop.f32.mrf.mxu3 }
 0x118   : > { %v7220_v23 = vpop.f32.mrf.mxu0 }
 0x119   : > { %8386 = vst [vmem:[#allocation28_spill] sm:$0xff] %v7220_v23  ;;  %v7222_v7 = vpop.f32.mrf.mxu1 }
 0x11a   : > { %8387 = vst [vmem:[#allocation29_spill] sm:$0xff] %v7222_v7  ;;  %v1059_v1 = vpop.f32.mrf.mxu2 }
 0x11b   : > { %v7224_v11 = vadd.f32 %v1152_v4, %v1059_v1  ;;  %1843 = vmatmul.f32.gmra.mxu0 %v6795_v49 }
 0x11c   : > { %1890 = vmatmul.f32.vlgmr.msra.gmra.mxu1 %v6759_v29  ;;  %2060 = vmatmul.f32.gmra.mxu3 %v6795_v49 }
 0x11d   : > { %8388 = vst [vmem:[#allocation30_spill] sm:$0xff] %v7224_v11 }
 0x11f   : > { %1953 = vmatmul.f32.gmra.mxu2 %v6944_v26  ;;  %v1156_v30 = vpop.f32.mrf.mxu3 }
 0x120   : > { %v7230_v63 = vpop.f32.mrf.mxu0 }
 0x121   : > { %v7232_v39 = vpop.f32.mrf.mxu1 }
 0x122   : > { %8389 = vst [vmem:[#allocation31_spill] sm:$0xff] %v7232_v39  ;;  %v1067_v61 = vpop.f32.mrf.mxu2 }
 0x123   : > { %v7234_v33 = vadd.f32 %v1156_v30, %v1067_v61  ;;  %1847 = vmatmul.f32.gmra.mxu0 %v6815_v32 }
 0x124   : > { %1894 = vmatmul.f32.gmra.mxu1 %v6795_v49  ;;  %2064 = vmatmul.f32.gmra.mxu3 %v6815_v32 }
 0x125   : > { %8390 = vst [vmem:[#allocation32_spill] sm:$0xff] %v7234_v33  ;;  %v942_v33 = vadd.f32 %v7134_v31, %v6859_v3 }
 0x127   : > { %1961 = vmatmul.f32.gmra.mxu2 %v6959_v47  ;;  %v1160_v25 = vpop.f32.mrf.mxu3 }
 0x128   : > { %v7240_v44 = vpop.f32.mrf.mxu0 }
 0x129   : > { %v7242_v26 = vpop.f32.mrf.mxu1 }
 0x12a   : > { %8391 = vst [vmem:[#allocation33_spill] sm:$0xff] %v7242_v26  ;;  %v1075_v48 = vpop.f32.mrf.mxu2 }
 0x12b   : > { %v7244_v20 = vadd.f32 %v1160_v25, %v1075_v48  ;;  %1851 = vmatmul.f32.gmra.mxu0 %v6937_v27 }
 0x12c   : > { %1898 = vmatmul.f32.gmra.mxu1 %v6815_v32  ;;  %2068 = vmatmul.f32.gmra.mxu3 %v6937_v27 }
 0x12d   : > { %8392 = vst [vmem:[#allocation34_spill] sm:$0xff] %v7244_v20 }
 0x12f   : > { %1969 = vmatmul.f32.gmra.mxu2 %v7079_v41  ;;  %v1164_v40 = vpop.f32.mrf.mxu3 }
 0x130   : > { %v7250_v35 = vpop.f32.mrf.mxu0 }
 0x131   : > { %v7252_v47 = vpop.f32.mrf.mxu1  ;;  %v1203_v46 = vadd.f32 %v7250_v35, %v7194_v62 }
 0x132   : > { %v1083_v2 = vpop.f32.mrf.mxu2 }
 0x133   : > { %v7254_v8 = vadd.f32 %v1164_v40, %v1083_v2  ;;  %1855 = vmatmul.f32.gmra.mxu0 %v7025_v10 }
 0x134   : > { %1902 = vmatmul.f32.gmra.mxu1 %v6937_v27  ;;  %2072 = vmatmul.f32.gmra.mxu3 %v7025_v10 }
 0x135   : > { %8393 = vst [vmem:[#allocation35_spill] sm:$0xff] %v7254_v8 }
 0x137   : > { %1977 = vmatmul.f32.gmra.mxu2 %v7125_v34  ;;  %v7260_v28 = vpop.f32.mrf.mxu3 }
 0x138   : > { %v7262_v54 = vpop.f32.mrf.mxu0 }
 0x139   : > { %v7264_v41 = vpop.f32.mrf.mxu1 }
 0x13a   : > { %v7266_v12 = vpop.f32.mrf.mxu2  ;;  %v1259_v26 = vadd.f32 %v7264_v41, %v1203_v46 }
 0x13b   : > { %1859 = vmatmul.f32.gmra.mxu0 %v7084_v42 }
 0x13c   : > { %1906 = vmatmul.f32.gmra.mxu1 %v7025_v10  ;;  %2076 = vmatmul.f32.gmra.mxu3 %v7084_v42 }
 0x13f   : > { %1985 = vmatmul.f32.gmra.mxu2 %v7172_v60  ;;  %v7272_v5 = vpop.f32.mrf.mxu3 }
 0x140   : > { %v7274_v13 = vpop.f32.mrf.mxu0 }
 0x141   : > { %8394 = vst [vmem:[#allocation36_spill] sm:$0xff] %v7274_v13  ;;  %v7276_v34 = vpop.f32.mrf.mxu1 }
 0x142   : > { %v7278_v22 = vpop.f32.mrf.mxu2 }
 0x143   : > { %2118 = vmatmul.f32.vlgmr.msrb.gmra.mxu0 %v6777_v51 }
 0x144   : > { %1910 = vmatmul.f32.gmra.mxu1 %v7084_v42  ;;  %2308 = vmatmul.f32.vlgmr.msrb.gmra.mxu3 %v6759_v29 }
 0x147   : > { %2257 = vmatmul.f32.vlgmr.msrb.gmra.mxu2 %v6759_v29  ;;  %v7284_v15 = vpop.f32.mrf.mxu3 }
 0x148   : > { %8395 = vst [vmem:[#allocation37_spill] sm:$0xff] %v7284_v15  ;;  %v7286_v16 = vpop.f32.mrf.mxu0 }
 0x149   : > { %8396 = vst [vmem:[#allocation38_spill] sm:$0xff] %v7286_v16  ;;  %v7288_v60 = vpop.f32.mrf.mxu1 }
 0x14a   : > { %8397 = vst [vmem:[#allocation39_spill] sm:$0xff] %v7288_v60  ;;  %v7290_v18 = vpop.f32.mrf.mxu2 }
 0x14b   : > { %8398 = vst [vmem:[#allocation40_spill] sm:$0xff] %v7290_v18  ;;  %2123 = vmatmul.f32.gmra.mxu0 %v6838_v45 }
 0x14c   : > { %2176 = vmatmul.f32.vlgmr.msrb.gmra.mxu1 %v6793_v36  ;;  %2312 = vmatmul.f32.gmra.mxu3 %v6795_v49 }
 0x14f   : > { %2261 = vmatmul.f32.gmra.mxu2 %v6795_v49  ;;  %v7296_v51 = vpop.f32.mrf.mxu3 }
 0x150   : > { %8399 = vst [vmem:[#allocation41_spill] sm:$0xff] %v7296_v51  ;;  %v7298_v19 = vpop.f32.mrf.mxu0 }
 0x151   : > { %8400 = vst [vmem:[#allocation42_spill] sm:$0xff] %v7298_v19  ;;  %v7300_v29 = vpop.f32.mrf.mxu1 }
 0x152   : > { %8401 = vst [vmem:[#allocation43_spill] sm:$0xff] %v7300_v29  ;;  %v7302_v4 = vpop.f32.mrf.mxu2 }
 0x153   : > { %8402 = vst [vmem:[#allocation44_spill] sm:$0xff] %v7302_v4  ;;  %2128 = vmatmul.f32.gmra.mxu0 %v6851_v17 }
 0x154   : > { %2182 = vmatmul.f32.gmra.mxu1 %v6870_v50  ;;  %2316 = vmatmul.f32.gmra.mxu3 %v6815_v32 }
 0x157   : > { %2265 = vmatmul.f32.gmra.mxu2 %v6815_v32  ;;  %v7308_v36 = vpop.f32.mrf.mxu3 }
 0x158   : > { %8403 = vst [vmem:[#allocation45_spill] sm:$0xff] %v7308_v36  ;;  %v7310_v45 = vpop.f32.mrf.mxu0 }
 0x159   : > { %8404 = vst [vmem:[#allocation46_spill] sm:$0xff] %v7310_v45  ;;  %v7312_v49 = vpop.f32.mrf.mxu1 }
 0x15a   : > { %8405 = vst [vmem:[#allocation47_spill] sm:$0xff] %v7312_v49  ;;  %v7314_v1 = vpop.f32.mrf.mxu2 }
 0x15b   : > { %8406 = vst [vmem:[#allocation48_spill] sm:$0xff] %v7314_v1  ;;  %2133 = vmatmul.f32.gmra.mxu0 %v6967_v58 }
 0x15c   : > { %2188 = vmatmul.f32.gmra.mxu1 %v6885_v6  ;;  %2320 = vmatmul.f32.gmra.mxu3 %v6937_v27 }
 0x15f   : > { %2269 = vmatmul.f32.gmra.mxu2 %v6937_v27  ;;  %v7320_v17 = vpop.f32.mrf.mxu3 }
 0x160   : > { %8407 = vst [vmem:[#allocation49_spill] sm:$0xff] %v7320_v17  ;;  %v1528_v50 = vpop.f32.mrf.mxu0 }
 0x161   : > { %v7322_v32 = vpop.f32.mrf.mxu1 }
 0x162   : > { %8408 = vst [vmem:[#allocation50_spill] sm:$0xff] %v7322_v32  ;;  %v7324_v30 = vpop.f32.mrf.mxu2 }
 0x163   : > { %8409 = vst [vmem:[#allocation51_spill] sm:$0xff] %v7324_v30  ;;  %2138 = vmatmul.f32.gmra.mxu0 %v7061_v24 }
 0x164   : > { %2194 = vmatmul.f32.gmra.mxu1 %v7023_v52  ;;  %2324 = vmatmul.f32.gmra.mxu3 %v7025_v10 }
 0x167   : > { %2273 = vmatmul.f32.gmra.mxu2 %v7025_v10  ;;  %v1759_v6 = vpop.f32.mrf.mxu3 }
 0x168   : > { %v1536_v58 = vpop.f32.mrf.mxu0 }
 0x169   : > { %v1639_v61 = vpop.f32.mrf.mxu1 }
 0x16a   : > { %v1701_v25 = vpop.f32.mrf.mxu2  ;;  %v1640_v4 = vadd.f32 %v1639_v61, %v1528_v50  ;;  %v991_v50 = vadd.f32 %v7186_v56, %v942_v33 }
 0x16b   : > { %2143 = vmatmul.f32.gmra.mxu0 %v7103_v53 }
 0x16c   : > { %2200 = vmatmul.f32.gmra.mxu1 %v7082_v0  ;;  %2328 = vmatmul.f32.gmra.mxu3 %v7084_v42  ;;  %v1702_v29 = vadd.f32 %v1701_v25, %v1640_v4 }
 0x16e   : > { %v1760_v11 = vadd.f32 %v1759_v6, %v1702_v29  ;;  %v946_v29 = vadd.f32 %v7178_v14, %v6935_v57 }
 0x16f   : > { %2277 = vmatmul.f32.gmra.mxu2 %v7084_v42  ;;  %v1765_v27 = vpop.f32.mrf.mxu3 }
 0x170   : > { %v7334_v24 = vpop.f32.mrf.mxu0  ;;  %v995_v31 = vadd.f32 %v7212_v37, %v946_v29 }
 0x171   : > { %v1643_v52 = vpop.f32.mrf.mxu1 }
 0x172   : > { %v1706_v48 = vpop.f32.mrf.mxu2  ;;  %v1644_v49 = vadd.f32 %v1643_v52, %v1536_v58 }
 0x174   : > { %2206 = vmatmul.f32.gmra.mxu1 %v7128_v43  ;;  %v1707_v61 = vadd.f32 %v1706_v48, %v1644_v49 }
 0x176   : > { %v1766_v4 = vadd.f32 %v1765_v27, %v1707_v61 }
 0x177   : > { %v7337_v10 = vpop.f32.mrf.mxu3 }
 0x178   : > { %v7339_v40 = vpop.f32.mrf.mxu0 }
 0x179   : > { %v7341_v2 = vpop.f32.mrf.mxu1 }
 0x17a   : > { %v7343_v53 = vpop.f32.mrf.mxu2 }
 0x17f   : > { %v7345_v0 = vpop.f32.mrf.mxu3 }
 0x180   : > { %v7347_v15 = vpop.f32.mrf.mxu0 }
 0x181   : > { %v7349_v42 = vpop.f32.mrf.mxu1 }
 0x182   : > { %v7351_v51 = vpop.f32.mrf.mxu2  ;;  %v1652_v39 = vadd.f32 %v7349_v42, %v7339_v40 }
 0x187   : > { %v7353_v36 = vpop.f32.mrf.mxu3 }
 0x188   : > { %v7355_v18 = vpop.f32.mrf.mxu0 }
 0x189   : > { %v7357_v43 = vpop.f32.mrf.mxu1 }
 0x18a   : > { %v7359_v17 = vpop.f32.mrf.mxu2 }
 0x18f   : > { %v7361_v1 = vpop.f32.mrf.mxu3 }
 0x190   : > { %v1840_v60 = vpop.f32.mrf.mxu0 }
 0x191   : > { %v7363_v30 = vpop.f32.mrf.mxu1  ;;  %v1841_v32 = vadd.f32 %v1840_v60, %v1760_v11 }
 0x192   : > { %v7365_v13 = vpop.f32.mrf.mxu2 }
 0x197   : > { %v7367_v16 = vpop.f32.mrf.mxu3 }
 0x198   : > { %v1844_v19 = vpop.f32.mrf.mxu0 }
 0x199   : > { %v1891_v20 = vpop.f32.mrf.mxu1  ;;  %v1845_v6 = vadd.f32 %v1844_v19, %v1766_v4 }
 0x19a   : > { %v1892_v45 = vadd.f32 %v1891_v20, %v1841_v32  ;;  %v7372_v8 = vpop.f32.mrf.mxu2 }
 0x19c   : > { %v2332_v7 = vmul.f32 %v1892_v45, %v991_v50  ;;  %v2336_v45 = vld [vmem:[%s8339_s3] sm:$0x1] }
 0x19d   : > { %v2341_v57 = vsel %vm2339_vm7, %v2336_v45, 0 }
 0x19e   : > { %v2359_v58 = vand.u32 4294901760, %v2332_v7  ;;  %v7391_v32 = vand.u32 4294901760, %v2341_v57 }
 0x19f   : > { %v7374_v25 = vpop.f32.mrf.mxu3 }
 0x1a0   : > { %v7378_v52 = vpop.f32.mrf.mxu0  ;;  %v2391_v20 = vsub.f32 %v2332_v7, %v2359_v58  ;;  %v7398_v50 = vsub.f32 %v2341_v57, %v7391_v32 }
 0x1a1   : > { %v1895_v3 = vpop.f32.mrf.mxu1 }
 0x1a2   : > { %v1896_v11 = vadd.f32 %v1895_v3, %v1845_v6  ;;  %v7381_v56 = vpop.f32.mrf.mxu2  ;;  %v2392_v37 = vand.u32 4294901760, %v2391_v20  ;;  %v7401_v29 = vand.u32 4294901760, %v7398_v50 }
 0x1a4   : > { %v2334_v33 = vmul.f32 %v1896_v11, %v995_v31  ;;  %v2393_v4 = vsub.f32 %v2391_v20, %v2392_v37  ;;  %v2364_v3 = vsub.f32 %v7398_v50, %v7401_v29 }
 0x1a6   : > { %v2357_v60 = vand.u32 4294901760, %v2334_v33  ;;  %v7409_v45 = vand.u32 4294901760, %v2364_v3 }
 0x1a7   : > { %v7386_v49 = vpop.f32.mrf.mxu3 }
 0x1a8   : > { %v2385_v14 = vsub.f32 %v2334_v33, %v2357_v60  ;;  %v7389_v19 = vpop.f32.mrf.mxu0  ;;  %2358 = vmatpush.msra.mxu0 %v2357_v60  ;;  %2442 = vmatpush.msra.mxu3 %v2357_v60  ;;  %v2394_v33 = vand.u32 4294901760, %v2393_v4  ;;  %v1660_v4 = vadd.f32 %v7363_v30, %v7355_v18  ;;  %v1648_v18 = vadd.f32 %v7341_v2, %v7334_v24 }
 0x1a9   : > { %v7393_v27 = vpop.f32.mrf.mxu1 }
 0x1aa   : > { %2360 = vmatpush.msra.mxu0 %v2359_v58  ;;  %2417 = vmatpush.msra.mxu2 %v2385_v14  ;;  %v7395_v7 = vpop.f32.mrf.mxu2  ;;  %v2386_v48 = vand.u32 4294901760, %v2385_v14  ;;  %v1727_v55 = vadd.f32 %v7365_v13, %v1660_v4  ;;  %v1712_v4 = vadd.f32 %v7343_v53, %v1648_v18 }
 0x1ab   : > { %2444 = vmatpush.msra.mxu3 %v2359_v58  ;;  %2366 = vmatmul.f32.vlgmr.msra.gmra.mxu0 %v7409_v45 }
 0x1ac   : > { %2420 = vmatpush.msra.mxu2 %v2391_v20  ;;  %2469 = vmatpush.msrb.mxu0 %v2386_v48  ;;  %v2387_v61 = vsub.f32 %v2385_v14, %v2386_v48  ;;  %v1790_v23 = vadd.f32 %v7361_v1, %v1727_v55  ;;  %v1208_v55 = vadd.f32 %v7262_v54, %v7214_v21 }
 0x1ad   : > { %2423 = vmatmul.f32.vlgmr.msra.gmra.mxu2 %v7398_v50  ;;  %2448 = vmatmul.f32.vlgmr.msra.gmra.mxu3 %v7401_v29 }
 0x1ae   : > { %2473 = vmatpush.msrb.mxu0 %v2392_v37  ;;  %v2388_v6 = vand.u32 4294901760, %v2387_v61 }
 0x1af   : > { %v7407_v31 = vpop.f32.mrf.mxu3 }
 0x1b0   : > { %v1856_v11 = vpop.f32.mrf.mxu0  ;;  %2389 = vmatpush.msra.mxu1 %v2388_v6 }
 0x1b1   : > { %v1903_v20 = vpop.f32.mrf.mxu1 }
 0x1b2   : > { %2395 = vmatpush.msra.mxu1 %v2394_v33  ;;  %v7411_v57 = vpop.f32.mrf.mxu2 }
 0x1b3   : > { %2397 = vmatmul.f32.vlgmr.msra.gmra.mxu1 %v7391_v32  ;;  %2475 = vmatmul.f32.vlgmr.msrb.gmra.mxu0 %v7391_v32 }
 0x1b4   : > { %2494 = vmatpush.msrb.mxu1 %v2357_v60  ;;  %v1656_v60 = vadd.f32 %v7357_v43, %v7347_v15  ;;  %v2058_v15 = vadd.f32 %v7367_v16, %v7372_v8  ;;  %v1717_v43 = vadd.f32 %v7351_v51, %v1652_v39  ;;  %v1772_v51 = vadd.f32 %v7337_v10, %v1712_v4 }
 0x1b6   : > { %2496 = vmatpush.msrb.mxu1 %v2359_v58  ;;  %v1722_v30 = vadd.f32 %v7359_v17, %v1656_v60  ;;  %v1334_v17 = vadd.f32 %v7266_v12, %v1259_v26  ;;  %v1778_v41 = vadd.f32 %v7345_v0, %v1717_v43  ;;  %v2062_v26 = vadd.f32 %v7374_v25, %v7381_v56 }
 0x1b7   : > { %v7415_v14 = vpop.f32.mrf.mxu3  ;;  %v1849_v0 = vadd.f32 %v7378_v52, %v1772_v51 }
 0x1b8   : > { %v1860_v37 = vpop.f32.mrf.mxu0  ;;  %v1784_v62 = vadd.f32 %v7353_v36, %v1722_v30  ;;  %v1853_v1 = vadd.f32 %v7389_v19, %v1778_v41  ;;  %v1265_v36 = vadd.f32 %v7276_v34, %v1208_v55  ;;  %v2704_v55 = vld [vmem:[#allocation8 + $0x8] sm:$0xff] }
 0x1b9   : > { %v1907_v48 = vpop.f32.mrf.mxu1  ;;  %v1861_v35 = vadd.f32 %v1860_v37, %v1790_v23  ;;  %v1383_v23 = vadd.f32 %v7260_v28, %v1334_v17  ;;  %v1900_v19 = vadd.f32 %v7393_v27, %v1849_v0 }
 0x1ba   : > { %v7417_v61 = vpop.f32.mrf.mxu2  ;;  %v1857_v8 = vadd.f32 %v1856_v11, %v1784_v62  ;;  %v1904_v11 = vadd.f32 %v1903_v20, %v1853_v1  ;;  %v1338_v34 = vadd.f32 %v7278_v22, %v1265_v36  ;;  %v2703_v20 = vld [vmem:[#allocation8] sm:$0xff] }
 0x1bb   : > { %2498 = vmatmul.f32.vlgmr.msrb.gmra.mxu1 %v7391_v32  ;;  %v7470_v30 = vand.u32 4294901760, %v1900_v19  ;;  %v2709_v43 = vsel %vm2707_vm8, %v2703_v20, 0 }
 0x1bc   : > { %v1908_v53 = vadd.f32 %v1907_v48, %v1857_v8  ;;  %v7463_v56 = vand.u32 4294901760, %v1904_v11 }
 0x1be   : > { %v7460_v48 = vand.u32 4294901760, %v1908_v53 }
 0x1bf   : > { %v7423_v6 = vpop.f32.mrf.mxu3 }
 0x1c0   : > { %v2119_v3 = vpop.f32.mrf.mxu0  ;;  %v7473_v27 = vsub.f32 %v1908_v53, %v7460_v48 }
 0x1c1   : > { %v1911_v58 = vpop.f32.mrf.mxu1  ;;  %v2120_v42 = vadd.f32 %v2119_v3, %v2058_v15  ;;  %v1387_v15 = vadd.f32 %v7272_v5, %v1338_v34 }
 0x1c2   : > { %v7427_v33 = vpop.f32.mrf.mxu2  ;;  %v1912_v16 = vadd.f32 %v1911_v58, %v1861_v35  ;;  %v7485_v35 = vsub.f32 %v1900_v19, %v7470_v30  ;;  %v2793_v5 = vand.u32 4294901760, %v7473_v27 }
 0x1c4   : > { %v7455_v37 = vand.u32 4294901760, %v1912_v16  ;;  %v2794_v1 = vsub.f32 %v7473_v27, %v2793_v5  ;;  %v2805_v53 = vand.u32 4294901760, %v7485_v35 }
 0x1c6   : > { %v7466_v52 = vsub.f32 %v1912_v16, %v7455_v37  ;;  %v2795_v19 = vand.u32 4294901760, %v2794_v1 }
 0x1c7   : > { %v2309_v40 = vpop.f32.mrf.mxu3 }
 0x1c8   : > { %v2124_v13 = vpop.f32.mrf.mxu0 }
 0x1c9   : > { %v2177_v24 = vpop.f32.mrf.mxu1  ;;  %v2125_v54 = vadd.f32 %v2124_v13, %v2062_v26  ;;  %v2712_v26 = vsel %vm2707_vm8, %v2704_v55, 0  ;;  %v2066_v55 = vadd.f32 %v7386_v49, %v7395_v7 }
 0x1ca   : > { %v2178_v2 = vadd.f32 %v2177_v24, %v2120_v42  ;;  %v2258_v46 = vpop.f32.mrf.mxu2  ;;  %v2787_v42 = vand.u32 4294901760, %v7466_v52  ;;  %v7526_v34 = vand.u32 4294901760, %v2712_v26 }
 0x1cc   : > { %v2259_v39 = vadd.f32 %v2258_v46, %v2178_v2  ;;  %v7490_v2 = vand.u32 4294901760, %v2709_v43  ;;  %v2788_v8 = vsub.f32 %v7466_v52, %v2787_v42 }
 0x1ce   : > { %v2310_v12 = vadd.f32 %v2309_v40, %v2259_v39  ;;  %v7478_v40 = vsub.f32 %v1904_v11, %v7463_v56 }
 0x1cf   : > { %v2313_v21 = vpop.f32.mrf.mxu3 }
 0x1d0   : > { %v2333_v3 = vmul.f32 %v2310_v12, %v1383_v23  ;;  %v7457_v10 = vpop.f32.mrf.mxu0  ;;  %v2799_v16 = vand.u32 4294901760, %v7478_v40  ;;  %v7508_v23 = vsub.f32 %v2709_v43, %v7490_v2  ;;  %v2789_v12 = vand.u32 4294901760, %v2788_v8 }
 0x1d1   : > { %v2183_v28 = vpop.f32.mrf.mxu1  ;;  %v2130_v49 = vadd.f32 %v7457_v10, %v2066_v55 }
 0x1d2   : > { %v2184_v60 = vadd.f32 %v2183_v28, %v2125_v54  ;;  %v2262_v25 = vpop.f32.mrf.mxu2  ;;  %v7468_v58 = vand.u32 4294901760, %v2333_v3  ;;  %v2800_v0 = vsub.f32 %v7478_v40, %v2799_v16  ;;  %v7524_v28 = vand.u32 4294901760, %v7508_v23 }
 0x1d4   : > { %v2263_v18 = vadd.f32 %v2262_v25, %v2184_v60  ;;  %v2550_v62 = vsub.f32 %v2333_v3, %v7468_v58  ;;  %v2801_v20 = vand.u32 4294901760, %v2800_v0  ;;  %v2743_v43 = vsub.f32 %v7508_v23, %v7524_v28 }
 0x1d6   : > { %v2314_v22 = vadd.f32 %v2313_v21, %v2263_v18  ;;  %v2551_v51 = vand.u32 4294901760, %v2550_v62  ;;  %v2705_v18 = vld [vmem:[#allocation8 + $0x10] sm:$0xff] }
 0x1d7   : > { %v7481_v13 = vpop.f32.mrf.mxu3  ;;  %v2715_v8 = vsel %vm2707_vm8, %v2705_v18, 0 }
 0x1d8   : > { %v2335_v4 = vmul.f32 %v2314_v22, %v1387_v15  ;;  %v2134_v24 = vpop.f32.mrf.mxu0  ;;  %v2552_v54 = vsub.f32 %v2550_v62, %v2551_v51  ;;  %v7554_v1 = vand.u32 4294901760, %v2715_v8 }
 0x1d9   : > { %v7487_v17 = vpop.f32.mrf.mxu1 }
 0x1da   : > { %v7492_v46 = vand.u32 4294901760, %v2335_v4  ;;  %v7494_v41 = vpop.f32.mrf.mxu2  ;;  %v2553_v15 = vand.u32 4294901760, %v2552_v54 }
 0x1dc   : > { %v2544_v39 = vsub.f32 %v2335_v4, %v7492_v46  ;;  %2517 = vmatpush.msrb.mxu2 %v7492_v46  ;;  %2601 = vmatpush.msra.mxu1 %v7492_v46  ;;  %v2070_v4 = vadd.f32 %v7407_v31, %v7411_v57  ;;  %v7549_v57 = vand.u32 4294901760, %v2743_v43  ;;  %v8413_v43 = vld [vmem:[#allocation27_spill] sm:$0xff] }
 0x1de   : > { %2519 = vmatpush.msrb.mxu2 %v7468_v58  ;;  %2576 = vmatpush.msra.mxu0 %v2544_v39  ;;  %v2545_v36 = vand.u32 4294901760, %v2544_v39 }
 0x1df   : > { %2603 = vmatpush.msra.mxu1 %v7468_v58  ;;  %2525 = vmatmul.f32.vlgmr.msrb.gmra.mxu2 %v7409_v45  ;;  %v7517_v11 = vpop.f32.mrf.mxu3  ;;  %v2806_v45 = vsub.f32 %v7485_v35, %v2805_v53 }
 0x1e0   : > { %2607 = vmatmul.f32.vlgmr.msra.gmra.mxu1 %v7401_v29  ;;  %2579 = vmatpush.msra.mxu0 %v2550_v62  ;;  %v2546_v21 = vsub.f32 %v2544_v39, %v2545_v36  ;;  %v2139_v25 = vpop.f32.mrf.mxu0  ;;  %v2074_v62 = vadd.f32 %v7415_v14, %v7417_v61  ;;  %v2135_v39 = vadd.f32 %v2134_v24, %v2070_v4 }
 0x1e1   : > { %2790 = vmatpush.msrb.mxu1 %v2789_v12  ;;  %2628 = vmatpush.msra.mxu2 %v2545_v36  ;;  %v2195_v3 = vpop.f32.mrf.mxu1  ;;  %v2807_v22 = vand.u32 4294901760, %v2806_v45  ;;  %v2190_v12 = vadd.f32 %v7487_v17, %v2130_v49  ;;  %v2078_v17 = vadd.f32 %v7423_v6, %v7427_v33  ;;  %v958_v45 = vadd.f32 %v7230_v63, %v7117_v38 }
 0x1e2   : > { %2582 = vmatmul.f32.vlgmr.msra.gmra.mxu0 %v7398_v50  ;;  %v2270_v60 = vpop.f32.mrf.mxu2  ;;  %v2547_v29 = vand.u32 4294901760, %v2546_v21  ;;  %v7534_v50 = vsub.f32 %v2712_v26, %v7526_v34  ;;  %v2196_v7 = vadd.f32 %v2195_v3, %v2135_v39  ;;  %v2706_v26 = vld [vmem:[#allocation8 + $0x18] sm:$0xff]  ;;  %v7570_v21 = vsub.f32 %v2715_v8, %v7554_v1 }
 0x1e3   : > { %2733 = vmatpush.msrb.mxu0 %v7455_v37  ;;  %2796 = vmatpush.msrb.mxu1 %v2795_v19 }
 0x1e4   : > { %2632 = vmatpush.msra.mxu2 %v2551_v51  ;;  %2548 = vmatpush.msrb.mxu3 %v2547_v29  ;;  %v2140_v51 = vadd.f32 %v2139_v25, %v2074_v62  ;;  %v7552_v61 = vand.u32 4294901760, %v7534_v50  ;;  %v2271_v54 = vadd.f32 %v2270_v60, %v2196_v7  ;;  %v8410_v29 = vld [vmem:[#allocation28_spill] sm:$0xff]  ;;  %v8414_v62 = vld [vmem:[#allocation31_spill] sm:$0xff] }
 0x1e5   : > { %2735 = vmatpush.msrb.mxu0 %v7460_v48  ;;  %2802 = vmatpush.msrb.mxu1 %v2801_v20  ;;  %v954_v25 = vadd.f32 %v8410_v29, %v7071_v9  ;;  %v8411_v20 = vld [vmem:[#allocation33_spill] sm:$0xff] }
 0x1e6   : > { %2840 = vmatpush.msrb.mxu2 %v7466_v52  ;;  %2554 = vmatpush.msrb.mxu3 %v2553_v15  ;;  %v2718_v52 = vsel %vm2707_vm8, %v2706_v26, 0  ;;  %v1007_v18 = vadd.f32 %v8411_v20, %v958_v45  ;;  %v8419_v20 = vld [vmem:[#allocation42_spill] sm:$0xff] }
 0x1e7   : > { %2737 = vmatpush.msrb.mxu0 %v7463_v56  ;;  %2808 = vmatpush.msrb.mxu1 %v2807_v22  ;;  %v2325_v14 = vpop.f32.mrf.mxu3  ;;  %v1003_v9 = vadd.f32 %v8414_v62, %v954_v25 }
 0x1e8   : > { %2843 = vmatpush.msrb.mxu2 %v7473_v27  ;;  %2556 = vmatmul.f32.vlgmr.msrb.gmra.mxu3 %v7391_v32  ;;  %v2144_v0 = vpop.f32.mrf.mxu0  ;;  %v7590_v27 = vand.u32 4294901760, %v2718_v52  ;;  %v7643_v49 = vand.u32 4294901760, %v1007_v18 }
 0x1e9   : > { %2974 = vmatpush.msra.mxu1 %v7455_v37  ;;  %2634 = vmatmul.f32.vlgmr.msra.gmra.mxu2 %v7391_v32  ;;  %v2201_v31 = vpop.f32.mrf.mxu1  ;;  %v7650_v26 = vand.u32 4294901760, %v1003_v9 }
 0x1ea   : > { %2653 = vmatpush.msra.mxu3 %v7492_v46  ;;  %2739 = vmatpush.msrb.mxu0 %v7470_v30  ;;  %v2202_v24 = vadd.f32 %v2201_v31, %v2140_v51  ;;  %v2274_v36 = vpop.f32.mrf.mxu2  ;;  %v2751_v46 = vsub.f32 %v7534_v50, %v7552_v61  ;;  %v8415_v31 = vld [vmem:[#allocation29_spill] sm:$0xff] }
 0x1eb   : > { %2810 = vmatmul.f32.vlgmr.msrb.gmra.mxu1 %v7490_v2  ;;  %2846 = vmatpush.msrb.mxu2 %v7478_v40 }
 0x1ec   : > { %2931 = vmatpush.msra.mxu0 %v2787_v42  ;;  %2976 = vmatpush.msra.mxu1 %v7460_v48  ;;  %v2275_v10 = vadd.f32 %v2274_v36, %v2202_v24  ;;  %v2145_v42 = vadd.f32 %v2144_v0, %v2078_v17  ;;  %v7585_v33 = vand.u32 4294901760, %v2751_v46 }
 0x1ed   : > { %2655 = vmatpush.msra.mxu3 %v7468_v58  ;;  %2745 = vmatmul.f32.vlgmr.msrb.gmra.mxu0 %v7549_v57  ;;  %v2267_v58 = vadd.f32 %v7494_v41, %v2190_v12 }
 0x1ee   : > { %2849 = vmatpush.msrb.mxu2 %v7485_v35  ;;  %2935 = vmatpush.msra.mxu0 %v2793_v5  ;;  %v2326_v3 = vadd.f32 %v2325_v14, %v2275_v10  ;;  %v2322_v5 = vadd.f32 %v7517_v11, %v2271_v54  ;;  %v7660_v54 = vsub.f32 %v1007_v18, %v7643_v49 }
 0x1ef   : > { %2884 = vmatpush.msrb.mxu3 %v7455_v37  ;;  %2978 = vmatpush.msra.mxu1 %v7463_v56  ;;  %v7588_v37 = vand.u32 4294901760, %v7570_v21  ;;  %v2329_v40 = vpop.f32.mrf.mxu3 }
 0x1f0   : > { %2939 = vmatpush.msra.mxu0 %v2799_v16  ;;  %2657 = vmatmul.f32.vlgmr.msra.gmra.mxu3 %v7391_v32  ;;  %v2318_v16 = vadd.f32 %v7481_v13, %v2267_v58  ;;  %v7599_v19 = vand.u32 4294901760, %v2326_v3  ;;  %v7609_v32 = vsub.f32 %v2718_v52, %v7590_v27 }
 0x1f1   : > { %2886 = vmatpush.msrb.mxu3 %v7460_v48  ;;  %2980 = vmatpush.msra.mxu1 %v7470_v30  ;;  %v2207_v6 = vpop.f32.mrf.mxu1  ;;  %v2759_v35 = vsub.f32 %v7570_v21, %v7588_v37 }
 0x1f2   : > { %2852 = vmatmul.f32.vlgmr.msrb.gmra.mxu2 %v7508_v23  ;;  %v2208_v48 = vadd.f32 %v2207_v6, %v2145_v42  ;;  %v2278_v41 = vpop.f32.mrf.mxu2  ;;  %2943 = vmatpush.msra.mxu0 %v2805_v53  ;;  %v7611_v53 = vand.u32 4294901760, %v2322_v5  ;;  %v7616_v60 = vand.u32 4294901760, %v2318_v16  ;;  %v7627_v22 = vand.u32 4294901760, %v7609_v32 }
 0x1f3   : > { %2888 = vmatpush.msrb.mxu3 %v7463_v56  ;;  %2814 = vmatmul.f32.gmra.mxu1 %v7526_v34  ;;  %v962_v56 = vadd.f32 %v7240_v44, %v7165_v59  ;;  %v3070_v59 = vsub.f32 %v2326_v3, %v7599_v19  ;;  %v7624_v15 = vand.u32 4294901760, %v2759_v35  ;;  %v7668_v42 = vsub.f32 %v1003_v9, %v7650_v26  ;;  %v8424_v9 = vld [vmem:[#allocation30_spill] sm:$0xff] }
 0x1f4   : > { %v2279_v11 = vadd.f32 %v2278_v41, %v2208_v48  ;;  %v3076_v38 = vsub.f32 %v2322_v5, %v7611_v53  ;;  %v3082_v55 = vsub.f32 %v2318_v16, %v7616_v60  ;;  %v2767_v7 = vsub.f32 %v7609_v32, %v7627_v22 }
 0x1f5   : > { %2890 = vmatpush.msrb.mxu3 %v7470_v30  ;;  %2753 = vmatmul.f32.gmra.mxu0 %v7585_v33  ;;  %v1011_v30 = vadd.f32 %v7252_v47, %v962_v56  ;;  %v8412_v47 = vld [vmem:[#allocation26_spill] sm:$0xff]  ;;  %v3071_v51 = vand.u32 4294901760, %v3070_v59  ;;  %v3361_v41 = vand.u32 4294901760, %v7660_v54 }
 0x1f6   : > { %v2330_v13 = vadd.f32 %v2329_v40, %v2279_v11  ;;  %v950_v4 = vadd.f32 %v8413_v43, %v8412_v47  ;;  %v3077_v36 = vand.u32 4294901760, %v3076_v38  ;;  %v3083_v46 = vand.u32 4294901760, %v3082_v55  ;;  %v8422_v47 = vld [vmem:[#allocation38_spill] sm:$0xff] }
 0x1f7   : > { %v7636_v8 = vand.u32 4294901760, %v1011_v30  ;;  %v3072_v0 = vsub.f32 %v3070_v59, %v3071_v51  ;;  %v7663_v52 = vand.u32 4294901760, %v2767_v7  ;;  %v3367_v11 = vand.u32 4294901760, %v7668_v42 }
 0x1f8   : > { %v7619_v44 = vand.u32 4294901760, %v2330_v13  ;;  %2894 = vmatmul.f32.vlgmr.msrb.gmra.mxu3 %v7524_v28  ;;  %v999_v14 = vadd.f32 %v8415_v31, %v950_v4  ;;  %v3078_v58 = vsub.f32 %v3076_v38, %v3077_v36  ;;  %v3084_v5 = vsub.f32 %v3082_v55, %v3083_v46  ;;  %v8423_v4 = vld [vmem:[#allocation47_spill] sm:$0xff] }
 0x1f9   : > { %v7653_v12 = vsub.f32 %v1011_v30, %v7636_v8  ;;  %v3073_v6 = vand.u32 4294901760, %v3072_v0  ;;  %v3362_v35 = vsub.f32 %v7660_v54, %v3361_v41  ;;  %v3368_v30 = vsub.f32 %v7668_v42, %v3367_v11 }
 0x1fa   : > { %v3064_v63 = vsub.f32 %v2330_v13, %v7619_v44  ;;  %2857 = vmatmul.f32.gmra.mxu2 %v7534_v50  ;;  %3162 = vmatpush.msrb.mxu1 %v7619_v44  ;;  %v7657_v17 = vand.u32 4294901760, %v999_v14  ;;  %v3079_v40 = vand.u32 4294901760, %v3078_v58  ;;  %v3085_v56 = vand.u32 4294901760, %v3084_v5  ;;  %v8432_v5 = vld [vmem:[#allocation40_spill] sm:$0xff] }
 0x1fb   : > { %3011 = vmatpush.msra.mxu2 %v7619_v44  ;;  %2818 = vmatmul.f32.gmra.mxu1 %v7554_v1  ;;  %v3355_v3 = vand.u32 4294901760, %v7653_v12  ;;  %v3369_v25 = vand.u32 4294901760, %v3368_v30 }
 0x1fc   : > { %3118 = vmatpush.msrb.mxu0 %v3064_v63  ;;  %v3065_v39 = vand.u32 4294901760, %v3064_v63  ;;  %3164 = vmatpush.msrb.mxu1 %v7599_v19  ;;  %v7674_v48 = vsub.f32 %v999_v14, %v7657_v17  ;;  %v8427_v14 = vld [vmem:[#allocation51_spill] sm:$0xff] }
 0x1fd   : > { %2761 = vmatmul.f32.gmra.mxu0 %v7624_v15  ;;  %3013 = vmatpush.msra.mxu2 %v7599_v19  ;;  %v3356_v16 = vsub.f32 %v7653_v12, %v3355_v3 }
 0x1fe   : > { %3121 = vmatpush.msrb.mxu0 %v3070_v59  ;;  %v3066_v24 = vsub.f32 %v3064_v63, %v3065_v39  ;;  %3166 = vmatpush.msrb.mxu1 %v7611_v53  ;;  %v3373_v13 = vand.u32 4294901760, %v7674_v48  ;;  %v3363_v59 = vand.u32 4294901760, %v3362_v35  ;;  %v8421_v63 = vld [vmem:[#allocation32_spill] sm:$0xff]  ;;  %v8434_v35 = vld [vmem:[#allocation41_spill] sm:$0xff] }
 0x1ff   : > { %3015 = vmatpush.msra.mxu2 %v7611_v53  ;;  %v3357_v45 = vand.u32 4294901760, %v3356_v16  ;;  %v1218_v43 = vadd.f32 %v8422_v47, %v8421_v63  ;;  %v8433_v16 = vld [vmem:[#allocation45_spill] sm:$0xff] }
 0x200   : > { %3124 = vmatpush.msrb.mxu0 %v3076_v38  ;;  %v3067_v10 = vand.u32 4294901760, %v3066_v24  ;;  %3168 = vmatpush.msrb.mxu1 %v7616_v60  ;;  %v3374_v29 = vsub.f32 %v7674_v48, %v3373_v13  ;;  %v8420_v38 = vld [vmem:[#allocation50_spill] sm:$0xff]  ;;  %v8428_v24 = vld [vmem:[#allocation39_spill] sm:$0xff] }
 0x201   : > { %3017 = vmatpush.msra.mxu2 %v7616_v60  ;;  %2900 = vmatmul.f32.gmra.mxu3 %v7552_v61 }
 0x202   : > { %2862 = vmatmul.f32.gmra.mxu2 %v7570_v21  ;;  %3068 = vmatpush.msra.mxu3 %v3067_v10  ;;  %v8429_v10 = vld [vmem:[#allocation48_spill] sm:$0xff] }
 0x203   : > { %3209 = vmatpush.msrb.mxu2 %v3065_v39  ;;  %2822 = vmatmul.f32.gmra.mxu1 %v7590_v27 }
 0x204   : > { %3127 = vmatpush.msrb.mxu0 %v3082_v55  ;;  %3074 = vmatpush.msra.mxu3 %v3073_v6  ;;  %v8425_v55 = vld [vmem:[#allocation36_spill] sm:$0xff] }
 0x205   : > { %2769 = vmatmul.f32.gmra.mxu0 %v7663_v52  ;;  %3213 = vmatpush.msrb.mxu2 %v3071_v51  ;;  %v1213_v39 = vadd.f32 %v8425_v55, %v8424_v9  ;;  %v8426_v51 = vld [vmem:[#allocation43_spill] sm:$0xff] }
 0x206   : > { %3080 = vmatpush.msra.mxu3 %v3079_v40  ;;  %v1277_v31 = vadd.f32 %v8426_v51, %v1218_v43 }
 0x207   : > { %3217 = vmatpush.msrb.mxu2 %v3077_v36  ;;  %v1271_v36 = vadd.f32 %v8428_v24, %v1213_v39 }
 0x208   : > { %3086 = vmatpush.msra.mxu3 %v3085_v56 }
 0x209   : > { %3221 = vmatpush.msrb.mxu2 %v3083_v46  ;;  %2906 = vmatmul.f32.gmra.mxu3 %v7588_v37  ;;  %v8430_v46 = vld [vmem:[#allocation44_spill] sm:$0xff]  ;;  %v1342_v40 = vadd.f32 %v8432_v5, %v1271_v36  ;;  %v5716_v36 = vmov 0  }
 0x20a   : > { %2867 = vmatmul.f32.gmra.mxu2 %v7609_v32  ;;  %3252 = vmatpush.msrb.mxu3 %v7619_v44  ;;  %v3375_v44 = vand.u32 4294901760, %v3374_v29  ;;  %v1346_v58 = vadd.f32 %v8430_v46, %v1277_v31 }
 0x20b   : > { %2982 = vmatmul.f32.vlgmr.msra.gmra.mxu1 %v7490_v2  ;;  %5443 = vset.pattern.permute.xlu1 %v5716_v36 }
 0x20c   : > { %3358 = vmatpush.msra.mxu1 %v3357_v45  ;;  %3254 = vmatpush.msrb.mxu3 %v7599_v19  ;;  %v8417_v19 = vld [vmem:[#allocation46_spill] sm:$0xff]  ;;  %v1395_v45 = vadd.f32 %v8434_v35, %v1346_v58  ;;  %v3844_v58 = vld [vmem:[%s8342_s6] sm:$0xff]  ;;  %v3847_v35 = vld [vmem:[%s8342_s6 + $0x18] sm:$0xff] }
 0x20d   : > { %2945 = vmatmul.f32.vlgmr.msra.gmra.mxu0 %v7490_v2  ;;  %5442 = vset.pattern.permute.xlu0 %v5716_v36 }
 0x20e   : > { %3301 = vmatpush.msra.mxu0 %v7636_v8  ;;  %3364 = vmatpush.msra.mxu1 %v3363_v59  ;;  %v8435_v59 = vld [vmem:[#allocation37_spill] sm:$0xff] }
 0x20f   : > { %3256 = vmatpush.msrb.mxu3 %v7611_v53  ;;  %v1391_v29 = vadd.f32 %v8435_v59, %v1342_v40  ;;  %5444 = vset.pattern.permute.xlu2 %v5716_v36 }
 0x210   : > { %3303 = vmatpush.msra.mxu0 %v7643_v49  ;;  %3370 = vmatpush.msra.mxu1 %v3369_v25 }
 0x211   : > { %2912 = vmatmul.f32.gmra.mxu3 %v7627_v22  ;;  %3865 = vperm.xlu0 %5442, %v3847_v35  }
 0x212   : > { %3305 = vmatpush.msra.mxu0 %v7650_v26  ;;  %3023 = vmatmul.f32.vlgmr.msra.gmra.mxu2 %v7549_v57  ;;  %v8416_v57 = vld [vmem:[#allocation35_spill] sm:$0xff] }
 0x213   : > { %3376 = vmatpush.msra.mxu1 %v3375_v44  ;;  %3258 = vmatpush.msrb.mxu3 %v7616_v60  ;;  %v1228_v53 = vadd.f32 %v8417_v19, %v8416_v57  ;;  %v8418_v60 = vld [vmem:[#allocation34_spill] sm:$0xff]  ;;  %v7753_v44 = vand.u32 4294901760, %v1395_v45  ;;  %v7761_v57 = vand.u32 4294901760, %v1391_v29 }
 0x214   : > { %2986 = vmatmul.f32.gmra.mxu1 %v7526_v34  ;;  %3307 = vmatpush.msra.mxu0 %v7657_v17  ;;  %v1223_v18 = vadd.f32 %v8419_v20, %v8418_v60 }
 0x215   : > { %3408 = vmatpush.msra.mxu2 %v7653_v12  ;;  %2949 = vmatmul.f32.gmra.mxu0 %v7526_v34  ;;  %v7780_v12 = vsub.f32 %v1391_v29, %v7761_v57 }
 0x216   : > { %v1283_v62 = vadd.f32 %v8423_v4, %v1223_v18  ;;  %v2702_v4 = vld [vmem:[#allocation6 + $0x18] sm:$0xff] }
 0x217   : > { %3411 = vmatpush.msra.mxu2 %v7660_v54 }
 0x218   : > { %v1350_v0 = vadd.f32 %v8429_v10, %v1283_v62 }
 0x219   : > { %3414 = vmatpush.msra.mxu2 %v7668_v42  ;;  %3088 = vmatmul.f32.vlgmr.msra.gmra.mxu3 %v7490_v2 }
 0x21a   : > { %3031 = vmatmul.f32.gmra.mxu2 %v7585_v33  ;;  %3452 = vmatpush.msra.mxu3 %v7636_v8  ;;  %v1289_v33 = vadd.f32 %v8420_v38, %v1228_v53  ;;  %v1399_v56 = vadd.f32 %v8433_v16, %v1350_v0 }
 0x21b   : > { %3417 = vmatpush.msra.mxu2 %v7674_v48 }
 0x21c   : > { %2990 = vmatmul.f32.gmra.mxu1 %v7554_v1  ;;  %3454 = vmatpush.msra.mxu3 %v7643_v49  ;;  %v1354_v7 = vadd.f32 %v8427_v14, %v1289_v33  ;;  %v7749_v25 = vand.u32 4294901760, %v1399_v56  ;;  %v3845_v14 = vld [vmem:[%s8342_s6 + $0x8] sm:$0xff] }
 0x21d   : > { %2953 = vmatmul.f32.gmra.mxu0 %v7554_v1  ;;  %3855 = vperm.xlu1 %5443, %v3845_v14  }
 0x21e   : > { %3456 = vmatpush.msra.mxu3 %v7650_v26 }
 0x220   : > { %3458 = vmatpush.msra.mxu3 %v7657_v17 }
 0x221   : > { %3092 = vmatmul.f32.gmra.mxu3 %v7526_v34 }
 0x222   : > { %3039 = vmatmul.f32.gmra.mxu2 %v7624_v15  ;;  %v8431_v15 = vld [vmem:[#allocation49_spill] sm:$0xff] }
 0x223   : > { %v1403_v6 = vadd.f32 %v8431_v15, %v1354_v7 }
 0x224   : > { %2994 = vmatmul.f32.gmra.mxu1 %v7590_v27 }
 0x225   : > { %2957 = vmatmul.f32.gmra.mxu0 %v7590_v27  ;;  %v7744_v30 = vand.u32 4294901760, %v1403_v6  ;;  %3850 = vperm.xlu1 %5443, %v3844_v58  }
 0x229   : > { %3096 = vmatmul.f32.gmra.mxu3 %v7554_v1 }
 0x22a   : > { %3047 = vmatmul.f32.gmra.mxu2 %v7663_v52  ;;  %v7756_v52 = vsub.f32 %v1403_v6, %v7744_v30 }
 0x22c   : > { %3172 = vmatmul.f32.vlgmr.msrb.gmra.mxu1 %v7524_v28  ;;  %v7764_v28 = vsub.f32 %v1399_v56, %v7749_v25 }
 0x22d   : > { %3542 = vmatpush.msrb.mxu1 %v7636_v8  ;;  %3130 = vmatmul.f32.vlgmr.msrb.gmra.mxu0 %v7508_v23  ;;  %v7771_v23 = vsub.f32 %v1395_v45, %v7753_v44  ;;  %v3633_v8 = vand.u32 4294901760, %v7756_v52  ;;  %v8363_v45 = vstv %s7905_s4 }
 0x22e   : > { %3499 = vmatpush.msrb.mxu0 %v3355_v3  ;;  %v3651_v3 = vand.u32 4294901760, %v7780_v12 }
 0x22f   : > { %3544 = vmatpush.msrb.mxu1 %v7643_v49  ;;  %v2699_v49 = vld [vmem:[#allocation6] sm:$0xff] }
 0x230   : > { %3503 = vmatpush.msrb.mxu0 %v3361_v41  ;;  %v3277_v54 = vsel %vm2707_vm8, %v2699_v49, 0  ;;  %v3652_v19 = vsub.f32 %v7780_v12, %v3651_v3  ;;  %v7833_v43 = vpop.f32.mrf.mxu1  ;;  %v7888_v10 = vpop.f32.mrf.mxu2 }
 0x231   : > { %3546 = vmatpush.msrb.mxu1 %v7650_v26  ;;  %3100 = vmatmul.f32.gmra.mxu3 %v7590_v27  ;;  %v3639_v26 = vand.u32 4294901760, %v7764_v28  ;;  %8436 = vst [vmem:[#allocation28_spill] sm:$0xff] %v7833_v43  ;;  %v7910_v56 = vpop.f32.mrf.mxu3 }
 0x232   : > { %3223 = vmatmul.f32.vlgmr.msrb.gmra.mxu2 %v7490_v2  ;;  %3507 = vmatpush.msrb.mxu0 %v3367_v11  ;;  %v2700_v11 = vld [vmem:[#allocation6 + $0x8] sm:$0xff]  ;;  %8440 = vst [vmem:[#allocation31_spill] sm:$0xff] %v7888_v10 }
 0x233   : > { %3548 = vmatpush.msrb.mxu1 %v7657_v17  ;;  %3579 = vmatpush.msrb.mxu2 %v7744_v30  ;;  %v3634_v17 = vsub.f32 %v7756_v52, %v3633_v8  ;;  %v3640_v42 = vsub.f32 %v7764_v28, %v3639_v26  ;;  %v3280_v20 = vsel %vm2707_vm8, %v2700_v11, 0  ;;  %8441 = vst [vmem:[#allocation29_spill] sm:$0xff] %v7910_v56 }
 0x234   : > { %3178 = vmatmul.f32.gmra.mxu1 %v7552_v61  ;;  %3511 = vmatpush.msrb.mxu0 %v3373_v13  ;;  %v3645_v61 = vand.u32 4294901760, %v7771_v23  ;;  %v7819_v18 = vand.u32 4294901760, %v3280_v20 }
 0x235   : > { %3135 = vmatmul.f32.gmra.mxu0 %v7534_v50  ;;  %3581 = vmatpush.msrb.mxu2 %v7749_v25  ;;  %v7799_v50 = vand.u32 4294901760, %v3277_v54  ;;  %v3635_v48 = vand.u32 4294901760, %v3634_v17  ;;  %v3641_v13 = vand.u32 4294901760, %v3640_v42 }
 0x236   : > { %v3646_v41 = vsub.f32 %v7771_v23, %v3645_v61  ;;  %v7827_v33 = vsub.f32 %v3280_v20, %v7819_v18 }
 0x237   : > { %3583 = vmatpush.msrb.mxu2 %v7753_v44  ;;  %v7812_v53 = vsub.f32 %v3277_v54, %v7799_v50 }
 0x238   : > { %v3647_v60 = vand.u32 4294901760, %v3646_v41  ;;  %v7869_v31 = vpop.f32.mrf.mxu1 }
 0x239   : > { %3585 = vmatpush.msrb.mxu2 %v7761_v57  ;;  %3260 = vmatmul.f32.vlgmr.msrb.gmra.mxu3 %v7490_v2  ;;  %v7817_v2 = vand.u32 4294901760, %v7812_v53  ;;  %8438 = vst [vmem:[#allocation26_spill] sm:$0xff] %v7869_v31 }
 0x23a   : > { %3227 = vmatmul.f32.gmra.mxu2 %v7526_v34  ;;  %3636 = vmatpush.msrb.mxu3 %v3635_v48 }
 0x23b   : > { %v3311_v38 = vsub.f32 %v7812_v53, %v7817_v2 }
 0x23c   : > { %3184 = vmatmul.f32.gmra.mxu1 %v7588_v37  ;;  %3642 = vmatpush.msrb.mxu3 %v3641_v13  ;;  %v3653_v37 = vand.u32 4294901760, %v3652_v19 }
 0x23d   : > { %3140 = vmatmul.f32.gmra.mxu0 %v7570_v21  ;;  %v2701_v21 = vld [vmem:[#allocation6 + $0x10] sm:$0xff]  ;;  %v7831_v47 = vand.u32 4294901760, %v3311_v38 }
 0x23e   : > { %3648 = vmatpush.msrb.mxu3 %v3647_v60  ;;  %v3283_v63 = vsel %vm2707_vm8, %v2701_v21, 0  ;;  %v4341_v60 = vld [vmem:[%s8346_s10] sm:$0xff] }
 0x240   : > { %3654 = vmatpush.msrb.mxu3 %v3653_v37 }
 0x241   : > { %3264 = vmatmul.f32.gmra.mxu3 %v7526_v34  ;;  %v7838_v34 = vand.u32 4294901760, %v3283_v63 }
 0x242   : > { %3231 = vmatmul.f32.gmra.mxu2 %v7554_v1 }
 0x243   : > { %v7849_v9 = vsub.f32 %v3283_v63, %v7838_v34 }
 0x244   : > { %3190 = vmatmul.f32.gmra.mxu1 %v7627_v22  ;;  %v7836_v22 = vand.u32 4294901760, %v7827_v33 }
 0x245   : > { %3145 = vmatmul.f32.gmra.mxu0 %v7609_v32  ;;  %v7842_v32 = vpop.f32.mrf.mxu0  ;;  %v7860_v39 = vand.u32 4294901760, %v7849_v9 }
 0x246   : > { %8437 = vst [vmem:[#allocation33_spill] sm:$0xff] %v7842_v32  ;;  %v3319_v62 = vsub.f32 %v7827_v33, %v7836_v22 }
 0x248   : > { %v7857_v55 = vand.u32 4294901760, %v3319_v62 }
 0x249   : > { %3268 = vmatmul.f32.gmra.mxu3 %v7554_v1  ;;  %v3286_v1 = vsel %vm2707_vm8, %v2702_v4, 0 }
 0x24a   : > { %3235 = vmatmul.f32.gmra.mxu2 %v7590_v27  ;;  %v7862_v51 = vand.u32 4294901760, %v3286_v1 }
 0x24c   : > { %3378 = vmatmul.f32.vlgmr.msra.gmra.mxu1 %v7799_v50  ;;  %v7884_v24 = vsub.f32 %v3286_v1, %v7862_v51 }
 0x24d   : > { %3730 = vmatpush.msra.mxu1 %v7744_v30  ;;  %3313 = vmatmul.f32.vlgmr.msra.gmra.mxu0 %v7831_v47  ;;  %v7879_v7 = vpop.f32.mrf.mxu0 }
 0x24e   : > { %3686 = vmatpush.msra.mxu0 %v7756_v52  ;;  %8439 = vst [vmem:[#allocation27_spill] sm:$0xff] %v7879_v7  ;;  %v7893_v46 = vand.u32 4294901760, %v7884_v24  ;;  %v3846_v52 = vld [vmem:[%s8342_s6 + $0x10] sm:$0xff] }
 0x24f   : > { %3732 = vmatpush.msra.mxu1 %v7749_v25  ;;  %3860 = vperm.xlu0 %5442, %v3846_v52  }
 0x250   : > { %3689 = vmatpush.msra.mxu0 %v7764_v28  ;;  %v3335_v6 = vsub.f32 %v7884_v24, %v7893_v46 }
 0x251   : > { %3734 = vmatpush.msra.mxu1 %v7753_v44  ;;  %3272 = vmatmul.f32.gmra.mxu3 %v7590_v27  ;;  %v3327_v27 = vsub.f32 %v7849_v9, %v7860_v39 }
 0x252   : > { %3420 = vmatmul.f32.vlgmr.msra.gmra.mxu2 %v7812_v53  ;;  %3692 = vmatpush.msra.mxu0 %v7771_v23  ;;  %v3336_v40 = vand.u32 4294901760, %v3335_v6 }
 0x253   : > { %3736 = vmatpush.msra.mxu1 %v7761_v57  ;;  %3777 = vmatpush.msra.mxu2 %v3633_v8  ;;  %v3328_v0 = vand.u32 4294901760, %v3327_v27 }
 0x254   : > { %3695 = vmatpush.msra.mxu0 %v7780_v12  ;;  %3382 = vmatmul.f32.gmra.mxu1 %v7819_v18 }
 0x255   : > { %3321 = vmatmul.f32.gmra.mxu0 %v7857_v55  ;;  %3781 = vmatpush.msra.mxu2 %v3639_v26 }
 0x257   : > { %3785 = vmatpush.msra.mxu2 %v3645_v61  ;;  %4344 = vperm.xlu0 %5442, %v4341_v60  }
 0x259   : > { %3789 = vmatpush.msra.mxu2 %v3651_v3  ;;  %3462 = vmatmul.f32.vlgmr.msra.gmra.mxu3 %v7817_v2 }
 0x25a   : > { %3425 = vmatmul.f32.gmra.mxu2 %v7827_v33  ;;  %3820 = vmatpush.msra.mxu3 %v7744_v30 }
 0x25c   : > { %3386 = vmatmul.f32.gmra.mxu1 %v7838_v34  ;;  %3822 = vmatpush.msra.mxu3 %v7749_v25 }
 0x25d   : > { %3329 = vmatmul.f32.gmra.mxu0 %v3328_v0  ;;  %v2608_v15 = vpop.f32.mrf.mxu1 }
 0x25e   : > { %3824 = vmatpush.msra.mxu3 %v7753_v44 }
 0x25f   : > { %v2583_v5 = vpop.f32.mrf.mxu0 }
 0x260   : > { %3826 = vmatpush.msra.mxu3 %v7761_v57 }
 0x261   : > { %3468 = vmatmul.f32.gmra.mxu3 %v7836_v22 }
 0x262   : > { %v2526_v16 = vpop.f32.mrf.mxu2  ;;  %3430 = vmatmul.f32.gmra.mxu2 %v7849_v9 }
 0x263   : > { %v2527_v59 = vadd.f32 %v2526_v16, %v8363_v45 }
 0x264   : > { %3390 = vmatmul.f32.gmra.mxu1 %v7862_v51 }
 0x265   : > { %3337 = vmatmul.f32.gmra.mxu0 %v3336_v40 }
 0x268   : > { %v7918_v30 = vpop.f32.mrf.mxu1 }
 0x269   : > { %3474 = vmatmul.f32.gmra.mxu3 %v7860_v39 }
 0x26a   : > { %v7922_v29 = vpop.f32.mrf.mxu0  ;;  %3435 = vmatmul.f32.gmra.mxu2 %v7884_v24 }
 0x26b   : > { %v2557_v25 = vpop.f32.mrf.mxu3  ;;  %v2812_v31 = vadd.f32 %v7918_v30, %v7922_v29 }
 0x26c   : > { %v2635_v44 = vpop.f32.mrf.mxu2  ;;  %v2558_v57 = vadd.f32 %v2557_v25, %v2527_v59  ;;  %3550 = vmatmul.f32.vlgmr.msrb.gmra.mxu1 %v7799_v50 }
 0x26d   : > { %3513 = vmatmul.f32.vlgmr.msrb.gmra.mxu0 %v7799_v50 }
 0x26e   : > { %v2584_v28 = vadd.f32 %v2583_v5, %v2558_v57 }
 0x270   : > { %v2609_v23 = vadd.f32 %v2608_v15, %v2584_v28  ;;  %v7931_v8 = vpop.f32.mrf.mxu1 }
 0x271   : > { %3480 = vmatmul.f32.gmra.mxu3 %v7893_v46 }
 0x272   : > { %v7933_v49 = vpop.f32.mrf.mxu0  ;;  %v2636_v12 = vadd.f32 %v2635_v44, %v2609_v23  ;;  %3591 = vmatmul.f32.vlgmr.msrb.gmra.mxu2 %v7831_v47 }
 0x273   : > { %v2658_v17 = vpop.f32.mrf.mxu3 }
 0x274   : > { %3554 = vmatmul.f32.gmra.mxu1 %v7819_v18  ;;  %v7941_v61 = vadd.f32 %v2658_v17, %v2636_v12 }
 0x275   : > { %v7937_v26 = vpop.f32.mrf.mxu2  ;;  %3517 = vmatmul.f32.gmra.mxu0 %v7819_v18 }
 0x276   : > { %8442 = vst [vmem:[#allocation35_spill] sm:$0xff] %v7941_v61  ;;  %v2816_v61 = vadd.f32 %v7931_v8, %v7933_v49  ;;  %v2854_v32 = vadd.f32 %v7937_v26, %v2812_v31 }
 0x278   : > { %v7943_v54 = vpop.f32.mrf.mxu1 }
 0x279   : > { %3656 = vmatmul.f32.vlgmr.msrb.gmra.mxu3 %v7799_v50 }
 0x27a   : > { %v7945_v42 = vpop.f32.mrf.mxu0  ;;  %3599 = vmatmul.f32.gmra.mxu2 %v7857_v55 }
 0x27b   : > { %v7953_v48 = vpop.f32.mrf.mxu3  ;;  %v2820_v10 = vadd.f32 %v7943_v54, %v7945_v42 }
 0x27c   : > { %3558 = vmatmul.f32.gmra.mxu1 %v7838_v34 }
 0x27d   : > { %v7949_v3 = vpop.f32.mrf.mxu2  ;;  %3521 = vmatmul.f32.gmra.mxu0 %v7838_v34 }
 0x27e   : > { %v2859_v43 = vadd.f32 %v7949_v3, %v2816_v61 }
 0x280   : > { %v7955_v41 = vpop.f32.mrf.mxu1 }
 0x281   : > { %3660 = vmatmul.f32.gmra.mxu3 %v7819_v18 }
 0x282   : > { %v7957_v11 = vpop.f32.mrf.mxu0  ;;  %3607 = vmatmul.f32.gmra.mxu2 %v3328_v0 }
 0x283   : > { %v2824_v61 = vadd.f32 %v7955_v41, %v7957_v11  ;;  %v8079_v11 = vpop.permute.xlu0 %3865 }
 0x284   : > { %3562 = vmatmul.f32.gmra.mxu1 %v7862_v51  ;;  %v7964_v19 = vpop.f32.mrf.mxu3 }
 0x285   : > { %v7960_v13 = vpop.f32.mrf.mxu2  ;;  %3525 = vmatmul.f32.gmra.mxu0 %v7862_v51 }
 0x286   : > { %v2864_v8 = vadd.f32 %v7960_v13, %v2820_v10 }
 0x288   : > { %v7969_v20 = vpop.f32.mrf.mxu1 }
 0x289   : > { %3664 = vmatmul.f32.gmra.mxu3 %v7838_v34 }
 0x28a   : > { %v7971_v37 = vpop.f32.mrf.mxu0  ;;  %3615 = vmatmul.f32.gmra.mxu2 %v3336_v40 }
 0x28c   : > { %3740 = vmatmul.f32.vlgmr.msra.gmra.mxu1 %v7817_v2  ;;  %v7978_v38 = vpop.f32.mrf.mxu3 }
 0x28d   : > { %v7974_v21 = vpop.f32.mrf.mxu2  ;;  %3698 = vmatmul.f32.vlgmr.msra.gmra.mxu0 %v7812_v53  ;;  %v2908_v29 = vadd.f32 %v7978_v38, %v2864_v8 }
 0x28e   : > { %v2869_v3 = vadd.f32 %v7974_v21, %v2824_v61 }
 0x291   : > { %v7980_v63 = vpop.f32.mrf.mxu1  ;;  %3668 = vmatmul.f32.gmra.mxu3 %v7862_v51 }
 0x292   : > { %v7982_v47 = vpop.f32.mrf.mxu0  ;;  %3791 = vmatmul.f32.vlgmr.msra.gmra.mxu2 %v7799_v50 }
 0x294   : > { %3746 = vmatmul.f32.gmra.mxu1 %v7836_v22  ;;  %v7990_v62 = vpop.f32.mrf.mxu3 }
 0x295   : > { %v7986_v4 = vpop.f32.mrf.mxu2  ;;  %3703 = vmatmul.f32.gmra.mxu0 %v7827_v33 }
 0x299   : > { %v7992_v2 = vpop.f32.mrf.mxu1  ;;  %3828 = vmatmul.f32.vlgmr.msra.gmra.mxu3 %v7799_v50 }
 0x29a   : > { %v7994_v53 = vpop.f32.mrf.mxu0  ;;  %3795 = vmatmul.f32.gmra.mxu2 %v7819_v18 }
 0x29c   : > { %3752 = vmatmul.f32.gmra.mxu1 %v7860_v39  ;;  %v8002_v55 = vpop.f32.mrf.mxu3 }
 0x29d   : > { %v7998_v1 = vpop.f32.mrf.mxu2  ;;  %3708 = vmatmul.f32.gmra.mxu0 %v7849_v9 }
 0x2a1   : > { %v8004_v22 = vpop.f32.mrf.mxu1  ;;  %3832 = vmatmul.f32.gmra.mxu3 %v7819_v18 }
 0x2a2   : > { %v8006_v33 = vpop.f32.mrf.mxu0  ;;  %3799 = vmatmul.f32.gmra.mxu2 %v7838_v34 }
 0x2a4   : > { %3758 = vmatmul.f32.gmra.mxu1 %v7893_v46  ;;  %v8014_v50 = vpop.f32.mrf.mxu3 }
 0x2a5   : > { %v8010_v14 = vpop.f32.mrf.mxu2  ;;  %3713 = vmatmul.f32.gmra.mxu0 %v7884_v24 }
 0x2a9   : > { %v8016_v39 = vpop.f32.mrf.mxu1  ;;  %3836 = vmatmul.f32.gmra.mxu3 %v7838_v34 }
 0x2aa   : > { %v8018_v9 = vpop.f32.mrf.mxu0  ;;  %3803 = vmatmul.f32.gmra.mxu2 %v7862_v51 }
 0x2ac   : > { %v8024_v36 = vpop.f32.mrf.mxu3 }
 0x2ad   : > { %v8022_v27 = vpop.f32.mrf.mxu2 }
 0x2b1   : > { %v8026_v18 = vpop.f32.mrf.mxu1  ;;  %3840 = vmatmul.f32.gmra.mxu3 %v7862_v51 }
 0x2b2   : > { %v8028_v0 = vpop.f32.mrf.mxu0 }
 0x2b4   : > { %v8033_v46 = vpop.f32.mrf.mxu3 }
 0x2b5   : > { %v8031_v24 = vpop.f32.mrf.mxu2 }
 0x2b9   : > { %v8035_v58 = vpop.f32.mrf.mxu1 }
 0x2ba   : > { %v8037_v15 = vpop.f32.mrf.mxu0 }
 0x2bc   : > { %v8041_v34 = vpop.f32.mrf.mxu3 }
 0x2bd   : > { %v8039_v6 = vpop.f32.mrf.mxu2 }
 0x2c1   : > { %v8043_v5 = vpop.f32.mrf.mxu1 }
 0x2c2   : > { %8443 = vst [vmem:[#allocation46_spill] sm:$0xff] %v8043_v5  ;;  %v8045_v40 = vpop.f32.mrf.mxu0 }
 0x2c3   : > { %8444 = vst [vmem:[#allocation34_spill] sm:$0xff] %v8045_v40 }
 0x2c4   : > { %v8049_v35 = vpop.f32.mrf.mxu3 }
 0x2c5   : > { %v8047_v16 = vpop.f32.mrf.mxu2 }
 0x2c9   : > { %v3379_v51 = vpop.f32.mrf.mxu1 }
 0x2ca   : > { %v3314_v59 = vpop.f32.mrf.mxu0 }
 0x2cc   : > { %v8053_v44 = vpop.f32.mrf.mxu3 }
 0x2cd   : > { %v8051_v25 = vpop.f32.mrf.mxu2  ;;  %8446 = vst [vmem:[#allocation50_spill] sm:$0xff] %v8053_v44  ;;  %v2896_v44 = vadd.f32 %v7953_v48, %v2854_v32 }
 0x2ce   : > { %8445 = vst [vmem:[#allocation42_spill] sm:$0xff] %v8051_v25 }
 0x2cf   : > { %v2947_v30 = vadd.f32 %v7971_v37, %v2896_v44  ;;  %v8082_v44 = vpop.permute.xlu1 %3855 }
 0x2d1   : > { %v3383_v52 = vpop.f32.mrf.mxu1  ;;  %v2984_v26 = vadd.f32 %v7969_v20, %v2947_v30 }
 0x2d2   : > { %v3322_v57 = vpop.f32.mrf.mxu0 }
 0x2d3   : > { %v3315_v13 = vadd.f32 %v3314_v59, %v2984_v26  ;;  %v3884_v26 = vld [vmem:[#allocation9] sm:$0xff] }
 0x2d4   : > { %v8055_v23 = vpop.f32.mrf.mxu3 }
 0x2d5   : > { %v3421_v28 = vpop.f32.mrf.mxu2  ;;  %8447 = vst [vmem:[#allocation32_spill] sm:$0xff] %v8055_v23  ;;  %v2902_v23 = vadd.f32 %v7964_v19, %v2859_v43  ;;  %v2955_v43 = vadd.f32 %v7994_v53, %v2908_v29  ;;  %v2914_v19 = vadd.f32 %v7990_v62, %v2869_v3  ;;  %v3380_v53 = vadd.f32 %v3379_v51, %v3315_v13 }
 0x2d7   : > { %v2951_v49 = vadd.f32 %v7982_v47, %v2902_v23  ;;  %v2992_v48 = vadd.f32 %v7992_v2, %v2955_v43 }
 0x2d9   : > { %v3387_v12 = vpop.f32.mrf.mxu1  ;;  %v2988_v31 = vadd.f32 %v7980_v63, %v2951_v49  ;;  %v2959_v63 = vadd.f32 %v8006_v33, %v2914_v19 }
 0x2da   : > { %v3330_v17 = vpop.f32.mrf.mxu0 }
 0x2db   : > { %v3323_v32 = vadd.f32 %v3322_v57, %v2988_v31  ;;  %v3331_v38 = vadd.f32 %v3330_v17, %v2992_v48  ;;  %v3422_v57 = vadd.f32 %v3421_v28, %v3380_v53  ;;  %v2996_v62 = vadd.f32 %v8004_v22, %v2959_v63  ;;  %v8087_v31 = vpop.permute.xlu0 %3860  ;;  %v3885_v63 = vld [vmem:[#allocation9 + $0x8] sm:$0xff] }
 0x2dc   : > { %v3463_v45 = vpop.f32.mrf.mxu3 }
 0x2dd   : > { %v3426_v60 = vpop.f32.mrf.mxu2  ;;  %v3384_v37 = vadd.f32 %v3383_v52, %v3323_v32  ;;  %v3388_v23 = vadd.f32 %v3387_v12, %v3331_v38  ;;  %v3464_v59 = vadd.f32 %v3463_v45, %v3422_v57  ;;  %v8091_v32 = vpop.permute.xlu1 %3850 }
 0x2df   : > { %v3427_v20 = vadd.f32 %v3426_v60, %v3384_v37 }
 0x2e1   : > { %v3391_v7 = vpop.f32.mrf.mxu1 }
 0x2e2   : > { %v3338_v56 = vpop.f32.mrf.mxu0 }
 0x2e3   : > { %v3339_v49 = vadd.f32 %v3338_v56, %v2996_v62 }
 0x2e4   : > { %v3469_v5 = vpop.f32.mrf.mxu3 }
 0x2e5   : > { %v3431_v25 = vpop.f32.mrf.mxu2  ;;  %v3470_v21 = vadd.f32 %v3469_v5, %v3427_v20  ;;  %v3392_v28 = vadd.f32 %v3391_v7, %v3339_v49 }
 0x2e6   : > { %v3432_v52 = vadd.f32 %v3431_v25, %v3388_v23 }
 0x2e9   : > { %v3551_v40 = vpop.f32.mrf.mxu1 }
 0x2ea   : > { %v3514_v54 = vpop.f32.mrf.mxu0 }
 0x2eb   : > { %v3515_v30 = vadd.f32 %v3514_v54, %v3464_v59  ;;  %v3899_v54 = vsel %vm2707_vm8, %v3884_v26, 0 }
 0x2ec   : > { %v3475_v10 = vpop.f32.mrf.mxu3  ;;  %v8099_v37 = vand.u32 4294901760, %v3899_v54 }
 0x2ed   : > { %v3436_v42 = vpop.f32.mrf.mxu2  ;;  %v3476_v29 = vadd.f32 %v3475_v10, %v3432_v52  ;;  %v3552_v12 = vadd.f32 %v3551_v40, %v3515_v30 }
 0x2ee   : > { %v3437_v22 = vadd.f32 %v3436_v42, %v3392_v28  ;;  %v8111_v23 = vsub.f32 %v3899_v54, %v8099_v37 }
 0x2ef   : > { %v3868_v10 = vadd.f32 %v8091_v32, %v3552_v12 }
 0x2f0   : > { %v8121_v49 = vand.u32 4294901760, %v8111_v23 }
 0x2f1   : > { %v3555_v47 = vpop.f32.mrf.mxu1  ;;  %v3876_v38 = vmax.f32 %v3868_v10, 0.0 }
 0x2f2   : > { %v3518_v41 = vpop.f32.mrf.mxu0  ;;  %v3927_v26 = vsub.f32 %v8111_v23, %v8121_v49 }
 0x2f3   : > { %v3519_v17 = vadd.f32 %v3518_v41, %v3470_v21  ;;  %v3902_v21 = vsel %vm2707_vm8, %v3885_v63, 0  ;;  %v3090_v63 = vadd.f32 %v8002_v55, %v7986_v4 }
 0x2f4   : > { %v3481_v2 = vpop.f32.mrf.mxu3  ;;  %v8123_v30 = vand.u32 4294901760, %v3902_v21 }
 0x2f5   : > { %v8084_v8 = vpop.f32.mrf.mxu2  ;;  %v3556_v51 = vadd.f32 %v3555_v47, %v3519_v17  ;;  %v3482_v3 = vadd.f32 %v3481_v2, %v3437_v22  ;;  %v8114_v2 = vand.u32 4294901760, %v3876_v38 }
 0x2f6   : > { %v8139_v22 = vsub.f32 %v3902_v21, %v8123_v30  ;;  %v3098_v21 = vadd.f32 %v8024_v36, %v8010_v14 }
 0x2f7   : > { %v3870_v56 = vadd.f32 %v8082_v44, %v3556_v51 }
 0x2f8   : > { %v3142_v55 = vadd.f32 %v8037_v15, %v3098_v21 }
 0x2f9   : > { %v3559_v61 = vpop.f32.mrf.mxu1  ;;  %v3878_v13 = vmax.f32 %v3870_v56, 0.0 }
 0x2fa   : > { %v3522_v33 = vpop.f32.mrf.mxu0 }
 0x2fb   : > { %v3523_v60 = vadd.f32 %v3522_v33, %v3476_v29  ;;  %v8107_v20 = vand.u32 4294901760, %v3878_v13  ;;  %v3972_v29 = vsub.f32 %v3876_v38, %v8114_v2 }
 0x2fc   : > { %v8093_v45 = vpop.f32.mrf.mxu3 }
 0x2fd   : > { %v3560_v5 = vadd.f32 %v3559_v61, %v3523_v60  ;;  %v8089_v43 = vpop.f32.mrf.mxu2  ;;  %v3966_v17 = vsub.f32 %v3878_v13, %v8107_v20  ;;  %v3973_v54 = vand.u32 4294901760, %v3972_v29  ;;  %v3094_v13 = vadd.f32 %v8014_v50, %v7998_v1 }
 0x2ff   : > { %v3872_v25 = vadd.f32 %v8087_v31, %v3560_v5  ;;  %v3967_v5 = vand.u32 4294901760, %v3966_v17 }
 0x301   : > { %v3880_v7 = vmax.f32 %v3872_v25, 0.0  ;;  %v3563_v48 = vpop.f32.mrf.mxu1 }
 0x302   : > { %v3526_v40 = vpop.f32.mrf.mxu0 }
 0x303   : > { %v3527_v19 = vadd.f32 %v3526_v40, %v3482_v3  ;;  %v8101_v47 = vand.u32 4294901760, %v3880_v7  ;;  %v8147_v40 = vand.u32 4294901760, %v3927_v26 }
 0x304   : > { %v8105_v53 = vpop.f32.mrf.mxu3 }
 0x305   : > { %v3564_v42 = vadd.f32 %v3563_v48, %v3527_v19  ;;  %v8103_v41 = vpop.f32.mrf.mxu2  ;;  %v3960_v59 = vsub.f32 %v3880_v7, %v8101_v47  ;;  %v3968_v7 = vsub.f32 %v3966_v17, %v3967_v5  ;;  %v8150_v48 = vand.u32 4294901760, %v8139_v22 }
 0x307   : > { %v3874_v57 = vadd.f32 %v8079_v11, %v3564_v42  ;;  %v3961_v51 = vand.u32 4294901760, %v3960_v59  ;;  %v3974_v42 = vsub.f32 %v3972_v29, %v3973_v54  ;;  %v3969_v1 = vand.u32 4294901760, %v3968_v7  ;;  %v8451_v7 = vld [vmem:[#allocation42_spill] sm:$0xff] }
 0x308   : > { %v3935_v50 = vsub.f32 %v8139_v22, %v8150_v48 }
 0x309   : > { %v3882_v62 = vmax.f32 %v3874_v57, 0.0  ;;  %v3962_v25 = vsub.f32 %v3960_v59, %v3961_v51  ;;  %v8143_v10 = vpop.f32.mrf.mxu1 }
 0x30a   : > { %v8131_v60 = vpop.f32.mrf.mxu0  ;;  %v8172_v36 = vand.u32 4294901760, %v3935_v50 }
 0x30b   : > { %v8117_v52 = vand.u32 4294901760, %v3882_v62  ;;  %v3963_v38 = vand.u32 4294901760, %v3962_v25 }
 0x30c   : > { %v8133_v28 = vpop.f32.mrf.mxu3 }
 0x30d   : > { %v3954_v61 = vsub.f32 %v3882_v62, %v8117_v52  ;;  %3917 = vmatpush.msrb.mxu0 %v8117_v52  ;;  %4034 = vmatpush.msrb.mxu3 %v8117_v52  ;;  %v8129_v33 = vpop.f32.mrf.mxu2  ;;  %v3137_v62 = vadd.f32 %v8028_v0, %v3094_v13 }
 0x30f   : > { %3919 = vmatpush.msrb.mxu0 %v8101_v47  ;;  %4000 = vmatpush.msrb.mxu2 %v3954_v61  ;;  %v3955_v12 = vand.u32 4294901760, %v3954_v61  ;;  %v3180_v14 = vadd.f32 %v8026_v18, %v3137_v62  ;;  %v3102_v18 = vadd.f32 %v8033_v46, %v8022_v27 }
 0x310   : > { %4036 = vmatpush.msrb.mxu3 %v8101_v47 }
 0x311   : > { %3921 = vmatpush.msrb.mxu0 %v8107_v20  ;;  %4003 = vmatpush.msrb.mxu2 %v3960_v59  ;;  %v3956_v56 = vsub.f32 %v3954_v61, %v3955_v12  ;;  %v3132_v59 = vadd.f32 %v8018_v9, %v3090_v63  ;;  %v3186_v9 = vadd.f32 %v8035_v58, %v3142_v55 }
 0x312   : > { %4038 = vmatpush.msrb.mxu3 %v8107_v20  ;;  %v3704_v4 = vpop.f32.mrf.mxu0  ;;  %v3229_v61 = vadd.f32 %v8039_v6, %v3180_v14 }
 0x313   : > { %3923 = vmatpush.msrb.mxu0 %v8114_v2  ;;  %4006 = vmatpush.msrb.mxu2 %v3966_v17  ;;  %v3957_v3 = vand.u32 4294901760, %v3956_v56  ;;  %v3975_v17 = vand.u32 4294901760, %v3974_v42  ;;  %v3174_v0 = vadd.f32 %v8016_v39, %v3132_v59  ;;  %v3233_v39 = vadd.f32 %v8047_v16, %v3186_v9 }
 0x314   : > { %4040 = vmatpush.msrb.mxu3 %v8114_v2  ;;  %v8159_v57 = vpop.f32.mrf.mxu3  ;;  %3929 = vmatmul.f32.vlgmr.msrb.gmra.mxu0 %v8147_v40 }
 0x315   : > { %4069 = vmatpush.msra.mxu0 %v3955_v12  ;;  %3958 = vmatpush.msrb.mxu1 %v3957_v3  ;;  %v8155_v19 = vpop.f32.mrf.mxu2  ;;  %v3225_v15 = vadd.f32 %v8031_v24, %v3174_v0  ;;  %v8448_v24 = vld [vmem:[#allocation34_spill] sm:$0xff] }
 0x316   : > { %4009 = vmatpush.msrb.mxu2 %v3972_v29  ;;  %4044 = vmatmul.f32.vlgmr.msrb.gmra.mxu3 %v8121_v49  ;;  %v3747_v29 = vpop.f32.mrf.mxu1  ;;  %v3147_v6 = vadd.f32 %v8448_v24, %v3102_v18 }
 0x317   : > { %4073 = vmatpush.msra.mxu0 %v3961_v51  ;;  %4012 = vmatmul.f32.vlgmr.msrb.gmra.mxu2 %v8111_v23  ;;  %v3262_v58 = vadd.f32 %v8041_v34, %v3225_v15  ;;  %v8450_v34 = vld [vmem:[#allocation46_spill] sm:$0xff] }
 0x318   : > { %3964 = vmatpush.msrb.mxu1 %v3963_v38  ;;  %v8452_v38 = vld [vmem:[#allocation32_spill] sm:$0xff] }
 0x319   : > { %4077 = vmatpush.msra.mxu0 %v3967_v5  ;;  %v3266_v5 = vadd.f32 %v8049_v35, %v3229_v61  ;;  %v3593_v46 = vadd.f32 %v8084_v8, %v3262_v58 }
 0x31a   : > { %3970 = vmatpush.msrb.mxu1 %v3969_v1  ;;  %v3709_v27 = vpop.f32.mrf.mxu0 }
 0x31b   : > { %4081 = vmatpush.msra.mxu0 %v3973_v54  ;;  %v3601_v56 = vadd.f32 %v8089_v43, %v3266_v5  ;;  %v3658_v25 = vadd.f32 %v8093_v45, %v3593_v46 }
 0x31c   : > { %3976 = vmatpush.msrb.mxu1 %v3975_v17  ;;  %v3829_v12 = vpop.f32.mrf.mxu3  ;;  %3937 = vmatmul.f32.gmra.mxu0 %v8172_v36 }
 0x31d   : > { %3978 = vmatmul.f32.vlgmr.msrb.gmra.mxu1 %v8099_v37  ;;  %v3796_v51 = vpop.f32.mrf.mxu2  ;;  %v3662_v35 = vadd.f32 %v8105_v53, %v3601_v56  ;;  %v3700_v8 = vadd.f32 %v8131_v60, %v3658_v25  ;;  %v3887_v53 = vld [vmem:[%s8344_s8 + $0x8] sm:$0xff] }
 0x31e   : > { %4104 = vmatpush.msra.mxu1 %v8117_v52  ;;  %4050 = vmatmul.f32.gmra.mxu3 %v8150_v48  ;;  %v8449_v52 = vld [vmem:[#allocation50_spill] sm:$0xff]  ;;  %v3753_v3 = vpop.f32.mrf.mxu1 }
 0x31f   : > { %4017 = vmatmul.f32.gmra.mxu2 %v8139_v22  ;;  %v3270_v26 = vadd.f32 %v8449_v52, %v3233_v39  ;;  %v3705_v43 = vadd.f32 %v3704_v4, %v3662_v35  ;;  %3895 = vperm.xlu2 %5444, %v3887_v53  }
 0x320   : > { %4106 = vmatpush.msra.mxu1 %v8101_v47  ;;  %v3192_v47 = vadd.f32 %v8450_v34, %v3147_v6 }
 0x321   : > { %v3609_v16 = vadd.f32 %v8103_v41, %v3270_v26  ;;  %v3748_v42 = vadd.f32 %v3747_v29, %v3705_v43 }
 0x322   : > { %4108 = vmatpush.msra.mxu1 %v8107_v20  ;;  %v3237_v13 = vadd.f32 %v8451_v7, %v3192_v47  ;;  %v3714_v1 = vpop.f32.mrf.mxu0 }
 0x323   : > { %v3666_v54 = vadd.f32 %v8133_v28, %v3609_v16  ;;  %v3742_v28 = vadd.f32 %v8143_v10, %v3700_v8  ;;  %v3797_v62 = vadd.f32 %v3796_v51, %v3748_v42 }
 0x324   : > { %4110 = vmatpush.msra.mxu1 %v8114_v2  ;;  %v3833_v20 = vpop.f32.mrf.mxu3  ;;  %4083 = vmatmul.f32.vlgmr.msra.gmra.mxu0 %v8099_v37  ;;  %v3274_v45 = vadd.f32 %v8452_v38, %v3237_v13 }
 0x325   : > { %3982 = vmatmul.f32.gmra.mxu1 %v8123_v30  ;;  %v3710_v41 = vadd.f32 %v3709_v27, %v3666_v54  ;;  %v3800_v2 = vpop.f32.mrf.mxu2  ;;  %v3793_v50 = vadd.f32 %v8155_v19, %v3742_v28  ;;  %v3834_v4 = vadd.f32 %v3833_v20, %v3797_v62 }
 0x326   : > { %v3617_v63 = vadd.f32 %v8129_v33, %v3274_v45  ;;  %v3886_v33 = vld [vmem:[%s8344_s8] sm:$0xff]  ;;  %v3759_v10 = vpop.f32.mrf.mxu1 }
 0x327   : > { %v3754_v21 = vadd.f32 %v3753_v3, %v3710_v41  ;;  %v3830_v17 = vadd.f32 %v3829_v12, %v3793_v50  ;;  %3890 = vperm.xlu2 %5444, %v3886_v33   ;;  %v3871_v29 = vadd.f32 %v8082_v44, %v3834_v4  ;;  %v4340_v45 = vld [vmem:[#allocation11] sm:$0xff] }
 0x328   : > { %v3670_v60 = vadd.f32 %v8159_v57, %v3617_v63  ;;  %v4348_v63 = vsel %vm2339_vm7, %v4340_v45, 0 }
 0x329   : > { %v3801_v59 = vadd.f32 %v3800_v2, %v3754_v21  ;;  %v3869_v19 = vadd.f32 %v8091_v32, %v3830_v17  ;;  %v3879_v51 = vmax.f32 %v3871_v29, 0.0 }
 0x32a   : > { %v3715_v14 = vadd.f32 %v3714_v1, %v3670_v60  ;;  %v8241_v60 = vand.u32 4294901760, %v4348_v63 }
 0x32b   : > { %v3877_v39 = vmax.f32 %v3869_v19, 0.0  ;;  %v4136_v24 = vand.u32 4294901760, %v3879_v51 }
 0x32c   : > { %v3837_v55 = vpop.f32.mrf.mxu3  ;;  %4087 = vmatmul.f32.gmra.mxu0 %v8123_v30  ;;  %v3760_v61 = vadd.f32 %v3759_v10, %v3715_v14 }
 0x32d   : > { %4112 = vmatmul.f32.vlgmr.msra.gmra.mxu1 %v8099_v37  ;;  %v3838_v0 = vadd.f32 %v3837_v55, %v3801_v59  ;;  %v3804_v9 = vpop.f32.mrf.mxu2  ;;  %v4138_v52 = vand.u32 4294901760, %v3877_v39  ;;  %v4182_v56 = vsub.f32 %v3879_v51, %v4136_v24  ;;  %v8244_v55 = vsub.f32 %v4348_v63, %v8241_v60  ;;  %v4674_v63 = vld [vmem:[%s8347_s11] sm:$0x1] }
 0x32e   : > { %v3805_v12 = vadd.f32 %v3804_v9, %v3760_v61 }
 0x32f   : > { %v3873_v57 = vadd.f32 %v8087_v31, %v3838_v0  ;;  %v4188_v32 = vsub.f32 %v3877_v39, %v4138_v52  ;;  %v4183_v35 = vand.u32 4294901760, %v4182_v56  ;;  %v8247_v10 = vand.u32 4294901760, %v8244_v55 }
 0x331   : > { %v3881_v15 = vmax.f32 %v3873_v57, 0.0  ;;  %v4184_v54 = vsub.f32 %v4182_v56, %v4183_v35  ;;  %v4371_v19 = vsub.f32 %v8244_v55, %v8247_v10 }
 0x333   : > { %v4134_v5 = vand.u32 4294901760, %v3881_v15  ;;  %v4185_v20 = vand.u32 4294901760, %v4184_v54 }
 0x334   : > { %v3841_v18 = vpop.f32.mrf.mxu3 }
 0x335   : > { %4116 = vmatmul.f32.gmra.mxu1 %v8123_v30  ;;  %v3842_v58 = vadd.f32 %v3841_v18, %v3805_v12  ;;  %v4176_v26 = vsub.f32 %v3881_v15, %v4134_v5  ;;  %v4372_v12 = vand.u32 4294901760, %v4371_v19 }
 0x337   : > { %v3875_v6 = vadd.f32 %v8079_v11, %v3842_v58  ;;  %v4177_v46 = vand.u32 4294901760, %v4176_v26  ;;  %v4189_v11 = vand.u32 4294901760, %v4188_v32 }
 0x339   : > { %v3883_v44 = vmax.f32 %v3875_v6, 0.0  ;;  %v4178_v47 = vsub.f32 %v4176_v26, %v4177_v46  ;;  %v4190_v3 = vsub.f32 %v4188_v32, %v4189_v11 }
 0x33b   : > { %v4132_v31 = vand.u32 4294901760, %v3883_v44  ;;  %v4179_v43 = vand.u32 4294901760, %v4178_v47  ;;  %v4191_v7 = vand.u32 4294901760, %v4190_v3 }
 0x33d   : > { %v4170_v27 = vsub.f32 %v3883_v44, %v4132_v31  ;;  %4133 = vmatpush.msra.mxu2 %v4132_v31  ;;  %4250 = vmatpush.msrb.mxu1 %v4132_v31 }
 0x33f   : > { %4135 = vmatpush.msra.mxu2 %v4134_v5  ;;  %4216 = vmatpush.msrb.mxu0 %v4170_v27  ;;  %v4171_v16 = vand.u32 4294901760, %v4170_v27 }
 0x340   : > { %4252 = vmatpush.msrb.mxu1 %v4134_v5 }
 0x341   : > { %4137 = vmatpush.msra.mxu2 %v4136_v24  ;;  %4219 = vmatpush.msrb.mxu0 %v4176_v26  ;;  %v4172_v34 = vsub.f32 %v4170_v27, %v4171_v16 }
 0x342   : > { %4254 = vmatpush.msrb.mxu1 %v4136_v24 }
 0x343   : > { %4139 = vmatpush.msra.mxu2 %v4138_v52  ;;  %4222 = vmatpush.msrb.mxu0 %v4182_v56  ;;  %v4173_v25 = vand.u32 4294901760, %v4172_v34 }
 0x344   : > { %4256 = vmatpush.msrb.mxu1 %v4138_v52  ;;  %4145 = vmatmul.f32.vlgmr.msra.gmra.mxu2 %v8147_v40 }
 0x345   : > { %4285 = vmatpush.msrb.mxu2 %v4171_v16  ;;  %4174 = vmatpush.msra.mxu3 %v4173_v25 }
 0x346   : > { %4225 = vmatpush.msrb.mxu0 %v4188_v32  ;;  %4260 = vmatmul.f32.vlgmr.msrb.gmra.mxu1 %v8121_v49 }
 0x347   : > { %4289 = vmatpush.msrb.mxu2 %v4177_v46  ;;  %4180 = vmatpush.msra.mxu3 %v4179_v43 }
 0x348   : > { %4228 = vmatmul.f32.vlgmr.msrb.gmra.mxu0 %v8111_v23 }
 0x349   : > { %4293 = vmatpush.msrb.mxu2 %v4183_v35  ;;  %4186 = vmatpush.msra.mxu3 %v4185_v20 }
 0x34b   : > { %4297 = vmatpush.msrb.mxu2 %v4189_v11  ;;  %4192 = vmatpush.msra.mxu3 %v4191_v7 }
 0x34c   : > { %4153 = vmatmul.f32.gmra.mxu2 %v8172_v36  ;;  %4194 = vmatmul.f32.vlgmr.msra.gmra.mxu3 %v8099_v37 }
 0x34d   : > { %4320 = vmatpush.msrb.mxu3 %v4132_v31 }
 0x34e   : > { %4266 = vmatmul.f32.gmra.mxu1 %v8150_v48 }
 0x34f   : > { %4322 = vmatpush.msrb.mxu3 %v4134_v5 }
 0x350   : > { %4233 = vmatmul.f32.gmra.mxu0 %v8139_v22 }
 0x351   : > { %4324 = vmatpush.msrb.mxu3 %v4136_v24 }
 0x353   : > { %4326 = vmatpush.msrb.mxu3 %v4138_v52 }
 0x354   : > { %4198 = vmatmul.f32.gmra.mxu3 %v8123_v30  ;;  %4299 = vmatmul.f32.vlgmr.msrb.gmra.mxu2 %v8099_v37 }
 0x35c   : > { %4303 = vmatmul.f32.gmra.mxu2 %v8123_v30  ;;  %4328 = vmatmul.f32.vlgmr.msrb.gmra.mxu3 %v8099_v37 }
 0x364   : > { %4332 = vmatmul.f32.gmra.mxu3 %v8123_v30 }
 0x379   : > { %v8234_v23 = vpop.permute.xlu2 %3895 }
 0x381   : > { %v8236_v49 = vpop.permute.xlu2 %3890 }
 0x391   : > { %v3930_v40 = vpop.f32.mrf.mxu0 }
 0x392   : > { %v3931_v48 = vadd.f32 %v3930_v40, %v8236_v49 }
 0x399   : > { %v3938_v8 = vpop.f32.mrf.mxu0  ;;  %v4045_v41 = vpop.f32.mrf.mxu3 }
 0x39a   : > { %v3979_v22 = vpop.f32.mrf.mxu1  ;;  %v4013_v36 = vpop.f32.mrf.mxu2  ;;  %v3939_v53 = vadd.f32 %v3938_v8, %v8234_v23 }
 0x39b   : > { %v3980_v13 = vadd.f32 %v3979_v22, %v3931_v48 }
 0x39d   : > { %v4014_v2 = vadd.f32 %v4013_v36, %v3980_v13 }
 0x39f   : > { %v4046_v42 = vadd.f32 %v4045_v41, %v4014_v2 }
 0x3a1   : > { %v4084_v28 = vpop.f32.mrf.mxu0  ;;  %v4051_v1 = vpop.f32.mrf.mxu3 }
 0x3a2   : > { %v3983_v38 = vpop.f32.mrf.mxu1  ;;  %v4018_v30 = vpop.f32.mrf.mxu2  ;;  %v4085_v21 = vadd.f32 %v4084_v28, %v4046_v42 }
 0x3a3   : > { %v3984_v37 = vadd.f32 %v3983_v38, %v3939_v53 }
 0x3a5   : > { %v4019_v62 = vadd.f32 %v4018_v30, %v3984_v37 }
 0x3a7   : > { %v4052_v4 = vadd.f32 %v4051_v1, %v4019_v62 }
 0x3a9   : > { %v4088_v14 = vpop.f32.mrf.mxu0 }
 0x3aa   : > { %v4113_v50 = vpop.f32.mrf.mxu1  ;;  %v4089_v33 = vadd.f32 %v4088_v14, %v4052_v4 }
 0x3ab   : > { %v4114_v59 = vadd.f32 %v4113_v50, %v4085_v21  ;;  %v4677_v21 = vsel %vm4675_vm9, %v4674_v63, 0  ;;  %v4345_v50 = vpop.permute.xlu0 %4344  ;;  %vm5018_vm9 = vcmask 1040384  }
 0x3ac   : > { %v8266_v1 = vand.u32 4294901760, %v4677_v21 }
 0x3ad   : > { %v4336_v17 = vmax.f32 %v4114_v59, 0.0 }
 0x3af   : > { %v4366_v0 = vand.u32 4294901760, %v4336_v17 }
 0x3b1   : > { %v4398_v57 = vsub.f32 %v4336_v17, %v4366_v0  ;;  %v4697_v17 = vsub.f32 %v4677_v21, %v8266_v1 }
 0x3b2   : > { %v4117_v29 = vpop.f32.mrf.mxu1 }
 0x3b3   : > { %v4118_v9 = vadd.f32 %v4117_v29, %v4089_v33  ;;  %v4399_v51 = vand.u32 4294901760, %v4398_v57 }
 0x3b5   : > { %v4338_v61 = vmax.f32 %v4118_v9, 0.0  ;;  %v4400_v5 = vsub.f32 %v4398_v57, %v4399_v51 }
 0x3b7   : > { %v4364_v15 = vand.u32 4294901760, %v4338_v61  ;;  %v4401_v6 = vand.u32 4294901760, %v4400_v5 }
 0x3b9   : > { %v4392_v18 = vsub.f32 %v4338_v61, %v4364_v15  ;;  %4365 = vmatpush.msra.mxu0 %v4364_v15  ;;  %4449 = vmatpush.msra.mxu3 %v4364_v15 }
 0x3bb   : > { %v4393_v39 = vand.u32 4294901760, %v4392_v18  ;;  %4367 = vmatpush.msra.mxu0 %v4366_v0  ;;  %4424 = vmatpush.msra.mxu2 %v4392_v18 }
 0x3bc   : > { %4373 = vmatmul.f32.vlgmr.msra.gmra.mxu0 %v4372_v12  ;;  %4451 = vmatpush.msra.mxu3 %v4366_v0 }
 0x3bd   : > { %v4394_v58 = vsub.f32 %v4392_v18, %v4393_v39  ;;  %4427 = vmatpush.msra.mxu2 %v4398_v57  ;;  %4455 = vmatmul.f32.vlgmr.msra.gmra.mxu3 %v8247_v10 }
 0x3be   : > { %4430 = vmatmul.f32.vlgmr.msra.gmra.mxu2 %v8244_v55  ;;  %4476 = vmatpush.msrb.mxu0 %v4393_v39 }
 0x3bf   : > { %v4395_v24 = vand.u32 4294901760, %v4394_v58 }
 0x3c0   : > { %4480 = vmatpush.msrb.mxu0 %v4399_v51 }
 0x3c1   : > { %4396 = vmatpush.msra.mxu1 %v4395_v24 }
 0x3c3   : > { %4402 = vmatpush.msra.mxu1 %v4401_v6  ;;  %v4261_v32 = vpop.f32.mrf.mxu1 }
 0x3c4   : > { %4404 = vmatmul.f32.vlgmr.msra.gmra.mxu1 %v8241_v60  ;;  %4482 = vmatmul.f32.vlgmr.msrb.gmra.mxu0 %v8241_v60 }
 0x3c5   : > { %4501 = vmatpush.msrb.mxu1 %v4364_v15  ;;  %v4229_v56 = vpop.f32.mrf.mxu0 }
 0x3c7   : > { %4503 = vmatpush.msrb.mxu1 %v4366_v0  ;;  %v4146_v52 = vpop.f32.mrf.mxu2 }
 0x3c8   : > { %v4147_v31 = vadd.f32 %v4146_v52, %v8236_v49 }
 0x3cb   : > { %v4267_v7 = vpop.f32.mrf.mxu1 }
 0x3cc   : > { %4505 = vmatmul.f32.vlgmr.msrb.gmra.mxu1 %v8241_v60 }
 0x3cd   : > { %v4234_v25 = vpop.f32.mrf.mxu0 }
 0x3cf   : > { %v4154_v44 = vpop.f32.mrf.mxu2  ;;  %v4195_v26 = vpop.f32.mrf.mxu3 }
 0x3d0   : > { %v4196_v27 = vadd.f32 %v4195_v26, %v4147_v31  ;;  %v4155_v34 = vadd.f32 %v4154_v44, %v8234_v23 }
 0x3d2   : > { %v4230_v16 = vadd.f32 %v4229_v56, %v4196_v27 }
 0x3d4   : > { %v4262_v47 = vadd.f32 %v4261_v32, %v4230_v16 }
 0x3d7   : > { %v4199_v46 = vpop.f32.mrf.mxu3  ;;  %v4300_v35 = vpop.f32.mrf.mxu2 }
 0x3d8   : > { %v4200_v11 = vadd.f32 %v4199_v46, %v4155_v34  ;;  %v4301_v54 = vadd.f32 %v4300_v35, %v4262_v47 }
 0x3da   : > { %v4235_v3 = vadd.f32 %v4234_v25, %v4200_v11 }
 0x3dc   : > { %v4268_v22 = vadd.f32 %v4267_v7, %v4235_v3  ;;  %v8453_v3 = vstv %s7905_s4  ;;  %s5333_s4 = sshll.u32 %s5808_s29, 1  ;;  %s528_s29 = scalar_lea.vmem [#allocation13], %s8293_s22 }
 0x3dd   : > { %s5037_s24 = scalar_lea.hbm %s8349_s13, %s5333_s4  ;;  %s5039_s30 = sshll.u32 %s528_s29, 4  ;;  %s5040_s30 = int_to_ptr.vmem [resolvable:$true] %s5039_s30 }
 0x3de   : > { %s5041_s14 = sshll.u32 %s5037_s24, 4  ;;  %s5042_s14 = int_to_ptr.hbm [resolvable:$true] %s5041_s14 }
 0x3df   : > { %v4329_v43 = vpop.f32.mrf.mxu3  ;;  %v4304_v48 = vpop.f32.mrf.mxu2  ;;  %s5640_s28 = sshra.s32 %s5042_s14, 4  ;;  %s5641_s28 = int_to_ptr.hbm [resolvable:$true] %s5640_s28 }
 0x3e0   : > { %v4330_v20 = vadd.f32 %v4329_v43, %v4301_v54  ;;  %v4305_v49 = vadd.f32 %v4304_v48, %v4268_v22  ;;  %v8456_v22 = vld [vmem:[#allocation31_spill] sm:$0xff]  ;;  %s5642_s17 = scalar_lea.hbm %s5641_s28, 2  ;;  %p5647_p3 = scmp.lt.s32.totalorder %s5641_s28, %s8349_s13 }
 0x3e1   : > { %p5643_p0 = scmp.ne.s32.totalorder %s5641_s28, %s5642_s17  ;;  %p5648_p4 = scmp.lt.s32.totalorder %s5646_s18, %s5642_s17 }
 0x3e2   : > { %v4337_v40 = vmax.f32 %v4330_v20, 0.0  ;;  %v8454_v20 = vld [vmem:[#allocation33_spill] sm:$0xff] }
 0x3e3   : > { %v2368_v7 = vadd.f32 %v8454_v20, %v8453_v3  ;;  %p5644_p1 = pnand %p5643_p0, %p5825_p5  ;;  %p5649_p7 = por %p5648_p4, %p5647_p3 }
 0x3e4   : > { %v4525_v36 = vand.u32 4294901760, %v4337_v40 }
 0x3e5   : > { %p5645_p2 = pneg %p5644_p1 }
 0x3e6   : > { %v4557_v41 = vsub.f32 %v4337_v40, %v4525_v36  ;;  %v8455_v40 = vld [vmem:[#allocation28_spill] sm:$0xff] }
 0x3e7   : > { %v4333_v13 = vpop.f32.mrf.mxu3  ;;  %v2399_v48 = vadd.f32 %v8455_v40, %v2368_v7  ;;  %p5650_p8 = pnand %p5649_p7, %p5645_p2 }
 0x3e8   : > { %v4334_v8 = vadd.f32 %v4333_v13, %v4305_v49  ;;  %v4558_v23 = vand.u32 4294901760, %v4557_v41 }
 0x3e9   : > { %v2425_v49 = vadd.f32 %v8456_v22, %v2399_v48 }
 0x3ea   : > { %v4339_v53 = vmax.f32 %v4334_v8, 0.0  ;;  %v4559_v42 = vsub.f32 %v4557_v41, %v4558_v23  ;;  %v8458_v8 = vld [vmem:[#allocation27_spill] sm:$0xff] }
 0x3ec   : > { %v4523_v2 = vand.u32 4294901760, %v4339_v53  ;;  %v4560_v28 = vand.u32 4294901760, %v4559_v42 }
 0x3ee   : > { %v4551_v38 = vsub.f32 %v4339_v53, %v4523_v2  ;;  %4524 = vmatpush.msrb.mxu2 %v4523_v2  ;;  %4608 = vmatpush.msra.mxu1 %v4523_v2  ;;  %v8459_v53 = vld [vmem:[#allocation26_spill] sm:$0xff] }
 0x3f0   : > { %v4552_v45 = vand.u32 4294901760, %v4551_v38  ;;  %4526 = vmatpush.msrb.mxu2 %v4525_v36  ;;  %4583 = vmatpush.msra.mxu0 %v4551_v38 }
 0x3f1   : > { %4610 = vmatpush.msra.mxu1 %v4525_v36  ;;  %4532 = vmatmul.f32.vlgmr.msrb.gmra.mxu2 %v4372_v12 }
 0x3f2   : > { %v4553_v37 = vsub.f32 %v4551_v38, %v4552_v45  ;;  %4586 = vmatpush.msra.mxu0 %v4557_v41  ;;  %4635 = vmatpush.msra.mxu2 %v4552_v45 }
 0x3f3   : > { %4589 = vmatmul.f32.vlgmr.msra.gmra.mxu0 %v8244_v55  ;;  %4614 = vmatmul.f32.vlgmr.msra.gmra.mxu1 %v8247_v10 }
 0x3f4   : > { %4639 = vmatpush.msra.mxu2 %v4558_v23  ;;  %v4554_v30 = vand.u32 4294901760, %v4553_v37  ;;  %v8460_v37 = vld [vmem:[#allocation35_spill] sm:$0xff] }
 0x3f5   : > { %v5327_v42 = vmul.f32 -1.442695, %v8460_v37 }
 0x3f6   : > { %4555 = vmatpush.msrb.mxu3 %v4554_v30 }
 0x3f8   : > { %4561 = vmatpush.msrb.mxu3 %v4560_v28 }
 0x3f9   : > { %4563 = vmatmul.f32.vlgmr.msrb.gmra.mxu3 %v8241_v60  ;;  %4641 = vmatmul.f32.vlgmr.msra.gmra.mxu2 %v8241_v60 }
 0x3fa   : > { %4660 = vmatpush.msra.mxu3 %v4523_v2 }
 0x3fc   : > { %4662 = vmatpush.msra.mxu3 %v4525_v36  ;;  %v8457_v36 = vld [vmem:[#allocation29_spill] sm:$0xff] }
 0x3fd   : > { %v2450_v13 = vadd.f32 %v8457_v36, %v2425_v49 }
 0x3ff   : > { %v2477_v41 = vadd.f32 %v8458_v8, %v2450_v13 }
 0x401   : > { %4664 = vmatmul.f32.vlgmr.msra.gmra.mxu3 %v8241_v60  ;;  %v4698_v60 = vand.u32 4294901760, %v4697_v17  ;;  %v2500_v2 = vadd.f32 %v8459_v53, %v2477_v41 }
 0x403   : > { %v4699_v19 = vsub.f32 %v4697_v17, %v4698_v60  ;;  %v5326_v38 = vmul.f32 -1.442695, %v2500_v2 }
 0x405   : > { %v4700_v51 = vand.u32 4294901760, %v4699_v19  ;;  %5445 = vpow2.f32 %v5326_v38 }
 0x40b   : > { %v5446_v23 = vpop.eup %5445 }
 0x40c   : > { %v2667_v45 = vadd.f32 1.0, %v5446_v23 }
 0x40e   : > { %5447 = vrcp.f32 %v2667_v45  ;;  %vm2674_vm10 = vweird.f32 %v2667_v45 }
 0x40f   : > { %5449 = vpow2.f32 %v5327_v42 }
 0x414   : > { %v5448_v30 = vpop.eup %5447 }
 0x415   : > { %v2670_v28 = vmul.f32 %v5448_v30, %v2667_v45  ;;  %vm2675_vm11 = vweird.f32 %v5448_v30 }
 0x416   : > { %vm2676_vm12 = vmor %vm2674_vm10, %vm2675_vm11 }
 0x439   : > { %v4374_v62 = vpop.f32.mrf.mxu0 }
 0x43a   : > { %v4375_v59 = vadd.f32 %v4374_v62, %v4345_v50  ;;  %v5450_v62 = vpop.eup %5449 }
 0x440   : > { %v4456_v0 = vpop.f32.mrf.mxu3 }
 0x441   : > { %v4405_v4 = vpop.f32.mrf.mxu1  ;;  %v4431_v55 = vpop.f32.mrf.mxu2 }
 0x442   : > { %v4406_v14 = vadd.f32 %v4405_v4, %v4375_v59  ;;  %v4483_v10 = vpop.f32.mrf.mxu0  ;;  %v2668_v4 = vadd.f32 1.0, %v5450_v62 }
 0x444   : > { %v4432_v33 = vadd.f32 %v4431_v55, %v4406_v14  ;;  %5451 = vrcp.f32 %v2668_v4  ;;  %vm2689_vm15 = vweird.f32 %v2668_v4 }
 0x446   : > { %v4457_v29 = vadd.f32 %v4456_v0, %v4432_v33  ;;  %v2680_v0 = vand.u32 2147483648, %v2667_v45 }
 0x448   : > { %v4484_v57 = vadd.f32 %v4483_v10, %v4457_v29 }
 0x449   : > { %v4506_v9 = vpop.f32.mrf.mxu1 }
 0x44a   : > { %v4507_v61 = vadd.f32 %v4506_v9, %v4484_v57  ;;  %v2681_v57 = vor.u32 1.1754944e-38, %v2680_v0 }
 0x44c   : > { %v4668_v15 = vmax.f32 %v4507_v61, 0.0  ;;  %v5452_v61 = vpop.eup %5451 }
 0x44d   : > { %vm2690_vm14 = vweird.f32 %v5452_v61 }
 0x44e   : > { %v4694_v12 = vand.u32 4294901760, %v4668_v15  ;;  %vm2691_vm0 = vmor %vm2689_vm15, %vm2690_vm14 }
 0x450   : > { %v4721_v18 = vsub.f32 %v4668_v15, %v4694_v12  ;;  %4695 = vmatpush.msrb.mxu0 %v4694_v12  ;;  %4771 = vmatpush.msrb.mxu3 %v4694_v12 }
 0x451   : > { %4701 = vmatmul.f32.vlgmr.msrb.gmra.mxu0 %v4700_v51  ;;  %4775 = vmatmul.f32.vlgmr.msrb.gmra.mxu3 %v4698_v60 }
 0x452   : > { %v4722_v39 = vand.u32 4294901760, %v4721_v18  ;;  %4748 = vmatpush.msrb.mxu2 %v4721_v18 }
 0x453   : > { %4751 = vmatmul.f32.vlgmr.msrb.gmra.mxu2 %v4697_v17 }
 0x454   : > { %v4723_v5 = vsub.f32 %v4721_v18, %v4722_v39  ;;  %4797 = vmatpush.msra.mxu0 %v4722_v39  ;;  %v2685_v39 = vmul.f32 %v5452_v61, %v2668_v4 }
 0x456   : > { %v4724_v58 = vand.u32 4294901760, %v4723_v5 }
 0x458   : > { %4725 = vmatpush.msrb.mxu1 %v4724_v58 }
 0x459   : > { %4727 = vmatmul.f32.vlgmr.msrb.gmra.mxu1 %v8266_v1  ;;  %4799 = vmatmul.f32.vlgmr.msra.gmra.mxu0 %v8266_v1 }
 0x45a   : > { %4819 = vmatpush.msra.mxu1 %v4694_v12  ;;  %v4671_v12 = vstv %s8284_s20 }
 0x461   : > { %4821 = vmatmul.f32.vlgmr.msra.gmra.mxu1 %v8266_v1 }
 0x470   : > { %v4590_v44 = vpop.f32.mrf.mxu0  ;;  %v4615_v31 = vpop.f32.mrf.mxu1 }
 0x474   : > { %v4533_v24 = vpop.f32.mrf.mxu2 }
 0x475   : > { %v4534_v6 = vadd.f32 %v4533_v24, %v4345_v50  ;;  %v2671_v50 = vsub.f32 1.0, %v2670_v28  ;;  %v2686_v24 = vsub.f32 1.0, %v2685_v39 }
 0x47c   : > { %v4564_v52 = vpop.f32.mrf.mxu3  ;;  %v4642_v27 = vpop.f32.mrf.mxu2 }
 0x47d   : > { %v4565_v26 = vadd.f32 %v4564_v52, %v4534_v6  ;;  %v4974_v6 = vstv %s8286_s16 }
 0x47f   : > { %v4591_v56 = vadd.f32 %v4590_v44, %v4565_v26  ;;  %v2687_v26 = vmul.f32 %v5452_v61, %v2686_v24 }
 0x481   : > { %v4616_v32 = vadd.f32 %v4615_v31, %v4591_v56  ;;  %v2688_v56 = vadd.f32 %v5452_v61, %v2687_v26 }
 0x483   : > { %v4643_v46 = vadd.f32 %v4642_v27, %v4616_v32 }
 0x484   : > { %v4665_v16 = vpop.f32.mrf.mxu3 }
 0x485   : > { %v4666_v35 = vadd.f32 %v4665_v16, %v4643_v46  ;;  %v2695_v46 = vand.u32 2147483648, %v2668_v4 }
 0x487   : > { %v4669_v34 = vmax.f32 %v4666_v35, 0.0  ;;  %v2693_v35 = vand.u32 2147483647, %v2668_v4 }
 0x489   : > { %v4840_v47 = vand.u32 4294901760, %v4669_v34  ;;  %vm2694_vm1 = vcmp.eq.f32.partialorder %v2693_v35, 8.507059e+37 }
 0x48b   : > { %v4867_v11 = vsub.f32 %v4669_v34, %v4840_v47  ;;  %4841 = vmatpush.msra.mxu2 %v4840_v47  ;;  %4917 = vmatpush.msrb.mxu1 %v4840_v47 }
 0x48c   : > { %4847 = vmatmul.f32.vlgmr.msra.gmra.mxu2 %v4700_v51  ;;  %4921 = vmatmul.f32.vlgmr.msrb.gmra.mxu1 %v4698_v60  ;;  %v2678_v60 = vand.u32 2147483647, %v2667_v45 }
 0x48d   : > { %v4868_v25 = vand.u32 4294901760, %v4867_v11  ;;  %4894 = vmatpush.msrb.mxu0 %v4867_v11 }
 0x48e   : > { %4897 = vmatmul.f32.vlgmr.msrb.gmra.mxu0 %v4697_v17  ;;  %v2672_v17 = vmul.f32 %v5448_v30, %v2671_v50  ;;  %vm2679_vm13 = vcmp.eq.f32.partialorder %v2678_v60, 8.507059e+37  ;;  %v8464_v60 = vlaneseq }
 0x48f   : > { %v4869_v54 = vsub.f32 %v4867_v11, %v4868_v25  ;;  %4943 = vmatpush.msrb.mxu2 %v4868_v25  ;;  %v2692_v11 = vsel %vm2691_vm0, %v5452_v61, %v2688_v56 }
 0x490   : > { %v2673_v10 = vadd.f32 %v5448_v30, %v2672_v17  ;;  %vm5023_vm11 = vcmp.lt.s32.totalorder %v8464_v60, 256 }
 0x491   : > { %v4870_v43 = vand.u32 4294901760, %v4869_v54  ;;  %v2696_v54 = vor.u32 1.1754944e-38, %v2695_v46 }
 0x492   : > { %v2677_v19 = vsel %vm2676_vm12, %v5448_v30, %v2673_v10 }
 0x493   : > { %4871 = vmatpush.msra.mxu3 %v4870_v43  ;;  %v2682_v51 = vsel %vm2679_vm13, %v2681_v57, %v2677_v19  ;;  %v2697_v3 = vsel %vm2694_vm1, %v2696_v54, %v2692_v11 }
 0x494   : > { %4873 = vmatmul.f32.vlgmr.msra.gmra.mxu3 %v8266_v1  ;;  %4945 = vmatmul.f32.vlgmr.msrb.gmra.mxu2 %v8266_v1  ;;  %v4672_v5 = vmul.f32 %v4671_v12, %v2682_v51  ;;  %v4673_v48 = vmul.f32 %v4671_v12, %v2697_v3 }
 0x495   : > { %4965 = vmatpush.msrb.mxu3 %v4840_v47 }
 0x49c   : > { %4967 = vmatmul.f32.vlgmr.msrb.gmra.mxu3 %v8266_v1 }
 0x4ce   : > { %v4702_v21 = vpop.f32.mrf.mxu0 }
 0x4d4   : > { %v4776_v14 = vpop.f32.mrf.mxu3 }
 0x4d6   : > { %v4728_v63 = vpop.f32.mrf.mxu1  ;;  %v4752_v59 = vpop.f32.mrf.mxu2 }
 0x4d7   : > { %v4729_v1 = vadd.f32 %v4728_v63, %v4702_v21  ;;  %v4800_v29 = vpop.f32.mrf.mxu0 }
 0x4d9   : > { %v4753_v55 = vadd.f32 %v4752_v59, %v4729_v1 }
 0x4db   : > { %v4777_v33 = vadd.f32 %v4776_v14, %v4753_v55 }
 0x4dd   : > { %v4801_v9 = vadd.f32 %v4800_v29, %v4777_v33 }
 0x4de   : > { %v4822_v15 = vpop.f32.mrf.mxu1 }
 0x4df   : > { %v4823_v18 = vadd.f32 %v4822_v15, %v4801_v9 }
 0x4e1   : > { %v4971_v58 = vadd.f32 %v4823_v18, %v4672_v5 }
 0x4e3   : > { %v4975_v44 = vadd.f32 %v4974_v6, %v4971_v58 }
 0x4e5   : > { %v5330_v31 = vmul.f32 -1.442695, %v4975_v44 }
 0x4e7   : > { %5453 = vpow2.f32 %v5330_v31 }
 0x4ed   : > { %v5454_v40 = vpop.eup %5453 }
 0x4ee   : > { %v4983_v36 = vadd.f32 1.0, %v5454_v40 }
 0x4f0   : > { %5455 = vrcp.f32 %v4983_v36  ;;  %vm4990_vm4 = vweird.f32 %v4983_v36  ;;  %v4996_v1 = vand.u32 2147483648, %v4983_v36  ;;  %v4994_v59 = vand.u32 2147483647, %v4983_v36 }
 0x4f2   : > { %v4997_v0 = vor.u32 1.1754944e-38, %v4996_v1  ;;  %vm4995_vm10 = vcmp.eq.f32.partialorder %v4994_v59, 8.507059e+37 }
 0x4f6   : > { %v5456_v41 = vpop.eup %5455 }
 0x4f7   : > { %v4986_v38 = vmul.f32 %v5456_v41, %v4983_v36  ;;  %vm4991_vm2 = vweird.f32 %v5456_v41 }
 0x4f8   : > { %vm8299_vm5 = vmor %vm4990_vm4, %vm4991_vm2 }
 0x4f9   : > { %v4987_v23 = vsub.f32 1.0, %v4986_v38 }
 0x4fb   : > { %v4988_v42 = vmul.f32 %v5456_v41, %v4987_v23 }
 0x4fd   : > { %v4989_v63 = vadd.f32 %v5456_v41, %v4988_v42 }
 0x4ff   : > { %v4993_v17 = vsel %vm8299_vm5, %v5456_v41, %v4989_v63 }
 0x500   : > { %v4998_v29 = vsel %vm4995_vm10, %v4997_v0, %v4993_v17 }
 0x509   : > { %v4922_v34 = vpop.f32.mrf.mxu1 }
 0x50b   : > { %v4898_v32 = vpop.f32.mrf.mxu0 }
 0x50f   : > { %v4848_v52 = vpop.f32.mrf.mxu2 }
 0x517   : > { %v4874_v27 = vpop.f32.mrf.mxu3  ;;  %v4946_v25 = vpop.f32.mrf.mxu2 }
 0x518   : > { %v4875_v16 = vadd.f32 %v4874_v27, %v4848_v52 }
 0x51a   : > { %v4899_v47 = vadd.f32 %v4898_v32, %v4875_v16 }
 0x51c   : > { %v4923_v43 = vadd.f32 %v4922_v34, %v4899_v47 }
 0x51e   : > { %v4947_v20 = vadd.f32 %v4946_v25, %v4923_v43 }
 0x51f   : > { %v4968_v7 = vpop.f32.mrf.mxu3 }
 0x520   : > { %v4969_v22 = vadd.f32 %v4968_v7, %v4947_v20 }
 0x522   : > { %v4972_v49 = vadd.f32 %v4969_v22, %v4673_v48 }
 0x524   : > { %v4976_v13 = vadd.f32 %v4974_v6, %v4972_v49 }
 0x526   : > { %v5331_v8 = vmul.f32 -1.442695, %v4976_v13 }
 0x528   : > { %5457 = vpow2.f32 %v5331_v8 }
 0x52e   : > { %v5458_v53 = vpop.eup %5457 }
 0x52f   : > { %v4984_v2 = vadd.f32 1.0, %v5458_v53 }
 0x531   : > { %5459 = vrcp.f32 %v4984_v2  ;;  %v5011_v28 = vand.u32 2147483648, %v4984_v2  ;;  %v5009_v62 = vand.u32 2147483647, %v4984_v2  ;;  %vm5005_vm6 = vweird.f32 %v4984_v2 }
 0x533   : > { %v5012_v55 = vor.u32 1.1754944e-38, %v5011_v28  ;;  %vm5010_vm8 = vcmp.eq.f32.partialorder %v5009_v62, 8.507059e+37 }
 0x537   : > { %v5460_v45 = vpop.eup %5459 }
 0x538   : > { %v5001_v37 = vmul.f32 %v5460_v45, %v4984_v2  ;;  %vm5006_vm3 = vweird.f32 %v5460_v45 }
 0x539   : > { %vm5007_vm7 = vmor %vm5005_vm6, %vm5006_vm3 }
 0x53a   : > { %v5002_v30 = vsub.f32 1.0, %v5001_v37 }
 0x53c   : > { %v5003_v21 = vmul.f32 %v5460_v45, %v5002_v30 }
 0x53e   : > { %v5004_v4 = vadd.f32 %v5460_v45, %v5003_v21 }
 0x540   : > { %v5008_v14 = vsel %vm5007_vm7, %v5460_v45, %v5004_v4 }
 0x541   : > { %v5013_v33 = vsel %vm5010_vm8, %v5012_v55, %v5008_v14 }
 0x542   : > { %v5017_v10 = vrot.slane %v5013_v33, 7 }
 0x544   : > { %v5019_v57 = vsel %vm5018_vm9, %v4998_v29, %v5017_v10 }
 0x545   : > { %5025 = vst.msk [vmem:[%s528_s29] sm:$0x3] %vm5023_vm11, %v5019_v57 }
 0x546   : > { %5653 = shalt.err (!%p5650_p8)
}
 0x547   : > { %5361 = dma.vmem_to_hbm [thread:$0]  (%p5825_p5), %s5040_s30, 32, %s5042_s14, %s5027_s15  }
 0x548 PF: > { %s8465_s21 = sld [smem:[#allocation21_spill]] }
 0x549   : > { %s8466_s22 = sld [smem:[#allocation19_spill]] }
 0x54e   : > { %p5398_p9 = scmp.ge.s32.totalorder %s8465_s21, 2 }
 0x54f   : > { %s5053_s27 = sand.u32 1, %s8466_s22  }
 0x550   : > { %p5383_p10 = pnand %p5398_p9, %p5829_p6  ;;  %s5054_s23 = scalar_lea.sflag [#allocation4], %s5053_s27 }
 0x552   : > { %p5384_p11 = pneg %p5383_p10 }
 0x554   : > { %5687 = dma.done.wait (%p5384_p11), %s5054_s23, 32  }
 0x555   : > { %5689 = vsyncadd (%p5384_p11), %s5054_s23, 4294967264  ;;  %s8468_s28 = sld [smem:[#allocation22_spill]]  ;;  %s8471_s25 = smov %s5696_s26 }
 0x556   : > { %s8469_s24 = sld [smem:[#allocation20_spill]] }
 0x557   : > { %s8470_s27 = sld [smem:[#allocation23_spill]] }
 0x55b   : > { %p27_p12 = scmp.ge.s32.totalorder %s8468_s28, 4  }
 0x55c   : > { %s8472_s26 = smov %s8469_s24 }
 0x55d   :  { %29 = sbr.rel (!%p27_p12) target bundleno = 10 (0xa), region = 133 }
 0x562   :  { %5060 = vsyncpa [#allocation3], 1 }
 0x563   :  { %5062 = vsyncpa [#allocation3 + $0x1], 1 }
 0x564   :  { %5063 = vsyncpa [#allocation7], 1 }
 0x565   :  { %5064 = vsyncpa [#allocation10], 1 }
 0x566   :  { %5065 = vsyncpa [#allocation4], 1 }
 0x567   :  { %5067 = vsyncpa [#allocation4 + $0x1], 1 }
 0x568   :  { %5068 = vsyncpa [#allocation5], 1 }
 0x569   :  { %5070 = vsyncpa [#allocation5 + $0x1], 1 }

</bundles_post_ra>
